<compile_context>
chip_gen: v5e
topology: v5e:2x2
jax: 0.10.0
libtpu: 0.0.40
codegen_flags: <defaults>
</compile_context>

<pallas_src>
import functools
import math

import jax
import jax.numpy as jnp
from jax.experimental import pallas as pl
from jax.experimental.pallas import tpu as pltpu

_MIB = 1024 * 1024
_TARGET_BLOCK_BYTES = 8 * _MIB          # channel-tile size for the tiled path


def _vmem_capacity_bytes():
    try:
        cap = getattr(pltpu.get_tpu_info(), "vmem_capacity_bytes", None)
        if cap:
            return int(cap)
    except Exception:
        pass
    return 64 * _MIB                    # conservative default (v7x per-TC)


def _acc_rows(rows):
    """Sublane row count of the partial-reduction accumulators (divides rows)."""
    if rows <= 8:
        return rows
    if rows % 8 == 0:
        return 8
    return math.gcd(rows, 8)


def _pick_c_tile(C, HW, itemsize):
    """Channel tile: multiple of 8 (or the full C) near the block-byte target."""
    if C * HW * itemsize <= _TARGET_BLOCK_BYTES:
        return C
    t = (_TARGET_BLOCK_BYTES // (HW * itemsize)) // 8 * 8
    t = max(8, t)
    return min(t, C)


def _tile_partials(x_ref, rows, R, valid_rows=None):
    """Reduce the (1, rows, HW) block behind `x_ref` over its row axis into
    (R, HW) float32 partial sum / max using a pure in-register group
    reduction (no full-tile scratch).  `rows` is a multiple of R.  If
    `valid_rows` (runtime scalar) is given, rows with index >= valid_rows are
    masked (0 for the sum, -inf for the max)."""
    g = rows // R

    def load(i):
        xi = x_ref[0, i * R:(i + 1) * R, :].astype(jnp.float32)
        if valid_rows is None:
            return xi, xi
        idx = jax.lax.broadcasted_iota(jnp.int32, (R, 1), 0) + i * R
        ok = idx < valid_rows
        return jnp.where(ok, xi, 0.0), jnp.where(ok, xi, -jnp.inf)

    s, m = load(0)
    for i in range(1, g):
        si, mi = load(i)
        s = s + si
        m = jnp.maximum(m, mi)
    return s, m


def _conv_sigmoid(avg, mx, w_ref, hw_ref, H, W, K):
    """'Same' KxK cross-correlation of the 2-channel (avg, max) map with the
    conv weights, then sigmoid.  Works on the flattened (1, HW) lane axis:
    one pltpu.roll per tap on the stacked (2, HW) plane; zero padding is a
    precomputed row/col validity mask."""
    HW = H * W
    pad = K // 2

    plane = jnp.concatenate([avg, mx], axis=0)                  # (2, HW) f32
    hh = hw_ref[0:1, :]                                         # (1, HW) i32
    ww = hw_ref[1:2, :]

    # 7 + 7 offset-validity masks hoisted out of the tap loop.
    row_ok = [(hh >= -d) & (hh < H - d) for d in range(-pad, pad + 1)]
    col_ok = [(ww >= -d) & (ww < W - d) for d in range(-pad, pad + 1)]

    # Weight scalars (OIHW flattened, O=1, I=(avg, max)), hoisted SMEM reads.
    w_avg = [w_ref[t] for t in range(K * K)]
    w_max = [w_ref[K * K + t] for t in range(K * K)]
    is_max_row = jax.lax.broadcasted_iota(jnp.int32, (2, 1), 0) == 1

    acc = jnp.zeros((2, HW), jnp.float32)
    for ki in range(K):
        di = ki - pad
        for kj in range(K):
            dj = kj - pad
            t = ki * K + kj
            amt = (-(di * W + dj)) % HW      # rolled[p] == plane[p + di*W + dj]
            rolled = plane if amt == 0 else pltpu.roll(plane, amt, 1)
            wcol = jnp.where(is_max_row, w_max[t], w_avg[t])    # (2, 1)
            valid = row_ok[ki] & col_ok[kj]                     # (1, HW)
            acc = acc + jnp.where(valid, rolled * wcol, 0.0)

    conv = jnp.sum(acc, axis=0, keepdims=True)                  # (1, HW)
    return jax.nn.sigmoid(conv)


def _fused_kernel(x_ref, w_ref, hw_ref, o_ref, *, C, R, H, W, K):
    """Whole batch resident in VMEM: reduce -> conv -> sigmoid -> multiply."""
    s, m = _tile_partials(x_ref, C, R)
    avg = jnp.sum(s, axis=0, keepdims=True) * (1.0 / C)
    mx = jnp.max(m, axis=0, keepdims=True)
    y = _conv_sigmoid(avg, mx, w_ref, hw_ref, H, W, K)          # (1, HW) f32
    x = x_ref[0]
    o_ref[0] = x * y.astype(x.dtype)


def _attn_map_kernel(x_ref, w_ref, hw_ref, y_ref, sum_acc, max_acc,
                     *, C, c_tile, R, H, W, K, n_c, has_partial):
    """Tiled pass 1: accumulate channel sum/max partials along the
    'arbitrary' C axis; conv + sigmoid in the finalize step."""
    c = pl.program_id(1)

    def step(valid_rows=None):
        s, m = _tile_partials(x_ref, c_tile, R, valid_rows)

        @pl.when(c == 0)
        def _():
            sum_acc[...] = s
            max_acc[...] = m

        @pl.when(c > 0)
        def _():
            sum_acc[...] = sum_acc[...] + s
            max_acc[...] = jnp.maximum(max_acc[...], m)

    if has_partial:
        @pl.when(c == n_c - 1)
        def _():
            step(C - c * c_tile)          # mask channels past C in the last tile

        @pl.when(c < n_c - 1)
        def _():
            step()
    else:
        step()

    @pl.when(c == n_c - 1)
    def _finalize():
        avg = jnp.sum(sum_acc[...], axis=0, keepdims=True) * (1.0 / C)
        mx = jnp.max(max_acc[...], axis=0, keepdims=True)
        y_ref[0] = _conv_sigmoid(avg, mx, w_ref, hw_ref, H, W, K).astype(y_ref.dtype)


def _apply_kernel(x_ref, y_ref, o_ref):
    """Tiled pass 2: out = x * y, y broadcast over the channel tile."""
    x = x_ref[...]                         # (1, c_tile, HW)
    o_ref[...] = x * y_ref[...].astype(x.dtype)


def sattention_layer(x, conv_weight, *, force_two_pass=False, c_tile_override=None):
    """x: (B, C, H, W); conv_weight: (1, 2, K, K) with K in (3, 7)."""
    B, C, H, W = x.shape
    K = conv_weight.shape[-1]
    assert conv_weight.shape == (1, 2, K, K) and K in (3, 7)
    HW = H * W
    itemsize = x.dtype.itemsize

    x3 = x.reshape(B, C, HW)                               # lane-dense view
    w_flat = conv_weight.reshape(-1).astype(jnp.float32)   # (2*K*K,) -> SMEM
    # Precomputed (h, w) coordinates of every flattened pixel (no in-kernel div/mod).
    hh = jnp.repeat(jnp.arange(H, dtype=jnp.int32), W)
    ww = jnp.tile(jnp.arange(W, dtype=jnp.int32), H)
    hw_idx = jnp.stack([hh, ww], axis=0)                   # (2, HW)

    cap = _vmem_capacity_bytes()
    vmem_limit = max(32 * _MIB, min(cap - 8 * _MIB, 112 * _MIB))

    per_batch = C * HW * itemsize
    epilogue = 64 * HW * 4                                 # conv / reduce temporaries (f32)
    use_fused = (not force_two_pass) and (
        4 * per_batch + epilogue + 2 * _MIB <= vmem_limit - 4 * _MIB)

    if use_fused:
        kernel = functools.partial(_fused_kernel, C=C, R=_acc_rows(C),
                                   H=H, W=W, K=K)
        out3 = pl.pallas_call(
            kernel,
            out_shape=jax.ShapeDtypeStruct((B, C, HW), x.dtype),
            grid_spec=pltpu.PrefetchScalarGridSpec(
                num_scalar_prefetch=0,
                grid=(B,),
                in_specs=[
                    pl.BlockSpec((1, C, HW), lambda b: (b, 0, 0)),
                    pl.BlockSpec(memory_space=pltpu.MemorySpace.SMEM),
                    pl.BlockSpec((2, HW), lambda b: (0, 0)),
                ],
                out_specs=pl.BlockSpec((1, C, HW), lambda b: (b, 0, 0)),
            ),
            compiler_params=pltpu.CompilerParams(
                dimension_semantics=("parallel",),
                vmem_limit_bytes=vmem_limit),
        )(x3, w_flat, hw_idx)
        return out3.reshape(B, C, H, W)

    # ---- tiled two-pass path (per-batch x does not fit the VMEM budget) ----
    c_tile = c_tile_override or _pick_c_tile(C, HW, itemsize)
    assert c_tile == C or c_tile % 8 == 0, "c_tile must be C or a multiple of 8"
    n_c = pl.cdiv(C, c_tile)
    has_partial = (C % c_tile) != 0
    R = _acc_rows(c_tile)

    kernel1 = functools.partial(_attn_map_kernel, C=C, c_tile=c_tile, R=R,
                                H=H, W=W, K=K, n_c=n_c, has_partial=has_partial)
    y = pl.pallas_call(
        kernel1,
        out_shape=jax.ShapeDtypeStruct((B, 1, HW), jnp.float32),
        grid_spec=pltpu.PrefetchScalarGridSpec(
            num_scalar_prefetch=0,
            grid=(B, n_c),
            in_specs=[
                pl.BlockSpec((1, c_tile, HW), lambda b, c: (b, c, 0)),
                pl.BlockSpec(memory_space=pltpu.MemorySpace.SMEM),
                pl.BlockSpec((2, HW), lambda b, c: (0, 0)),
            ],
            out_specs=pl.BlockSpec((1, 1, HW), lambda b, c: (b, 0, 0)),
            scratch_shapes=[
                pltpu.VMEM((R, HW), jnp.float32),   # channel-sum partials
                pltpu.VMEM((R, HW), jnp.float32),   # channel-max partials (f32: no bf16 VPU on v5e)
            ],
        ),
        compiler_params=pltpu.CompilerParams(
            dimension_semantics=("parallel", "arbitrary"),
            vmem_limit_bytes=vmem_limit),
    )(x3, w_flat, hw_idx)

    out3 = pl.pallas_call(
        _apply_kernel,
        out_shape=jax.ShapeDtypeStruct((B, C, HW), x.dtype),
        grid_spec=pltpu.PrefetchScalarGridSpec(
            num_scalar_prefetch=0,
            grid=(B, n_c),
            in_specs=[
                pl.BlockSpec((1, c_tile, HW), lambda b, c: (b, c, 0)),
                pl.BlockSpec((1, 1, HW), lambda b, c: (b, 0, 0)),
            ],
            out_specs=pl.BlockSpec((1, c_tile, HW), lambda b, c: (b, c, 0)),
        ),
        compiler_params=pltpu.CompilerParams(
            dimension_semantics=("parallel", "parallel"),
            vmem_limit_bytes=vmem_limit),
    )(x3, y)

    return out3.reshape(B, C, H, W)


def _reference_forward(x, conv_weight):
    K = conv_weight.shape[-1]
    pad = K // 2
    avg = jnp.mean(x, axis=1, keepdims=True)
    mx = jnp.max(x, axis=1, keepdims=True)
    y = jnp.concatenate([avg, mx], axis=1)
    y = jax.lax.conv_general_dilated(
        y, conv_weight, window_strides=(1, 1),
        padding=[(pad, pad), (pad, pad)],
        dimension_numbers=("NCHW", "OIHW", "NCHW"))
    return x * jax.nn.sigmoid(y)


if __name__ == "__main__":
    key = jax.random.PRNGKey(0)
    kx, kw, kx2 = jax.random.split(key, 3)

    KSIZE = 7
    fan_in = 2 * KSIZE * KSIZE
    conv_weight = (jax.random.normal(kw, (1, 2, KSIZE, KSIZE), dtype=jnp.float32)
                   * (1.0 / fan_in) ** 0.5)

    # Main shape (module-sized): exercises the fused single-pass path.
    B, C, H, W = 2, 4, 16, 16
    x = jax.random.normal(kx, (B, C, H, W), dtype=jnp.float32)
    out = jax.block_until_ready(sattention_layer(x, conv_weight))
    ref = _reference_forward(x, conv_weight)
    assert out.shape == ref.shape
    assert jnp.max(jnp.abs(out - ref)) < 1e-4, "fused path mismatch vs reference"

    # Also exercise the tiled two-pass path (multi-step channel reduction with
    # a masked partial last tile) at a small shape.
    x2 = jax.random.normal(kx2, (2, 20, 16, 16), dtype=jnp.float32)
    out2 = jax.block_until_ready(
        sattention_layer(x2, conv_weight, force_two_pass=True, c_tile_override=8))
    ref2 = _reference_forward(x2, conv_weight)
    assert jnp.max(jnp.abs(out2 - ref2)) < 1e-4, "tiled path mismatch vs reference"

    print("KERNEL_OK")
</pallas_src>

<mosaic_0001>
module attributes {stable_mosaic.version = 11 : i64} {
  func.func @_fused_kernel(%arg0: i32, %arg1: memref<1x4x256xf32, #tpu.memory_space<vmem>>, %arg2: memref<98xf32, #tpu.memory_space<smem>>, %arg3: memref<2x256xi32, #tpu.memory_space<vmem>>, %arg4: memref<1x4x256xf32, #tpu.memory_space<vmem>>) attributes {dimension_semantics = [#tpu.dimension_semantics<parallel>], iteration_bounds = array<i64: 2>, scalar_prefetch = 0 : i64, scratch_operands = 0 : i64, tpu.core_type = #tpu.core_type<tc>, window_params = [{transform_indices = @transform_0, window_bounds = array<i64: 1, 4, 256>}, {transform_indices = @transform_1, window_bounds = array<i64: 98>}, {pipeline_mode = #tpu.pipeline_mode<synchronous>, transform_indices = @transform_2, window_bounds = array<i64: 2, 256>}, {transform_indices = @transform_3, window_bounds = array<i64: 1, 4, 256>}]} {
    %c0 = arith.constant 0 : index
    %c0_0 = arith.constant 0 : index
    %c0_1 = arith.constant 0 : index
    %0 = vector.load %arg1[%c0, %c0_0, %c0_1] : memref<1x4x256xf32, #tpu.memory_space<vmem>>, vector<1x4x256xf32>
    %1 = vector.shape_cast %0 : vector<1x4x256xf32> to vector<4x256xf32>
    %cst = arith.constant dense<0.000000e+00> : vector<256xf32>
    %2 = vector.multi_reduction <add>, %1, %cst [0] : vector<4x256xf32> to vector<256xf32>
    %3 = vector.shape_cast %2 : vector<256xf32> to vector<1x256xf32>
    %cst_2 = arith.constant 2.500000e-01 : f32
    %4 = vector.broadcast %cst_2 : f32 to vector<1x256xf32>
    %5 = arith.mulf %3, %4 : vector<1x256xf32>
    %cst_3 = arith.constant dense<0xFF800000> : vector<256xf32>
    %6 = vector.multi_reduction <maximumf>, %1, %cst_3 [0] : vector<4x256xf32> to vector<256xf32>
    %7 = vector.shape_cast %6 : vector<256xf32> to vector<1x256xf32>
    %8 = tpu.concatenate %5, %7 in 0 : vector<1x256xf32>, vector<1x256xf32> -> vector<2x256xf32>
    %c0_4 = arith.constant 0 : index
    %c0_5 = arith.constant 0 : index
    %9 = vector.load %arg3[%c0_4, %c0_5] : memref<2x256xi32, #tpu.memory_space<vmem>>, vector<1x256xi32>
    %c1 = arith.constant 1 : index
    %c0_6 = arith.constant 0 : index
    %10 = vector.load %arg3[%c1, %c0_6] : memref<2x256xi32, #tpu.memory_space<vmem>>, vector<1x256xi32>
    %c3_i32 = arith.constant 3 : i32
    %11 = vector.broadcast %c3_i32 : i32 to vector<1x256xi32>
    %12 = arith.cmpi sge, %9, %11 : vector<1x256xi32>
    %c19_i32 = arith.constant 19 : i32
    %13 = vector.broadcast %c19_i32 : i32 to vector<1x256xi32>
    %14 = arith.cmpi slt, %9, %13 : vector<1x256xi32>
    %15 = arith.andi %12, %14 : vector<1x256xi1>
    %c2_i32 = arith.constant 2 : i32
    %16 = vector.broadcast %c2_i32 : i32 to vector<1x256xi32>
    %17 = arith.cmpi sge, %9, %16 : vector<1x256xi32>
    %c18_i32 = arith.constant 18 : i32
    %18 = vector.broadcast %c18_i32 : i32 to vector<1x256xi32>
    %19 = arith.cmpi slt, %9, %18 : vector<1x256xi32>
    %20 = arith.andi %17, %19 : vector<1x256xi1>
    %c1_i32 = arith.constant 1 : i32
    %21 = vector.broadcast %c1_i32 : i32 to vector<1x256xi32>
    %22 = arith.cmpi sge, %9, %21 : vector<1x256xi32>
    %c17_i32 = arith.constant 17 : i32
    %23 = vector.broadcast %c17_i32 : i32 to vector<1x256xi32>
    %24 = arith.cmpi slt, %9, %23 : vector<1x256xi32>
    %25 = arith.andi %22, %24 : vector<1x256xi1>
    %c0_i32 = arith.constant 0 : i32
    %26 = vector.broadcast %c0_i32 : i32 to vector<1x256xi32>
    %27 = arith.cmpi sge, %9, %26 : vector<1x256xi32>
    %c16_i32 = arith.constant 16 : i32
    %28 = vector.broadcast %c16_i32 : i32 to vector<1x256xi32>
    %29 = arith.cmpi slt, %9, %28 : vector<1x256xi32>
    %30 = arith.andi %27, %29 : vector<1x256xi1>
    %c-1_i32 = arith.constant -1 : i32
    %31 = vector.broadcast %c-1_i32 : i32 to vector<1x256xi32>
    %32 = arith.cmpi sge, %9, %31 : vector<1x256xi32>
    %c15_i32 = arith.constant 15 : i32
    %33 = vector.broadcast %c15_i32 : i32 to vector<1x256xi32>
    %34 = arith.cmpi slt, %9, %33 : vector<1x256xi32>
    %35 = arith.andi %32, %34 : vector<1x256xi1>
    %c-2_i32 = arith.constant -2 : i32
    %36 = vector.broadcast %c-2_i32 : i32 to vector<1x256xi32>
    %37 = arith.cmpi sge, %9, %36 : vector<1x256xi32>
    %c14_i32 = arith.constant 14 : i32
    %38 = vector.broadcast %c14_i32 : i32 to vector<1x256xi32>
    %39 = arith.cmpi slt, %9, %38 : vector<1x256xi32>
    %40 = arith.andi %37, %39 : vector<1x256xi1>
    %c-3_i32 = arith.constant -3 : i32
    %41 = vector.broadcast %c-3_i32 : i32 to vector<1x256xi32>
    %42 = arith.cmpi sge, %9, %41 : vector<1x256xi32>
    %c13_i32 = arith.constant 13 : i32
    %43 = vector.broadcast %c13_i32 : i32 to vector<1x256xi32>
    %44 = arith.cmpi slt, %9, %43 : vector<1x256xi32>
    %45 = arith.andi %42, %44 : vector<1x256xi1>
    %c3_i32_7 = arith.constant 3 : i32
    %46 = vector.broadcast %c3_i32_7 : i32 to vector<1x256xi32>
    %47 = arith.cmpi sge, %10, %46 : vector<1x256xi32>
    %c19_i32_8 = arith.constant 19 : i32
    %48 = vector.broadcast %c19_i32_8 : i32 to vector<1x256xi32>
    %49 = arith.cmpi slt, %10, %48 : vector<1x256xi32>
    %50 = arith.andi %47, %49 : vector<1x256xi1>
    %c2_i32_9 = arith.constant 2 : i32
    %51 = vector.broadcast %c2_i32_9 : i32 to vector<1x256xi32>
    %52 = arith.cmpi sge, %10, %51 : vector<1x256xi32>
    %c18_i32_10 = arith.constant 18 : i32
    %53 = vector.broadcast %c18_i32_10 : i32 to vector<1x256xi32>
    %54 = arith.cmpi slt, %10, %53 : vector<1x256xi32>
    %55 = arith.andi %52, %54 : vector<1x256xi1>
    %c1_i32_11 = arith.constant 1 : i32
    %56 = vector.broadcast %c1_i32_11 : i32 to vector<1x256xi32>
    %57 = arith.cmpi sge, %10, %56 : vector<1x256xi32>
    %c17_i32_12 = arith.constant 17 : i32
    %58 = vector.broadcast %c17_i32_12 : i32 to vector<1x256xi32>
    %59 = arith.cmpi slt, %10, %58 : vector<1x256xi32>
    %60 = arith.andi %57, %59 : vector<1x256xi1>
    %c0_i32_13 = arith.constant 0 : i32
    %61 = vector.broadcast %c0_i32_13 : i32 to vector<1x256xi32>
    %62 = arith.cmpi sge, %10, %61 : vector<1x256xi32>
    %c16_i32_14 = arith.constant 16 : i32
    %63 = vector.broadcast %c16_i32_14 : i32 to vector<1x256xi32>
    %64 = arith.cmpi slt, %10, %63 : vector<1x256xi32>
    %65 = arith.andi %62, %64 : vector<1x256xi1>
    %c-1_i32_15 = arith.constant -1 : i32
    %66 = vector.broadcast %c-1_i32_15 : i32 to vector<1x256xi32>
    %67 = arith.cmpi sge, %10, %66 : vector<1x256xi32>
    %c15_i32_16 = arith.constant 15 : i32
    %68 = vector.broadcast %c15_i32_16 : i32 to vector<1x256xi32>
    %69 = arith.cmpi slt, %10, %68 : vector<1x256xi32>
    %70 = arith.andi %67, %69 : vector<1x256xi1>
    %c-2_i32_17 = arith.constant -2 : i32
    %71 = vector.broadcast %c-2_i32_17 : i32 to vector<1x256xi32>
    %72 = arith.cmpi sge, %10, %71 : vector<1x256xi32>
    %c14_i32_18 = arith.constant 14 : i32
    %73 = vector.broadcast %c14_i32_18 : i32 to vector<1x256xi32>
    %74 = arith.cmpi slt, %10, %73 : vector<1x256xi32>
    %75 = arith.andi %72, %74 : vector<1x256xi1>
    %c-3_i32_19 = arith.constant -3 : i32
    %76 = vector.broadcast %c-3_i32_19 : i32 to vector<1x256xi32>
    %77 = arith.cmpi sge, %10, %76 : vector<1x256xi32>
    %c13_i32_20 = arith.constant 13 : i32
    %78 = vector.broadcast %c13_i32_20 : i32 to vector<1x256xi32>
    %79 = arith.cmpi slt, %10, %78 : vector<1x256xi32>
    %80 = arith.andi %77, %79 : vector<1x256xi1>
    %c0_21 = arith.constant 0 : index
    %81 = memref.load %arg2[%c0_21] : memref<98xf32, #tpu.memory_space<smem>>
    %c1_22 = arith.constant 1 : index
    %82 = memref.load %arg2[%c1_22] : memref<98xf32, #tpu.memory_space<smem>>
    %c2 = arith.constant 2 : index
    %83 = memref.load %arg2[%c2] : memref<98xf32, #tpu.memory_space<smem>>
    %c3 = arith.constant 3 : index
    %84 = memref.load %arg2[%c3] : memref<98xf32, #tpu.memory_space<smem>>
    %c4 = arith.constant 4 : index
    %85 = memref.load %arg2[%c4] : memref<98xf32, #tpu.memory_space<smem>>
    %c5 = arith.constant 5 : index
    %86 = memref.load %arg2[%c5] : memref<98xf32, #tpu.memory_space<smem>>
    %c6 = arith.constant 6 : index
    %87 = memref.load %arg2[%c6] : memref<98xf32, #tpu.memory_space<smem>>
    %c7 = arith.constant 7 : index
    %88 = memref.load %arg2[%c7] : memref<98xf32, #tpu.memory_space<smem>>
    %c8 = arith.constant 8 : index
    %89 = memref.load %arg2[%c8] : memref<98xf32, #tpu.memory_space<smem>>
    %c9 = arith.constant 9 : index
    %90 = memref.load %arg2[%c9] : memref<98xf32, #tpu.memory_space<smem>>
    %c10 = arith.constant 10 : index
    %91 = memref.load %arg2[%c10] : memref<98xf32, #tpu.memory_space<smem>>
    %c11 = arith.constant 11 : index
    %92 = memref.load %arg2[%c11] : memref<98xf32, #tpu.memory_space<smem>>
    %c12 = arith.constant 12 : index
    %93 = memref.load %arg2[%c12] : memref<98xf32, #tpu.memory_space<smem>>
    %c13 = arith.constant 13 : index
    %94 = memref.load %arg2[%c13] : memref<98xf32, #tpu.memory_space<smem>>
    %c14 = arith.constant 14 : index
    %95 = memref.load %arg2[%c14] : memref<98xf32, #tpu.memory_space<smem>>
    %c15 = arith.constant 15 : index
    %96 = memref.load %arg2[%c15] : memref<98xf32, #tpu.memory_space<smem>>
    %c16 = arith.constant 16 : index
    %97 = memref.load %arg2[%c16] : memref<98xf32, #tpu.memory_space<smem>>
    %c17 = arith.constant 17 : index
    %98 = memref.load %arg2[%c17] : memref<98xf32, #tpu.memory_space<smem>>
    %c18 = arith.constant 18 : index
    %99 = memref.load %arg2[%c18] : memref<98xf32, #tpu.memory_space<smem>>
    %c19 = arith.constant 19 : index
    %100 = memref.load %arg2[%c19] : memref<98xf32, #tpu.memory_space<smem>>
    %c20 = arith.constant 20 : index
    %101 = memref.load %arg2[%c20] : memref<98xf32, #tpu.memory_space<smem>>
    %c21 = arith.constant 21 : index
    %102 = memref.load %arg2[%c21] : memref<98xf32, #tpu.memory_space<smem>>
    %c22 = arith.constant 22 : index
    %103 = memref.load %arg2[%c22] : memref<98xf32, #tpu.memory_space<smem>>
    %c23 = arith.constant 23 : index
    %104 = memref.load %arg2[%c23] : memref<98xf32, #tpu.memory_space<smem>>
    %c24 = arith.constant 24 : index
    %105 = memref.load %arg2[%c24] : memref<98xf32, #tpu.memory_space<smem>>
    %c25 = arith.constant 25 : index
    %106 = memref.load %arg2[%c25] : memref<98xf32, #tpu.memory_space<smem>>
    %c26 = arith.constant 26 : index
    %107 = memref.load %arg2[%c26] : memref<98xf32, #tpu.memory_space<smem>>
    %c27 = arith.constant 27 : index
    %108 = memref.load %arg2[%c27] : memref<98xf32, #tpu.memory_space<smem>>
    %c28 = arith.constant 28 : index
    %109 = memref.load %arg2[%c28] : memref<98xf32, #tpu.memory_space<smem>>
    %c29 = arith.constant 29 : index
    %110 = memref.load %arg2[%c29] : memref<98xf32, #tpu.memory_space<smem>>
    %c30 = arith.constant 30 : index
    %111 = memref.load %arg2[%c30] : memref<98xf32, #tpu.memory_space<smem>>
    %c31 = arith.constant 31 : index
    %112 = memref.load %arg2[%c31] : memref<98xf32, #tpu.memory_space<smem>>
    %c32 = arith.constant 32 : index
    %113 = memref.load %arg2[%c32] : memref<98xf32, #tpu.memory_space<smem>>
    %c33 = arith.constant 33 : index
    %114 = memref.load %arg2[%c33] : memref<98xf32, #tpu.memory_space<smem>>
    %c34 = arith.constant 34 : index
    %115 = memref.load %arg2[%c34] : memref<98xf32, #tpu.memory_space<smem>>
    %c35 = arith.constant 35 : index
    %116 = memref.load %arg2[%c35] : memref<98xf32, #tpu.memory_space<smem>>
    %c36 = arith.constant 36 : index
    %117 = memref.load %arg2[%c36] : memref<98xf32, #tpu.memory_space<smem>>
    %c37 = arith.constant 37 : index
    %118 = memref.load %arg2[%c37] : memref<98xf32, #tpu.memory_space<smem>>
    %c38 = arith.constant 38 : index
    %119 = memref.load %arg2[%c38] : memref<98xf32, #tpu.memory_space<smem>>
    %c39 = arith.constant 39 : index
    %120 = memref.load %arg2[%c39] : memref<98xf32, #tpu.memory_space<smem>>
    %c40 = arith.constant 40 : index
    %121 = memref.load %arg2[%c40] : memref<98xf32, #tpu.memory_space<smem>>
    %c41 = arith.constant 41 : index
    %122 = memref.load %arg2[%c41] : memref<98xf32, #tpu.memory_space<smem>>
    %c42 = arith.constant 42 : index
    %123 = memref.load %arg2[%c42] : memref<98xf32, #tpu.memory_space<smem>>
    %c43 = arith.constant 43 : index
    %124 = memref.load %arg2[%c43] : memref<98xf32, #tpu.memory_space<smem>>
    %c44 = arith.constant 44 : index
    %125 = memref.load %arg2[%c44] : memref<98xf32, #tpu.memory_space<smem>>
    %c45 = arith.constant 45 : index
    %126 = memref.load %arg2[%c45] : memref<98xf32, #tpu.memory_space<smem>>
    %c46 = arith.constant 46 : index
    %127 = memref.load %arg2[%c46] : memref<98xf32, #tpu.memory_space<smem>>
    %c47 = arith.constant 47 : index
    %128 = memref.load %arg2[%c47] : memref<98xf32, #tpu.memory_space<smem>>
    %c48 = arith.constant 48 : index
    %129 = memref.load %arg2[%c48] : memref<98xf32, #tpu.memory_space<smem>>
    %c49 = arith.constant 49 : index
    %130 = memref.load %arg2[%c49] : memref<98xf32, #tpu.memory_space<smem>>
    %c50 = arith.constant 50 : index
    %131 = memref.load %arg2[%c50] : memref<98xf32, #tpu.memory_space<smem>>
    %c51 = arith.constant 51 : index
    %132 = memref.load %arg2[%c51] : memref<98xf32, #tpu.memory_space<smem>>
    %c52 = arith.constant 52 : index
    %133 = memref.load %arg2[%c52] : memref<98xf32, #tpu.memory_space<smem>>
    %c53 = arith.constant 53 : index
    %134 = memref.load %arg2[%c53] : memref<98xf32, #tpu.memory_space<smem>>
    %c54 = arith.constant 54 : index
    %135 = memref.load %arg2[%c54] : memref<98xf32, #tpu.memory_space<smem>>
    %c55 = arith.constant 55 : index
    %136 = memref.load %arg2[%c55] : memref<98xf32, #tpu.memory_space<smem>>
    %c56 = arith.constant 56 : index
    %137 = memref.load %arg2[%c56] : memref<98xf32, #tpu.memory_space<smem>>
    %c57 = arith.constant 57 : index
    %138 = memref.load %arg2[%c57] : memref<98xf32, #tpu.memory_space<smem>>
    %c58 = arith.constant 58 : index
    %139 = memref.load %arg2[%c58] : memref<98xf32, #tpu.memory_space<smem>>
    %c59 = arith.constant 59 : index
    %140 = memref.load %arg2[%c59] : memref<98xf32, #tpu.memory_space<smem>>
    %c60 = arith.constant 60 : index
    %141 = memref.load %arg2[%c60] : memref<98xf32, #tpu.memory_space<smem>>
    %c61 = arith.constant 61 : index
    %142 = memref.load %arg2[%c61] : memref<98xf32, #tpu.memory_space<smem>>
    %c62 = arith.constant 62 : index
    %143 = memref.load %arg2[%c62] : memref<98xf32, #tpu.memory_space<smem>>
    %c63 = arith.constant 63 : index
    %144 = memref.load %arg2[%c63] : memref<98xf32, #tpu.memory_space<smem>>
    %c64 = arith.constant 64 : index
    %145 = memref.load %arg2[%c64] : memref<98xf32, #tpu.memory_space<smem>>
    %c65 = arith.constant 65 : index
    %146 = memref.load %arg2[%c65] : memref<98xf32, #tpu.memory_space<smem>>
    %c66 = arith.constant 66 : index
    %147 = memref.load %arg2[%c66] : memref<98xf32, #tpu.memory_space<smem>>
    %c67 = arith.constant 67 : index
    %148 = memref.load %arg2[%c67] : memref<98xf32, #tpu.memory_space<smem>>
    %c68 = arith.constant 68 : index
    %149 = memref.load %arg2[%c68] : memref<98xf32, #tpu.memory_space<smem>>
    %c69 = arith.constant 69 : index
    %150 = memref.load %arg2[%c69] : memref<98xf32, #tpu.memory_space<smem>>
    %c70 = arith.constant 70 : index
    %151 = memref.load %arg2[%c70] : memref<98xf32, #tpu.memory_space<smem>>
    %c71 = arith.constant 71 : index
    %152 = memref.load %arg2[%c71] : memref<98xf32, #tpu.memory_space<smem>>
    %c72 = arith.constant 72 : index
    %153 = memref.load %arg2[%c72] : memref<98xf32, #tpu.memory_space<smem>>
    %c73 = arith.constant 73 : index
    %154 = memref.load %arg2[%c73] : memref<98xf32, #tpu.memory_space<smem>>
    %c74 = arith.constant 74 : index
    %155 = memref.load %arg2[%c74] : memref<98xf32, #tpu.memory_space<smem>>
    %c75 = arith.constant 75 : index
    %156 = memref.load %arg2[%c75] : memref<98xf32, #tpu.memory_space<smem>>
    %c76 = arith.constant 76 : index
    %157 = memref.load %arg2[%c76] : memref<98xf32, #tpu.memory_space<smem>>
    %c77 = arith.constant 77 : index
    %158 = memref.load %arg2[%c77] : memref<98xf32, #tpu.memory_space<smem>>
    %c78 = arith.constant 78 : index
    %159 = memref.load %arg2[%c78] : memref<98xf32, #tpu.memory_space<smem>>
    %c79 = arith.constant 79 : index
    %160 = memref.load %arg2[%c79] : memref<98xf32, #tpu.memory_space<smem>>
    %c80 = arith.constant 80 : index
    %161 = memref.load %arg2[%c80] : memref<98xf32, #tpu.memory_space<smem>>
    %c81 = arith.constant 81 : index
    %162 = memref.load %arg2[%c81] : memref<98xf32, #tpu.memory_space<smem>>
    %c82 = arith.constant 82 : index
    %163 = memref.load %arg2[%c82] : memref<98xf32, #tpu.memory_space<smem>>
    %c83 = arith.constant 83 : index
    %164 = memref.load %arg2[%c83] : memref<98xf32, #tpu.memory_space<smem>>
    %c84 = arith.constant 84 : index
    %165 = memref.load %arg2[%c84] : memref<98xf32, #tpu.memory_space<smem>>
    %c85 = arith.constant 85 : index
    %166 = memref.load %arg2[%c85] : memref<98xf32, #tpu.memory_space<smem>>
    %c86 = arith.constant 86 : index
    %167 = memref.load %arg2[%c86] : memref<98xf32, #tpu.memory_space<smem>>
    %c87 = arith.constant 87 : index
    %168 = memref.load %arg2[%c87] : memref<98xf32, #tpu.memory_space<smem>>
    %c88 = arith.constant 88 : index
    %169 = memref.load %arg2[%c88] : memref<98xf32, #tpu.memory_space<smem>>
    %c89 = arith.constant 89 : index
    %170 = memref.load %arg2[%c89] : memref<98xf32, #tpu.memory_space<smem>>
    %c90 = arith.constant 90 : index
    %171 = memref.load %arg2[%c90] : memref<98xf32, #tpu.memory_space<smem>>
    %c91 = arith.constant 91 : index
    %172 = memref.load %arg2[%c91] : memref<98xf32, #tpu.memory_space<smem>>
    %c92 = arith.constant 92 : index
    %173 = memref.load %arg2[%c92] : memref<98xf32, #tpu.memory_space<smem>>
    %c93 = arith.constant 93 : index
    %174 = memref.load %arg2[%c93] : memref<98xf32, #tpu.memory_space<smem>>
    %c94 = arith.constant 94 : index
    %175 = memref.load %arg2[%c94] : memref<98xf32, #tpu.memory_space<smem>>
    %c95 = arith.constant 95 : index
    %176 = memref.load %arg2[%c95] : memref<98xf32, #tpu.memory_space<smem>>
    %c96 = arith.constant 96 : index
    %177 = memref.load %arg2[%c96] : memref<98xf32, #tpu.memory_space<smem>>
    %c97 = arith.constant 97 : index
    %178 = memref.load %arg2[%c97] : memref<98xf32, #tpu.memory_space<smem>>
    %179 = tpu.iota {dimensions = array<i32: 0>} : vector<2x1xi32>
    %c1_i32_23 = arith.constant 1 : i32
    %180 = vector.broadcast %c1_i32_23 : i32 to vector<2x1xi32>
    %181 = arith.cmpi eq, %179, %180 : vector<2x1xi32>
    %cst_24 = arith.constant 0.000000e+00 : f32
    %182 = vector.broadcast %cst_24 : f32 to vector<2x256xf32>
    %c51_i32 = arith.constant 51 : i32
    %183 = tpu.dynamic_rotate %8 by %c51_i32 dim 1 : vector<2x256xf32>, i32 -> vector<2x256xf32>
    %184 = vector.broadcast %130 : f32 to vector<2x1xf32>
    %185 = vector.broadcast %81 : f32 to vector<2x1xf32>
    %186 = arith.select %181, %184, %185 : vector<2x1xi1>, vector<2x1xf32>
    %187 = arith.andi %15, %50 : vector<1x256xi1>
    %188 = vector.broadcast %186 : vector<2x1xf32> to vector<2x256xf32>
    %189 = arith.mulf %183, %188 : vector<2x256xf32>
    %cst_25 = arith.constant 0.000000e+00 : f32
    %190 = vector.shape_cast %187 : vector<1x256xi1> to vector<1x256xi1>
    %191 = vector.broadcast %190 : vector<1x256xi1> to vector<2x256xi1>
    %192 = vector.broadcast %cst_25 : f32 to vector<2x256xf32>
    %193 = arith.select %191, %189, %192 : vector<2x256xi1>, vector<2x256xf32>
    %194 = arith.addf %182, %193 : vector<2x256xf32>
    %c50_i32 = arith.constant 50 : i32
    %195 = tpu.dynamic_rotate %8 by %c50_i32 dim 1 : vector<2x256xf32>, i32 -> vector<2x256xf32>
    %196 = vector.broadcast %131 : f32 to vector<2x1xf32>
    %197 = vector.broadcast %82 : f32 to vector<2x1xf32>
    %198 = arith.select %181, %196, %197 : vector<2x1xi1>, vector<2x1xf32>
    %199 = arith.andi %15, %55 : vector<1x256xi1>
    %200 = vector.broadcast %198 : vector<2x1xf32> to vector<2x256xf32>
    %201 = arith.mulf %195, %200 : vector<2x256xf32>
    %cst_26 = arith.constant 0.000000e+00 : f32
    %202 = vector.shape_cast %199 : vector<1x256xi1> to vector<1x256xi1>
    %203 = vector.broadcast %202 : vector<1x256xi1> to vector<2x256xi1>
    %204 = vector.broadcast %cst_26 : f32 to vector<2x256xf32>
    %205 = arith.select %203, %201, %204 : vector<2x256xi1>, vector<2x256xf32>
    %206 = arith.addf %194, %205 : vector<2x256xf32>
    %c49_i32 = arith.constant 49 : i32
    %207 = tpu.dynamic_rotate %8 by %c49_i32 dim 1 : vector<2x256xf32>, i32 -> vector<2x256xf32>
    %208 = vector.broadcast %132 : f32 to vector<2x1xf32>
    %209 = vector.broadcast %83 : f32 to vector<2x1xf32>
    %210 = arith.select %181, %208, %209 : vector<2x1xi1>, vector<2x1xf32>
    %211 = arith.andi %15, %60 : vector<1x256xi1>
    %212 = vector.broadcast %210 : vector<2x1xf32> to vector<2x256xf32>
    %213 = arith.mulf %207, %212 : vector<2x256xf32>
    %cst_27 = arith.constant 0.000000e+00 : f32
    %214 = vector.shape_cast %211 : vector<1x256xi1> to vector<1x256xi1>
    %215 = vector.broadcast %214 : vector<1x256xi1> to vector<2x256xi1>
    %216 = vector.broadcast %cst_27 : f32 to vector<2x256xf32>
    %217 = arith.select %215, %213, %216 : vector<2x256xi1>, vector<2x256xf32>
    %218 = arith.addf %206, %217 : vector<2x256xf32>
    %c48_i32 = arith.constant 48 : i32
    %219 = tpu.dynamic_rotate %8 by %c48_i32 dim 1 : vector<2x256xf32>, i32 -> vector<2x256xf32>
    %220 = vector.broadcast %133 : f32 to vector<2x1xf32>
    %221 = vector.broadcast %84 : f32 to vector<2x1xf32>
    %222 = arith.select %181, %220, %221 : vector<2x1xi1>, vector<2x1xf32>
    %223 = arith.andi %15, %65 : vector<1x256xi1>
    %224 = vector.broadcast %222 : vector<2x1xf32> to vector<2x256xf32>
    %225 = arith.mulf %219, %224 : vector<2x256xf32>
    %cst_28 = arith.constant 0.000000e+00 : f32
    %226 = vector.shape_cast %223 : vector<1x256xi1> to vector<1x256xi1>
    %227 = vector.broadcast %226 : vector<1x256xi1> to vector<2x256xi1>
    %228 = vector.broadcast %cst_28 : f32 to vector<2x256xf32>
    %229 = arith.select %227, %225, %228 : vector<2x256xi1>, vector<2x256xf32>
    %230 = arith.addf %218, %229 : vector<2x256xf32>
    %c47_i32 = arith.constant 47 : i32
    %231 = tpu.dynamic_rotate %8 by %c47_i32 dim 1 : vector<2x256xf32>, i32 -> vector<2x256xf32>
    %232 = vector.broadcast %134 : f32 to vector<2x1xf32>
    %233 = vector.broadcast %85 : f32 to vector<2x1xf32>
    %234 = arith.select %181, %232, %233 : vector<2x1xi1>, vector<2x1xf32>
    %235 = arith.andi %15, %70 : vector<1x256xi1>
    %236 = vector.broadcast %234 : vector<2x1xf32> to vector<2x256xf32>
    %237 = arith.mulf %231, %236 : vector<2x256xf32>
    %cst_29 = arith.constant 0.000000e+00 : f32
    %238 = vector.shape_cast %235 : vector<1x256xi1> to vector<1x256xi1>
    %239 = vector.broadcast %238 : vector<1x256xi1> to vector<2x256xi1>
    %240 = vector.broadcast %cst_29 : f32 to vector<2x256xf32>
    %241 = arith.select %239, %237, %240 : vector<2x256xi1>, vector<2x256xf32>
    %242 = arith.addf %230, %241 : vector<2x256xf32>
    %c46_i32 = arith.constant 46 : i32
    %243 = tpu.dynamic_rotate %8 by %c46_i32 dim 1 : vector<2x256xf32>, i32 -> vector<2x256xf32>
    %244 = vector.broadcast %135 : f32 to vector<2x1xf32>
    %245 = vector.broadcast %86 : f32 to vector<2x1xf32>
    %246 = arith.select %181, %244, %245 : vector<2x1xi1>, vector<2x1xf32>
    %247 = arith.andi %15, %75 : vector<1x256xi1>
    %248 = vector.broadcast %246 : vector<2x1xf32> to vector<2x256xf32>
    %249 = arith.mulf %243, %248 : vector<2x256xf32>
    %cst_30 = arith.constant 0.000000e+00 : f32
    %250 = vector.shape_cast %247 : vector<1x256xi1> to vector<1x256xi1>
    %251 = vector.broadcast %250 : vector<1x256xi1> to vector<2x256xi1>
    %252 = vector.broadcast %cst_30 : f32 to vector<2x256xf32>
    %253 = arith.select %251, %249, %252 : vector<2x256xi1>, vector<2x256xf32>
    %254 = arith.addf %242, %253 : vector<2x256xf32>
    %c45_i32 = arith.constant 45 : i32
    %255 = tpu.dynamic_rotate %8 by %c45_i32 dim 1 : vector<2x256xf32>, i32 -> vector<2x256xf32>
    %256 = vector.broadcast %136 : f32 to vector<2x1xf32>
    %257 = vector.broadcast %87 : f32 to vector<2x1xf32>
    %258 = arith.select %181, %256, %257 : vector<2x1xi1>, vector<2x1xf32>
    %259 = arith.andi %15, %80 : vector<1x256xi1>
    %260 = vector.broadcast %258 : vector<2x1xf32> to vector<2x256xf32>
    %261 = arith.mulf %255, %260 : vector<2x256xf32>
    %cst_31 = arith.constant 0.000000e+00 : f32
    %262 = vector.shape_cast %259 : vector<1x256xi1> to vector<1x256xi1>
    %263 = vector.broadcast %262 : vector<1x256xi1> to vector<2x256xi1>
    %264 = vector.broadcast %cst_31 : f32 to vector<2x256xf32>
    %265 = arith.select %263, %261, %264 : vector<2x256xi1>, vector<2x256xf32>
    %266 = arith.addf %254, %265 : vector<2x256xf32>
    %c35_i32 = arith.constant 35 : i32
    %267 = tpu.dynamic_rotate %8 by %c35_i32 dim 1 : vector<2x256xf32>, i32 -> vector<2x256xf32>
    %268 = vector.broadcast %137 : f32 to vector<2x1xf32>
    %269 = vector.broadcast %88 : f32 to vector<2x1xf32>
    %270 = arith.select %181, %268, %269 : vector<2x1xi1>, vector<2x1xf32>
    %271 = arith.andi %20, %50 : vector<1x256xi1>
    %272 = vector.broadcast %270 : vector<2x1xf32> to vector<2x256xf32>
    %273 = arith.mulf %267, %272 : vector<2x256xf32>
    %cst_32 = arith.constant 0.000000e+00 : f32
    %274 = vector.shape_cast %271 : vector<1x256xi1> to vector<1x256xi1>
    %275 = vector.broadcast %274 : vector<1x256xi1> to vector<2x256xi1>
    %276 = vector.broadcast %cst_32 : f32 to vector<2x256xf32>
    %277 = arith.select %275, %273, %276 : vector<2x256xi1>, vector<2x256xf32>
    %278 = arith.addf %266, %277 : vector<2x256xf32>
    %c34_i32 = arith.constant 34 : i32
    %279 = tpu.dynamic_rotate %8 by %c34_i32 dim 1 : vector<2x256xf32>, i32 -> vector<2x256xf32>
    %280 = vector.broadcast %138 : f32 to vector<2x1xf32>
    %281 = vector.broadcast %89 : f32 to vector<2x1xf32>
    %282 = arith.select %181, %280, %281 : vector<2x1xi1>, vector<2x1xf32>
    %283 = arith.andi %20, %55 : vector<1x256xi1>
    %284 = vector.broadcast %282 : vector<2x1xf32> to vector<2x256xf32>
    %285 = arith.mulf %279, %284 : vector<2x256xf32>
    %cst_33 = arith.constant 0.000000e+00 : f32
    %286 = vector.shape_cast %283 : vector<1x256xi1> to vector<1x256xi1>
    %287 = vector.broadcast %286 : vector<1x256xi1> to vector<2x256xi1>
    %288 = vector.broadcast %cst_33 : f32 to vector<2x256xf32>
    %289 = arith.select %287, %285, %288 : vector<2x256xi1>, vector<2x256xf32>
    %290 = arith.addf %278, %289 : vector<2x256xf32>
    %c33_i32 = arith.constant 33 : i32
    %291 = tpu.dynamic_rotate %8 by %c33_i32 dim 1 : vector<2x256xf32>, i32 -> vector<2x256xf32>
    %292 = vector.broadcast %139 : f32 to vector<2x1xf32>
    %293 = vector.broadcast %90 : f32 to vector<2x1xf32>
    %294 = arith.select %181, %292, %293 : vector<2x1xi1>, vector<2x1xf32>
    %295 = arith.andi %20, %60 : vector<1x256xi1>
    %296 = vector.broadcast %294 : vector<2x1xf32> to vector<2x256xf32>
    %297 = arith.mulf %291, %296 : vector<2x256xf32>
    %cst_34 = arith.constant 0.000000e+00 : f32
    %298 = vector.shape_cast %295 : vector<1x256xi1> to vector<1x256xi1>
    %299 = vector.broadcast %298 : vector<1x256xi1> to vector<2x256xi1>
    %300 = vector.broadcast %cst_34 : f32 to vector<2x256xf32>
    %301 = arith.select %299, %297, %300 : vector<2x256xi1>, vector<2x256xf32>
    %302 = arith.addf %290, %301 : vector<2x256xf32>
    %c32_i32 = arith.constant 32 : i32
    %303 = tpu.dynamic_rotate %8 by %c32_i32 dim 1 : vector<2x256xf32>, i32 -> vector<2x256xf32>
    %304 = vector.broadcast %140 : f32 to vector<2x1xf32>
    %305 = vector.broadcast %91 : f32 to vector<2x1xf32>
    %306 = arith.select %181, %304, %305 : vector<2x1xi1>, vector<2x1xf32>
    %307 = arith.andi %20, %65 : vector<1x256xi1>
    %308 = vector.broadcast %306 : vector<2x1xf32> to vector<2x256xf32>
    %309 = arith.mulf %303, %308 : vector<2x256xf32>
    %cst_35 = arith.constant 0.000000e+00 : f32
    %310 = vector.shape_cast %307 : vector<1x256xi1> to vector<1x256xi1>
    %311 = vector.broadcast %310 : vector<1x256xi1> to vector<2x256xi1>
    %312 = vector.broadcast %cst_35 : f32 to vector<2x256xf32>
    %313 = arith.select %311, %309, %312 : vector<2x256xi1>, vector<2x256xf32>
    %314 = arith.addf %302, %313 : vector<2x256xf32>
    %c31_i32 = arith.constant 31 : i32
    %315 = tpu.dynamic_rotate %8 by %c31_i32 dim 1 : vector<2x256xf32>, i32 -> vector<2x256xf32>
    %316 = vector.broadcast %141 : f32 to vector<2x1xf32>
    %317 = vector.broadcast %92 : f32 to vector<2x1xf32>
    %318 = arith.select %181, %316, %317 : vector<2x1xi1>, vector<2x1xf32>
    %319 = arith.andi %20, %70 : vector<1x256xi1>
    %320 = vector.broadcast %318 : vector<2x1xf32> to vector<2x256xf32>
    %321 = arith.mulf %315, %320 : vector<2x256xf32>
    %cst_36 = arith.constant 0.000000e+00 : f32
    %322 = vector.shape_cast %319 : vector<1x256xi1> to vector<1x256xi1>
    %323 = vector.broadcast %322 : vector<1x256xi1> to vector<2x256xi1>
    %324 = vector.broadcast %cst_36 : f32 to vector<2x256xf32>
    %325 = arith.select %323, %321, %324 : vector<2x256xi1>, vector<2x256xf32>
    %326 = arith.addf %314, %325 : vector<2x256xf32>
    %c30_i32 = arith.constant 30 : i32
    %327 = tpu.dynamic_rotate %8 by %c30_i32 dim 1 : vector<2x256xf32>, i32 -> vector<2x256xf32>
    %328 = vector.broadcast %142 : f32 to vector<2x1xf32>
    %329 = vector.broadcast %93 : f32 to vector<2x1xf32>
    %330 = arith.select %181, %328, %329 : vector<2x1xi1>, vector<2x1xf32>
    %331 = arith.andi %20, %75 : vector<1x256xi1>
    %332 = vector.broadcast %330 : vector<2x1xf32> to vector<2x256xf32>
    %333 = arith.mulf %327, %332 : vector<2x256xf32>
    %cst_37 = arith.constant 0.000000e+00 : f32
    %334 = vector.shape_cast %331 : vector<1x256xi1> to vector<1x256xi1>
    %335 = vector.broadcast %334 : vector<1x256xi1> to vector<2x256xi1>
    %336 = vector.broadcast %cst_37 : f32 to vector<2x256xf32>
    %337 = arith.select %335, %333, %336 : vector<2x256xi1>, vector<2x256xf32>
    %338 = arith.addf %326, %337 : vector<2x256xf32>
    %c29_i32 = arith.constant 29 : i32
    %339 = tpu.dynamic_rotate %8 by %c29_i32 dim 1 : vector<2x256xf32>, i32 -> vector<2x256xf32>
    %340 = vector.broadcast %143 : f32 to vector<2x1xf32>
    %341 = vector.broadcast %94 : f32 to vector<2x1xf32>
    %342 = arith.select %181, %340, %341 : vector<2x1xi1>, vector<2x1xf32>
    %343 = arith.andi %20, %80 : vector<1x256xi1>
    %344 = vector.broadcast %342 : vector<2x1xf32> to vector<2x256xf32>
    %345 = arith.mulf %339, %344 : vector<2x256xf32>
    %cst_38 = arith.constant 0.000000e+00 : f32
    %346 = vector.shape_cast %343 : vector<1x256xi1> to vector<1x256xi1>
    %347 = vector.broadcast %346 : vector<1x256xi1> to vector<2x256xi1>
    %348 = vector.broadcast %cst_38 : f32 to vector<2x256xf32>
    %349 = arith.select %347, %345, %348 : vector<2x256xi1>, vector<2x256xf32>
    %350 = arith.addf %338, %349 : vector<2x256xf32>
    %c19_i32_39 = arith.constant 19 : i32
    %351 = tpu.dynamic_rotate %8 by %c19_i32_39 dim 1 : vector<2x256xf32>, i32 -> vector<2x256xf32>
    %352 = vector.broadcast %144 : f32 to vector<2x1xf32>
    %353 = vector.broadcast %95 : f32 to vector<2x1xf32>
    %354 = arith.select %181, %352, %353 : vector<2x1xi1>, vector<2x1xf32>
    %355 = arith.andi %25, %50 : vector<1x256xi1>
    %356 = vector.broadcast %354 : vector<2x1xf32> to vector<2x256xf32>
    %357 = arith.mulf %351, %356 : vector<2x256xf32>
    %cst_40 = arith.constant 0.000000e+00 : f32
    %358 = vector.shape_cast %355 : vector<1x256xi1> to vector<1x256xi1>
    %359 = vector.broadcast %358 : vector<1x256xi1> to vector<2x256xi1>
    %360 = vector.broadcast %cst_40 : f32 to vector<2x256xf32>
    %361 = arith.select %359, %357, %360 : vector<2x256xi1>, vector<2x256xf32>
    %362 = arith.addf %350, %361 : vector<2x256xf32>
    %c18_i32_41 = arith.constant 18 : i32
    %363 = tpu.dynamic_rotate %8 by %c18_i32_41 dim 1 : vector<2x256xf32>, i32 -> vector<2x256xf32>
    %364 = vector.broadcast %145 : f32 to vector<2x1xf32>
    %365 = vector.broadcast %96 : f32 to vector<2x1xf32>
    %366 = arith.select %181, %364, %365 : vector<2x1xi1>, vector<2x1xf32>
    %367 = arith.andi %25, %55 : vector<1x256xi1>
    %368 = vector.broadcast %366 : vector<2x1xf32> to vector<2x256xf32>
    %369 = arith.mulf %363, %368 : vector<2x256xf32>
    %cst_42 = arith.constant 0.000000e+00 : f32
    %370 = vector.shape_cast %367 : vector<1x256xi1> to vector<1x256xi1>
    %371 = vector.broadcast %370 : vector<1x256xi1> to vector<2x256xi1>
    %372 = vector.broadcast %cst_42 : f32 to vector<2x256xf32>
    %373 = arith.select %371, %369, %372 : vector<2x256xi1>, vector<2x256xf32>
    %374 = arith.addf %362, %373 : vector<2x256xf32>
    %c17_i32_43 = arith.constant 17 : i32
    %375 = tpu.dynamic_rotate %8 by %c17_i32_43 dim 1 : vector<2x256xf32>, i32 -> vector<2x256xf32>
    %376 = vector.broadcast %146 : f32 to vector<2x1xf32>
    %377 = vector.broadcast %97 : f32 to vector<2x1xf32>
    %378 = arith.select %181, %376, %377 : vector<2x1xi1>, vector<2x1xf32>
    %379 = arith.andi %25, %60 : vector<1x256xi1>
    %380 = vector.broadcast %378 : vector<2x1xf32> to vector<2x256xf32>
    %381 = arith.mulf %375, %380 : vector<2x256xf32>
    %cst_44 = arith.constant 0.000000e+00 : f32
    %382 = vector.shape_cast %379 : vector<1x256xi1> to vector<1x256xi1>
    %383 = vector.broadcast %382 : vector<1x256xi1> to vector<2x256xi1>
    %384 = vector.broadcast %cst_44 : f32 to vector<2x256xf32>
    %385 = arith.select %383, %381, %384 : vector<2x256xi1>, vector<2x256xf32>
    %386 = arith.addf %374, %385 : vector<2x256xf32>
    %c16_i32_45 = arith.constant 16 : i32
    %387 = tpu.dynamic_rotate %8 by %c16_i32_45 dim 1 : vector<2x256xf32>, i32 -> vector<2x256xf32>
    %388 = vector.broadcast %147 : f32 to vector<2x1xf32>
    %389 = vector.broadcast %98 : f32 to vector<2x1xf32>
    %390 = arith.select %181, %388, %389 : vector<2x1xi1>, vector<2x1xf32>
    %391 = arith.andi %25, %65 : vector<1x256xi1>
    %392 = vector.broadcast %390 : vector<2x1xf32> to vector<2x256xf32>
    %393 = arith.mulf %387, %392 : vector<2x256xf32>
    %cst_46 = arith.constant 0.000000e+00 : f32
    %394 = vector.shape_cast %391 : vector<1x256xi1> to vector<1x256xi1>
    %395 = vector.broadcast %394 : vector<1x256xi1> to vector<2x256xi1>
    %396 = vector.broadcast %cst_46 : f32 to vector<2x256xf32>
    %397 = arith.select %395, %393, %396 : vector<2x256xi1>, vector<2x256xf32>
    %398 = arith.addf %386, %397 : vector<2x256xf32>
    %c15_i32_47 = arith.constant 15 : i32
    %399 = tpu.dynamic_rotate %8 by %c15_i32_47 dim 1 : vector<2x256xf32>, i32 -> vector<2x256xf32>
    %400 = vector.broadcast %148 : f32 to vector<2x1xf32>
    %401 = vector.broadcast %99 : f32 to vector<2x1xf32>
    %402 = arith.select %181, %400, %401 : vector<2x1xi1>, vector<2x1xf32>
    %403 = arith.andi %25, %70 : vector<1x256xi1>
    %404 = vector.broadcast %402 : vector<2x1xf32> to vector<2x256xf32>
    %405 = arith.mulf %399, %404 : vector<2x256xf32>
    %cst_48 = arith.constant 0.000000e+00 : f32
    %406 = vector.shape_cast %403 : vector<1x256xi1> to vector<1x256xi1>
    %407 = vector.broadcast %406 : vector<1x256xi1> to vector<2x256xi1>
    %408 = vector.broadcast %cst_48 : f32 to vector<2x256xf32>
    %409 = arith.select %407, %405, %408 : vector<2x256xi1>, vector<2x256xf32>
    %410 = arith.addf %398, %409 : vector<2x256xf32>
    %c14_i32_49 = arith.constant 14 : i32
    %411 = tpu.dynamic_rotate %8 by %c14_i32_49 dim 1 : vector<2x256xf32>, i32 -> vector<2x256xf32>
    %412 = vector.broadcast %149 : f32 to vector<2x1xf32>
    %413 = vector.broadcast %100 : f32 to vector<2x1xf32>
    %414 = arith.select %181, %412, %413 : vector<2x1xi1>, vector<2x1xf32>
    %415 = arith.andi %25, %75 : vector<1x256xi1>
    %416 = vector.broadcast %414 : vector<2x1xf32> to vector<2x256xf32>
    %417 = arith.mulf %411, %416 : vector<2x256xf32>
    %cst_50 = arith.constant 0.000000e+00 : f32
    %418 = vector.shape_cast %415 : vector<1x256xi1> to vector<1x256xi1>
    %419 = vector.broadcast %418 : vector<1x256xi1> to vector<2x256xi1>
    %420 = vector.broadcast %cst_50 : f32 to vector<2x256xf32>
    %421 = arith.select %419, %417, %420 : vector<2x256xi1>, vector<2x256xf32>
    %422 = arith.addf %410, %421 : vector<2x256xf32>
    %c13_i32_51 = arith.constant 13 : i32
    %423 = tpu.dynamic_rotate %8 by %c13_i32_51 dim 1 : vector<2x256xf32>, i32 -> vector<2x256xf32>
    %424 = vector.broadcast %150 : f32 to vector<2x1xf32>
    %425 = vector.broadcast %101 : f32 to vector<2x1xf32>
    %426 = arith.select %181, %424, %425 : vector<2x1xi1>, vector<2x1xf32>
    %427 = arith.andi %25, %80 : vector<1x256xi1>
    %428 = vector.broadcast %426 : vector<2x1xf32> to vector<2x256xf32>
    %429 = arith.mulf %423, %428 : vector<2x256xf32>
    %cst_52 = arith.constant 0.000000e+00 : f32
    %430 = vector.shape_cast %427 : vector<1x256xi1> to vector<1x256xi1>
    %431 = vector.broadcast %430 : vector<1x256xi1> to vector<2x256xi1>
    %432 = vector.broadcast %cst_52 : f32 to vector<2x256xf32>
    %433 = arith.select %431, %429, %432 : vector<2x256xi1>, vector<2x256xf32>
    %434 = arith.addf %422, %433 : vector<2x256xf32>
    %c3_i32_53 = arith.constant 3 : i32
    %435 = tpu.dynamic_rotate %8 by %c3_i32_53 dim 1 : vector<2x256xf32>, i32 -> vector<2x256xf32>
    %436 = vector.broadcast %151 : f32 to vector<2x1xf32>
    %437 = vector.broadcast %102 : f32 to vector<2x1xf32>
    %438 = arith.select %181, %436, %437 : vector<2x1xi1>, vector<2x1xf32>
    %439 = arith.andi %30, %50 : vector<1x256xi1>
    %440 = vector.broadcast %438 : vector<2x1xf32> to vector<2x256xf32>
    %441 = arith.mulf %435, %440 : vector<2x256xf32>
    %cst_54 = arith.constant 0.000000e+00 : f32
    %442 = vector.shape_cast %439 : vector<1x256xi1> to vector<1x256xi1>
    %443 = vector.broadcast %442 : vector<1x256xi1> to vector<2x256xi1>
    %444 = vector.broadcast %cst_54 : f32 to vector<2x256xf32>
    %445 = arith.select %443, %441, %444 : vector<2x256xi1>, vector<2x256xf32>
    %446 = arith.addf %434, %445 : vector<2x256xf32>
    %c2_i32_55 = arith.constant 2 : i32
    %447 = tpu.dynamic_rotate %8 by %c2_i32_55 dim 1 : vector<2x256xf32>, i32 -> vector<2x256xf32>
    %448 = vector.broadcast %152 : f32 to vector<2x1xf32>
    %449 = vector.broadcast %103 : f32 to vector<2x1xf32>
    %450 = arith.select %181, %448, %449 : vector<2x1xi1>, vector<2x1xf32>
    %451 = arith.andi %30, %55 : vector<1x256xi1>
    %452 = vector.broadcast %450 : vector<2x1xf32> to vector<2x256xf32>
    %453 = arith.mulf %447, %452 : vector<2x256xf32>
    %cst_56 = arith.constant 0.000000e+00 : f32
    %454 = vector.shape_cast %451 : vector<1x256xi1> to vector<1x256xi1>
    %455 = vector.broadcast %454 : vector<1x256xi1> to vector<2x256xi1>
    %456 = vector.broadcast %cst_56 : f32 to vector<2x256xf32>
    %457 = arith.select %455, %453, %456 : vector<2x256xi1>, vector<2x256xf32>
    %458 = arith.addf %446, %457 : vector<2x256xf32>
    %c1_i32_57 = arith.constant 1 : i32
    %459 = tpu.dynamic_rotate %8 by %c1_i32_57 dim 1 : vector<2x256xf32>, i32 -> vector<2x256xf32>
    %460 = vector.broadcast %153 : f32 to vector<2x1xf32>
    %461 = vector.broadcast %104 : f32 to vector<2x1xf32>
    %462 = arith.select %181, %460, %461 : vector<2x1xi1>, vector<2x1xf32>
    %463 = arith.andi %30, %60 : vector<1x256xi1>
    %464 = vector.broadcast %462 : vector<2x1xf32> to vector<2x256xf32>
    %465 = arith.mulf %459, %464 : vector<2x256xf32>
    %cst_58 = arith.constant 0.000000e+00 : f32
    %466 = vector.shape_cast %463 : vector<1x256xi1> to vector<1x256xi1>
    %467 = vector.broadcast %466 : vector<1x256xi1> to vector<2x256xi1>
    %468 = vector.broadcast %cst_58 : f32 to vector<2x256xf32>
    %469 = arith.select %467, %465, %468 : vector<2x256xi1>, vector<2x256xf32>
    %470 = arith.addf %458, %469 : vector<2x256xf32>
    %471 = vector.broadcast %154 : f32 to vector<2x1xf32>
    %472 = vector.broadcast %105 : f32 to vector<2x1xf32>
    %473 = arith.select %181, %471, %472 : vector<2x1xi1>, vector<2x1xf32>
    %474 = arith.andi %30, %65 : vector<1x256xi1>
    %475 = vector.broadcast %473 : vector<2x1xf32> to vector<2x256xf32>
    %476 = arith.mulf %8, %475 : vector<2x256xf32>
    %cst_59 = arith.constant 0.000000e+00 : f32
    %477 = vector.shape_cast %474 : vector<1x256xi1> to vector<1x256xi1>
    %478 = vector.broadcast %477 : vector<1x256xi1> to vector<2x256xi1>
    %479 = vector.broadcast %cst_59 : f32 to vector<2x256xf32>
    %480 = arith.select %478, %476, %479 : vector<2x256xi1>, vector<2x256xf32>
    %481 = arith.addf %470, %480 : vector<2x256xf32>
    %c255_i32 = arith.constant 255 : i32
    %482 = tpu.dynamic_rotate %8 by %c255_i32 dim 1 : vector<2x256xf32>, i32 -> vector<2x256xf32>
    %483 = vector.broadcast %155 : f32 to vector<2x1xf32>
    %484 = vector.broadcast %106 : f32 to vector<2x1xf32>
    %485 = arith.select %181, %483, %484 : vector<2x1xi1>, vector<2x1xf32>
    %486 = arith.andi %30, %70 : vector<1x256xi1>
    %487 = vector.broadcast %485 : vector<2x1xf32> to vector<2x256xf32>
    %488 = arith.mulf %482, %487 : vector<2x256xf32>
    %cst_60 = arith.constant 0.000000e+00 : f32
    %489 = vector.shape_cast %486 : vector<1x256xi1> to vector<1x256xi1>
    %490 = vector.broadcast %489 : vector<1x256xi1> to vector<2x256xi1>
    %491 = vector.broadcast %cst_60 : f32 to vector<2x256xf32>
    %492 = arith.select %490, %488, %491 : vector<2x256xi1>, vector<2x256xf32>
    %493 = arith.addf %481, %492 : vector<2x256xf32>
    %c254_i32 = arith.constant 254 : i32
    %494 = tpu.dynamic_rotate %8 by %c254_i32 dim 1 : vector<2x256xf32>, i32 -> vector<2x256xf32>
    %495 = vector.broadcast %156 : f32 to vector<2x1xf32>
    %496 = vector.broadcast %107 : f32 to vector<2x1xf32>
    %497 = arith.select %181, %495, %496 : vector<2x1xi1>, vector<2x1xf32>
    %498 = arith.andi %30, %75 : vector<1x256xi1>
    %499 = vector.broadcast %497 : vector<2x1xf32> to vector<2x256xf32>
    %500 = arith.mulf %494, %499 : vector<2x256xf32>
    %cst_61 = arith.constant 0.000000e+00 : f32
    %501 = vector.shape_cast %498 : vector<1x256xi1> to vector<1x256xi1>
    %502 = vector.broadcast %501 : vector<1x256xi1> to vector<2x256xi1>
    %503 = vector.broadcast %cst_61 : f32 to vector<2x256xf32>
    %504 = arith.select %502, %500, %503 : vector<2x256xi1>, vector<2x256xf32>
    %505 = arith.addf %493, %504 : vector<2x256xf32>
    %c253_i32 = arith.constant 253 : i32
    %506 = tpu.dynamic_rotate %8 by %c253_i32 dim 1 : vector<2x256xf32>, i32 -> vector<2x256xf32>
    %507 = vector.broadcast %157 : f32 to vector<2x1xf32>
    %508 = vector.broadcast %108 : f32 to vector<2x1xf32>
    %509 = arith.select %181, %507, %508 : vector<2x1xi1>, vector<2x1xf32>
    %510 = arith.andi %30, %80 : vector<1x256xi1>
    %511 = vector.broadcast %509 : vector<2x1xf32> to vector<2x256xf32>
    %512 = arith.mulf %506, %511 : vector<2x256xf32>
    %cst_62 = arith.constant 0.000000e+00 : f32
    %513 = vector.shape_cast %510 : vector<1x256xi1> to vector<1x256xi1>
    %514 = vector.broadcast %513 : vector<1x256xi1> to vector<2x256xi1>
    %515 = vector.broadcast %cst_62 : f32 to vector<2x256xf32>
    %516 = arith.select %514, %512, %515 : vector<2x256xi1>, vector<2x256xf32>
    %517 = arith.addf %505, %516 : vector<2x256xf32>
    %c243_i32 = arith.constant 243 : i32
    %518 = tpu.dynamic_rotate %8 by %c243_i32 dim 1 : vector<2x256xf32>, i32 -> vector<2x256xf32>
    %519 = vector.broadcast %158 : f32 to vector<2x1xf32>
    %520 = vector.broadcast %109 : f32 to vector<2x1xf32>
    %521 = arith.select %181, %519, %520 : vector<2x1xi1>, vector<2x1xf32>
    %522 = arith.andi %35, %50 : vector<1x256xi1>
    %523 = vector.broadcast %521 : vector<2x1xf32> to vector<2x256xf32>
    %524 = arith.mulf %518, %523 : vector<2x256xf32>
    %cst_63 = arith.constant 0.000000e+00 : f32
    %525 = vector.shape_cast %522 : vector<1x256xi1> to vector<1x256xi1>
    %526 = vector.broadcast %525 : vector<1x256xi1> to vector<2x256xi1>
    %527 = vector.broadcast %cst_63 : f32 to vector<2x256xf32>
    %528 = arith.select %526, %524, %527 : vector<2x256xi1>, vector<2x256xf32>
    %529 = arith.addf %517, %528 : vector<2x256xf32>
    %c242_i32 = arith.constant 242 : i32
    %530 = tpu.dynamic_rotate %8 by %c242_i32 dim 1 : vector<2x256xf32>, i32 -> vector<2x256xf32>
    %531 = vector.broadcast %159 : f32 to vector<2x1xf32>
    %532 = vector.broadcast %110 : f32 to vector<2x1xf32>
    %533 = arith.select %181, %531, %532 : vector<2x1xi1>, vector<2x1xf32>
    %534 = arith.andi %35, %55 : vector<1x256xi1>
    %535 = vector.broadcast %533 : vector<2x1xf32> to vector<2x256xf32>
    %536 = arith.mulf %530, %535 : vector<2x256xf32>
    %cst_64 = arith.constant 0.000000e+00 : f32
    %537 = vector.shape_cast %534 : vector<1x256xi1> to vector<1x256xi1>
    %538 = vector.broadcast %537 : vector<1x256xi1> to vector<2x256xi1>
    %539 = vector.broadcast %cst_64 : f32 to vector<2x256xf32>
    %540 = arith.select %538, %536, %539 : vector<2x256xi1>, vector<2x256xf32>
    %541 = arith.addf %529, %540 : vector<2x256xf32>
    %c241_i32 = arith.constant 241 : i32
    %542 = tpu.dynamic_rotate %8 by %c241_i32 dim 1 : vector<2x256xf32>, i32 -> vector<2x256xf32>
    %543 = vector.broadcast %160 : f32 to vector<2x1xf32>
    %544 = vector.broadcast %111 : f32 to vector<2x1xf32>
    %545 = arith.select %181, %543, %544 : vector<2x1xi1>, vector<2x1xf32>
    %546 = arith.andi %35, %60 : vector<1x256xi1>
    %547 = vector.broadcast %545 : vector<2x1xf32> to vector<2x256xf32>
    %548 = arith.mulf %542, %547 : vector<2x256xf32>
    %cst_65 = arith.constant 0.000000e+00 : f32
    %549 = vector.shape_cast %546 : vector<1x256xi1> to vector<1x256xi1>
    %550 = vector.broadcast %549 : vector<1x256xi1> to vector<2x256xi1>
    %551 = vector.broadcast %cst_65 : f32 to vector<2x256xf32>
    %552 = arith.select %550, %548, %551 : vector<2x256xi1>, vector<2x256xf32>
    %553 = arith.addf %541, %552 : vector<2x256xf32>
    %c240_i32 = arith.constant 240 : i32
    %554 = tpu.dynamic_rotate %8 by %c240_i32 dim 1 : vector<2x256xf32>, i32 -> vector<2x256xf32>
    %555 = vector.broadcast %161 : f32 to vector<2x1xf32>
    %556 = vector.broadcast %112 : f32 to vector<2x1xf32>
    %557 = arith.select %181, %555, %556 : vector<2x1xi1>, vector<2x1xf32>
    %558 = arith.andi %35, %65 : vector<1x256xi1>
    %559 = vector.broadcast %557 : vector<2x1xf32> to vector<2x256xf32>
    %560 = arith.mulf %554, %559 : vector<2x256xf32>
    %cst_66 = arith.constant 0.000000e+00 : f32
    %561 = vector.shape_cast %558 : vector<1x256xi1> to vector<1x256xi1>
    %562 = vector.broadcast %561 : vector<1x256xi1> to vector<2x256xi1>
    %563 = vector.broadcast %cst_66 : f32 to vector<2x256xf32>
    %564 = arith.select %562, %560, %563 : vector<2x256xi1>, vector<2x256xf32>
    %565 = arith.addf %553, %564 : vector<2x256xf32>
    %c239_i32 = arith.constant 239 : i32
    %566 = tpu.dynamic_rotate %8 by %c239_i32 dim 1 : vector<2x256xf32>, i32 -> vector<2x256xf32>
    %567 = vector.broadcast %162 : f32 to vector<2x1xf32>
    %568 = vector.broadcast %113 : f32 to vector<2x1xf32>
    %569 = arith.select %181, %567, %568 : vector<2x1xi1>, vector<2x1xf32>
    %570 = arith.andi %35, %70 : vector<1x256xi1>
    %571 = vector.broadcast %569 : vector<2x1xf32> to vector<2x256xf32>
    %572 = arith.mulf %566, %571 : vector<2x256xf32>
    %cst_67 = arith.constant 0.000000e+00 : f32
    %573 = vector.shape_cast %570 : vector<1x256xi1> to vector<1x256xi1>
    %574 = vector.broadcast %573 : vector<1x256xi1> to vector<2x256xi1>
    %575 = vector.broadcast %cst_67 : f32 to vector<2x256xf32>
    %576 = arith.select %574, %572, %575 : vector<2x256xi1>, vector<2x256xf32>
    %577 = arith.addf %565, %576 : vector<2x256xf32>
    %c238_i32 = arith.constant 238 : i32
    %578 = tpu.dynamic_rotate %8 by %c238_i32 dim 1 : vector<2x256xf32>, i32 -> vector<2x256xf32>
    %579 = vector.broadcast %163 : f32 to vector<2x1xf32>
    %580 = vector.broadcast %114 : f32 to vector<2x1xf32>
    %581 = arith.select %181, %579, %580 : vector<2x1xi1>, vector<2x1xf32>
    %582 = arith.andi %35, %75 : vector<1x256xi1>
    %583 = vector.broadcast %581 : vector<2x1xf32> to vector<2x256xf32>
    %584 = arith.mulf %578, %583 : vector<2x256xf32>
    %cst_68 = arith.constant 0.000000e+00 : f32
    %585 = vector.shape_cast %582 : vector<1x256xi1> to vector<1x256xi1>
    %586 = vector.broadcast %585 : vector<1x256xi1> to vector<2x256xi1>
    %587 = vector.broadcast %cst_68 : f32 to vector<2x256xf32>
    %588 = arith.select %586, %584, %587 : vector<2x256xi1>, vector<2x256xf32>
    %589 = arith.addf %577, %588 : vector<2x256xf32>
    %c237_i32 = arith.constant 237 : i32
    %590 = tpu.dynamic_rotate %8 by %c237_i32 dim 1 : vector<2x256xf32>, i32 -> vector<2x256xf32>
    %591 = vector.broadcast %164 : f32 to vector<2x1xf32>
    %592 = vector.broadcast %115 : f32 to vector<2x1xf32>
    %593 = arith.select %181, %591, %592 : vector<2x1xi1>, vector<2x1xf32>
    %594 = arith.andi %35, %80 : vector<1x256xi1>
    %595 = vector.broadcast %593 : vector<2x1xf32> to vector<2x256xf32>
    %596 = arith.mulf %590, %595 : vector<2x256xf32>
    %cst_69 = arith.constant 0.000000e+00 : f32
    %597 = vector.shape_cast %594 : vector<1x256xi1> to vector<1x256xi1>
    %598 = vector.broadcast %597 : vector<1x256xi1> to vector<2x256xi1>
    %599 = vector.broadcast %cst_69 : f32 to vector<2x256xf32>
    %600 = arith.select %598, %596, %599 : vector<2x256xi1>, vector<2x256xf32>
    %601 = arith.addf %589, %600 : vector<2x256xf32>
    %c227_i32 = arith.constant 227 : i32
    %602 = tpu.dynamic_rotate %8 by %c227_i32 dim 1 : vector<2x256xf32>, i32 -> vector<2x256xf32>
    %603 = vector.broadcast %165 : f32 to vector<2x1xf32>
    %604 = vector.broadcast %116 : f32 to vector<2x1xf32>
    %605 = arith.select %181, %603, %604 : vector<2x1xi1>, vector<2x1xf32>
    %606 = arith.andi %40, %50 : vector<1x256xi1>
    %607 = vector.broadcast %605 : vector<2x1xf32> to vector<2x256xf32>
    %608 = arith.mulf %602, %607 : vector<2x256xf32>
    %cst_70 = arith.constant 0.000000e+00 : f32
    %609 = vector.shape_cast %606 : vector<1x256xi1> to vector<1x256xi1>
    %610 = vector.broadcast %609 : vector<1x256xi1> to vector<2x256xi1>
    %611 = vector.broadcast %cst_70 : f32 to vector<2x256xf32>
    %612 = arith.select %610, %608, %611 : vector<2x256xi1>, vector<2x256xf32>
    %613 = arith.addf %601, %612 : vector<2x256xf32>
    %c226_i32 = arith.constant 226 : i32
    %614 = tpu.dynamic_rotate %8 by %c226_i32 dim 1 : vector<2x256xf32>, i32 -> vector<2x256xf32>
    %615 = vector.broadcast %166 : f32 to vector<2x1xf32>
    %616 = vector.broadcast %117 : f32 to vector<2x1xf32>
    %617 = arith.select %181, %615, %616 : vector<2x1xi1>, vector<2x1xf32>
    %618 = arith.andi %40, %55 : vector<1x256xi1>
    %619 = vector.broadcast %617 : vector<2x1xf32> to vector<2x256xf32>
    %620 = arith.mulf %614, %619 : vector<2x256xf32>
    %cst_71 = arith.constant 0.000000e+00 : f32
    %621 = vector.shape_cast %618 : vector<1x256xi1> to vector<1x256xi1>
    %622 = vector.broadcast %621 : vector<1x256xi1> to vector<2x256xi1>
    %623 = vector.broadcast %cst_71 : f32 to vector<2x256xf32>
    %624 = arith.select %622, %620, %623 : vector<2x256xi1>, vector<2x256xf32>
    %625 = arith.addf %613, %624 : vector<2x256xf32>
    %c225_i32 = arith.constant 225 : i32
    %626 = tpu.dynamic_rotate %8 by %c225_i32 dim 1 : vector<2x256xf32>, i32 -> vector<2x256xf32>
    %627 = vector.broadcast %167 : f32 to vector<2x1xf32>
    %628 = vector.broadcast %118 : f32 to vector<2x1xf32>
    %629 = arith.select %181, %627, %628 : vector<2x1xi1>, vector<2x1xf32>
    %630 = arith.andi %40, %60 : vector<1x256xi1>
    %631 = vector.broadcast %629 : vector<2x1xf32> to vector<2x256xf32>
    %632 = arith.mulf %626, %631 : vector<2x256xf32>
    %cst_72 = arith.constant 0.000000e+00 : f32
    %633 = vector.shape_cast %630 : vector<1x256xi1> to vector<1x256xi1>
    %634 = vector.broadcast %633 : vector<1x256xi1> to vector<2x256xi1>
    %635 = vector.broadcast %cst_72 : f32 to vector<2x256xf32>
    %636 = arith.select %634, %632, %635 : vector<2x256xi1>, vector<2x256xf32>
    %637 = arith.addf %625, %636 : vector<2x256xf32>
    %c224_i32 = arith.constant 224 : i32
    %638 = tpu.dynamic_rotate %8 by %c224_i32 dim 1 : vector<2x256xf32>, i32 -> vector<2x256xf32>
    %639 = vector.broadcast %168 : f32 to vector<2x1xf32>
    %640 = vector.broadcast %119 : f32 to vector<2x1xf32>
    %641 = arith.select %181, %639, %640 : vector<2x1xi1>, vector<2x1xf32>
    %642 = arith.andi %40, %65 : vector<1x256xi1>
    %643 = vector.broadcast %641 : vector<2x1xf32> to vector<2x256xf32>
    %644 = arith.mulf %638, %643 : vector<2x256xf32>
    %cst_73 = arith.constant 0.000000e+00 : f32
    %645 = vector.shape_cast %642 : vector<1x256xi1> to vector<1x256xi1>
    %646 = vector.broadcast %645 : vector<1x256xi1> to vector<2x256xi1>
    %647 = vector.broadcast %cst_73 : f32 to vector<2x256xf32>
    %648 = arith.select %646, %644, %647 : vector<2x256xi1>, vector<2x256xf32>
    %649 = arith.addf %637, %648 : vector<2x256xf32>
    %c223_i32 = arith.constant 223 : i32
    %650 = tpu.dynamic_rotate %8 by %c223_i32 dim 1 : vector<2x256xf32>, i32 -> vector<2x256xf32>
    %651 = vector.broadcast %169 : f32 to vector<2x1xf32>
    %652 = vector.broadcast %120 : f32 to vector<2x1xf32>
    %653 = arith.select %181, %651, %652 : vector<2x1xi1>, vector<2x1xf32>
    %654 = arith.andi %40, %70 : vector<1x256xi1>
    %655 = vector.broadcast %653 : vector<2x1xf32> to vector<2x256xf32>
    %656 = arith.mulf %650, %655 : vector<2x256xf32>
    %cst_74 = arith.constant 0.000000e+00 : f32
    %657 = vector.shape_cast %654 : vector<1x256xi1> to vector<1x256xi1>
    %658 = vector.broadcast %657 : vector<1x256xi1> to vector<2x256xi1>
    %659 = vector.broadcast %cst_74 : f32 to vector<2x256xf32>
    %660 = arith.select %658, %656, %659 : vector<2x256xi1>, vector<2x256xf32>
    %661 = arith.addf %649, %660 : vector<2x256xf32>
    %c222_i32 = arith.constant 222 : i32
    %662 = tpu.dynamic_rotate %8 by %c222_i32 dim 1 : vector<2x256xf32>, i32 -> vector<2x256xf32>
    %663 = vector.broadcast %170 : f32 to vector<2x1xf32>
    %664 = vector.broadcast %121 : f32 to vector<2x1xf32>
    %665 = arith.select %181, %663, %664 : vector<2x1xi1>, vector<2x1xf32>
    %666 = arith.andi %40, %75 : vector<1x256xi1>
    %667 = vector.broadcast %665 : vector<2x1xf32> to vector<2x256xf32>
    %668 = arith.mulf %662, %667 : vector<2x256xf32>
    %cst_75 = arith.constant 0.000000e+00 : f32
    %669 = vector.shape_cast %666 : vector<1x256xi1> to vector<1x256xi1>
    %670 = vector.broadcast %669 : vector<1x256xi1> to vector<2x256xi1>
    %671 = vector.broadcast %cst_75 : f32 to vector<2x256xf32>
    %672 = arith.select %670, %668, %671 : vector<2x256xi1>, vector<2x256xf32>
    %673 = arith.addf %661, %672 : vector<2x256xf32>
    %c221_i32 = arith.constant 221 : i32
    %674 = tpu.dynamic_rotate %8 by %c221_i32 dim 1 : vector<2x256xf32>, i32 -> vector<2x256xf32>
    %675 = vector.broadcast %171 : f32 to vector<2x1xf32>
    %676 = vector.broadcast %122 : f32 to vector<2x1xf32>
    %677 = arith.select %181, %675, %676 : vector<2x1xi1>, vector<2x1xf32>
    %678 = arith.andi %40, %80 : vector<1x256xi1>
    %679 = vector.broadcast %677 : vector<2x1xf32> to vector<2x256xf32>
    %680 = arith.mulf %674, %679 : vector<2x256xf32>
    %cst_76 = arith.constant 0.000000e+00 : f32
    %681 = vector.shape_cast %678 : vector<1x256xi1> to vector<1x256xi1>
    %682 = vector.broadcast %681 : vector<1x256xi1> to vector<2x256xi1>
    %683 = vector.broadcast %cst_76 : f32 to vector<2x256xf32>
    %684 = arith.select %682, %680, %683 : vector<2x256xi1>, vector<2x256xf32>
    %685 = arith.addf %673, %684 : vector<2x256xf32>
    %c211_i32 = arith.constant 211 : i32
    %686 = tpu.dynamic_rotate %8 by %c211_i32 dim 1 : vector<2x256xf32>, i32 -> vector<2x256xf32>
    %687 = vector.broadcast %172 : f32 to vector<2x1xf32>
    %688 = vector.broadcast %123 : f32 to vector<2x1xf32>
    %689 = arith.select %181, %687, %688 : vector<2x1xi1>, vector<2x1xf32>
    %690 = arith.andi %45, %50 : vector<1x256xi1>
    %691 = vector.broadcast %689 : vector<2x1xf32> to vector<2x256xf32>
    %692 = arith.mulf %686, %691 : vector<2x256xf32>
    %cst_77 = arith.constant 0.000000e+00 : f32
    %693 = vector.shape_cast %690 : vector<1x256xi1> to vector<1x256xi1>
    %694 = vector.broadcast %693 : vector<1x256xi1> to vector<2x256xi1>
    %695 = vector.broadcast %cst_77 : f32 to vector<2x256xf32>
    %696 = arith.select %694, %692, %695 : vector<2x256xi1>, vector<2x256xf32>
    %697 = arith.addf %685, %696 : vector<2x256xf32>
    %c210_i32 = arith.constant 210 : i32
    %698 = tpu.dynamic_rotate %8 by %c210_i32 dim 1 : vector<2x256xf32>, i32 -> vector<2x256xf32>
    %699 = vector.broadcast %173 : f32 to vector<2x1xf32>
    %700 = vector.broadcast %124 : f32 to vector<2x1xf32>
    %701 = arith.select %181, %699, %700 : vector<2x1xi1>, vector<2x1xf32>
    %702 = arith.andi %45, %55 : vector<1x256xi1>
    %703 = vector.broadcast %701 : vector<2x1xf32> to vector<2x256xf32>
    %704 = arith.mulf %698, %703 : vector<2x256xf32>
    %cst_78 = arith.constant 0.000000e+00 : f32
    %705 = vector.shape_cast %702 : vector<1x256xi1> to vector<1x256xi1>
    %706 = vector.broadcast %705 : vector<1x256xi1> to vector<2x256xi1>
    %707 = vector.broadcast %cst_78 : f32 to vector<2x256xf32>
    %708 = arith.select %706, %704, %707 : vector<2x256xi1>, vector<2x256xf32>
    %709 = arith.addf %697, %708 : vector<2x256xf32>
    %c209_i32 = arith.constant 209 : i32
    %710 = tpu.dynamic_rotate %8 by %c209_i32 dim 1 : vector<2x256xf32>, i32 -> vector<2x256xf32>
    %711 = vector.broadcast %174 : f32 to vector<2x1xf32>
    %712 = vector.broadcast %125 : f32 to vector<2x1xf32>
    %713 = arith.select %181, %711, %712 : vector<2x1xi1>, vector<2x1xf32>
    %714 = arith.andi %45, %60 : vector<1x256xi1>
    %715 = vector.broadcast %713 : vector<2x1xf32> to vector<2x256xf32>
    %716 = arith.mulf %710, %715 : vector<2x256xf32>
    %cst_79 = arith.constant 0.000000e+00 : f32
    %717 = vector.shape_cast %714 : vector<1x256xi1> to vector<1x256xi1>
    %718 = vector.broadcast %717 : vector<1x256xi1> to vector<2x256xi1>
    %719 = vector.broadcast %cst_79 : f32 to vector<2x256xf32>
    %720 = arith.select %718, %716, %719 : vector<2x256xi1>, vector<2x256xf32>
    %721 = arith.addf %709, %720 : vector<2x256xf32>
    %c208_i32 = arith.constant 208 : i32
    %722 = tpu.dynamic_rotate %8 by %c208_i32 dim 1 : vector<2x256xf32>, i32 -> vector<2x256xf32>
    %723 = vector.broadcast %175 : f32 to vector<2x1xf32>
    %724 = vector.broadcast %126 : f32 to vector<2x1xf32>
    %725 = arith.select %181, %723, %724 : vector<2x1xi1>, vector<2x1xf32>
    %726 = arith.andi %45, %65 : vector<1x256xi1>
    %727 = vector.broadcast %725 : vector<2x1xf32> to vector<2x256xf32>
    %728 = arith.mulf %722, %727 : vector<2x256xf32>
    %cst_80 = arith.constant 0.000000e+00 : f32
    %729 = vector.shape_cast %726 : vector<1x256xi1> to vector<1x256xi1>
    %730 = vector.broadcast %729 : vector<1x256xi1> to vector<2x256xi1>
    %731 = vector.broadcast %cst_80 : f32 to vector<2x256xf32>
    %732 = arith.select %730, %728, %731 : vector<2x256xi1>, vector<2x256xf32>
    %733 = arith.addf %721, %732 : vector<2x256xf32>
    %c207_i32 = arith.constant 207 : i32
    %734 = tpu.dynamic_rotate %8 by %c207_i32 dim 1 : vector<2x256xf32>, i32 -> vector<2x256xf32>
    %735 = vector.broadcast %176 : f32 to vector<2x1xf32>
    %736 = vector.broadcast %127 : f32 to vector<2x1xf32>
    %737 = arith.select %181, %735, %736 : vector<2x1xi1>, vector<2x1xf32>
    %738 = arith.andi %45, %70 : vector<1x256xi1>
    %739 = vector.broadcast %737 : vector<2x1xf32> to vector<2x256xf32>
    %740 = arith.mulf %734, %739 : vector<2x256xf32>
    %cst_81 = arith.constant 0.000000e+00 : f32
    %741 = vector.shape_cast %738 : vector<1x256xi1> to vector<1x256xi1>
    %742 = vector.broadcast %741 : vector<1x256xi1> to vector<2x256xi1>
    %743 = vector.broadcast %cst_81 : f32 to vector<2x256xf32>
    %744 = arith.select %742, %740, %743 : vector<2x256xi1>, vector<2x256xf32>
    %745 = arith.addf %733, %744 : vector<2x256xf32>
    %c206_i32 = arith.constant 206 : i32
    %746 = tpu.dynamic_rotate %8 by %c206_i32 dim 1 : vector<2x256xf32>, i32 -> vector<2x256xf32>
    %747 = vector.broadcast %177 : f32 to vector<2x1xf32>
    %748 = vector.broadcast %128 : f32 to vector<2x1xf32>
    %749 = arith.select %181, %747, %748 : vector<2x1xi1>, vector<2x1xf32>
    %750 = arith.andi %45, %75 : vector<1x256xi1>
    %751 = vector.broadcast %749 : vector<2x1xf32> to vector<2x256xf32>
    %752 = arith.mulf %746, %751 : vector<2x256xf32>
    %cst_82 = arith.constant 0.000000e+00 : f32
    %753 = vector.shape_cast %750 : vector<1x256xi1> to vector<1x256xi1>
    %754 = vector.broadcast %753 : vector<1x256xi1> to vector<2x256xi1>
    %755 = vector.broadcast %cst_82 : f32 to vector<2x256xf32>
    %756 = arith.select %754, %752, %755 : vector<2x256xi1>, vector<2x256xf32>
    %757 = arith.addf %745, %756 : vector<2x256xf32>
    %c205_i32 = arith.constant 205 : i32
    %758 = tpu.dynamic_rotate %8 by %c205_i32 dim 1 : vector<2x256xf32>, i32 -> vector<2x256xf32>
    %759 = vector.broadcast %178 : f32 to vector<2x1xf32>
    %760 = vector.broadcast %129 : f32 to vector<2x1xf32>
    %761 = arith.select %181, %759, %760 : vector<2x1xi1>, vector<2x1xf32>
    %762 = arith.andi %45, %80 : vector<1x256xi1>
    %763 = vector.broadcast %761 : vector<2x1xf32> to vector<2x256xf32>
    %764 = arith.mulf %758, %763 : vector<2x256xf32>
    %cst_83 = arith.constant 0.000000e+00 : f32
    %765 = vector.shape_cast %762 : vector<1x256xi1> to vector<1x256xi1>
    %766 = vector.broadcast %765 : vector<1x256xi1> to vector<2x256xi1>
    %767 = vector.broadcast %cst_83 : f32 to vector<2x256xf32>
    %768 = arith.select %766, %764, %767 : vector<2x256xi1>, vector<2x256xf32>
    %769 = arith.addf %757, %768 : vector<2x256xf32>
    %cst_84 = arith.constant dense<0.000000e+00> : vector<256xf32>
    %770 = vector.multi_reduction <add>, %769, %cst_84 [0] : vector<2x256xf32> to vector<256xf32>
    %771 = vector.shape_cast %770 : vector<256xf32> to vector<1x256xf32>
    %772 = arith.negf %771 : vector<1x256xf32>
    %773 = math.exp %772 : vector<1x256xf32>
    %cst_85 = arith.constant 1.000000e+00 : f32
    %774 = vector.broadcast %cst_85 : f32 to vector<1x256xf32>
    %775 = arith.addf %774, %773 : vector<1x256xf32>
    %776 = arith.divf %774, %775 : vector<1x256xf32>
    %c0_86 = arith.constant 0 : index
    %c0_87 = arith.constant 0 : index
    %c0_88 = arith.constant 0 : index
    %777 = vector.load %arg1[%c0_86, %c0_87, %c0_88] : memref<1x4x256xf32, #tpu.memory_space<vmem>>, vector<1x4x256xf32>
    %778 = vector.shape_cast %777 : vector<1x4x256xf32> to vector<4x256xf32>
    %779 = vector.broadcast %776 : vector<1x256xf32> to vector<4x256xf32>
    %780 = arith.mulf %778, %779 : vector<4x256xf32>
    %c0_89 = arith.constant 0 : index
    %c0_90 = arith.constant 0 : index
    %c0_91 = arith.constant 0 : index
    %781 = vector.load %arg4[%c0_89, %c0_90, %c0_91] : memref<1x4x256xf32, #tpu.memory_space<vmem>>, vector<1x4x256xf32>
    %782 = vector.shape_cast %781 : vector<1x4x256xf32> to vector<4x256xf32>
    %783 = vector.shape_cast %780 : vector<4x256xf32> to vector<1x4x256xf32>
    tpu.vector_store %arg4[%c0_89, %c0_90, %c0_91], %783 {strides = array<i32>} : memref<1x4x256xf32, #tpu.memory_space<vmem>>, vector<1x4x256xf32>,
    return
  }
  func.func @transform_0(%arg0: i32) -> (i32, i32, i32) {
    %c0_i32 = arith.constant 0 : i32
    %c0_i32_0 = arith.constant 0 : i32
    %c0_i32_1 = arith.constant 0 : i32
    return %arg0, %c0_i32, %c0_i32_0 : i32, i32, i32
  }
  func.func @transform_1(%arg0: i32) -> i32 {
    %c0_i32 = arith.constant 0 : i32
    %c0_i32_0 = arith.constant 0 : i32
    return %c0_i32 : i32
  }
  func.func @transform_2(%arg0: i32) -> (i32, i32) {
    %c0_i32 = arith.constant 0 : i32
    %c0_i32_0 = arith.constant 0 : i32
    %c0_i32_1 = arith.constant 0 : i32
    return %c0_i32, %c0_i32_0 : i32, i32
  }
  func.func @transform_3(%arg0: i32) -> (i32, i32, i32) {
    %c0_i32 = arith.constant 0 : i32
    %c0_i32_0 = arith.constant 0 : i32
    %c0_i32_1 = arith.constant 0 : i32
    return %arg0, %c0_i32, %c0_i32_0 : i32, i32, i32
  }
}

</mosaic_0001>

<bundles_post_ra>
// kernel: tpu_custom_call.1
= control target key start
LH: loop header
LB: loop body
LE: loop exit
PB: predicated region body
PF: predicated region fallthrough
CT: control target
= control target key end

     0   :  { %8 = vsyncpa [#allocation3], 0  ;;  %s4234_s0 = inlined_call_operand.hbm [shape: f32[2,4,256], index: 0, kind: input, shape index: {}]   ;;  %s4235_s1 = inlined_call_operand.hbm [shape: f32[98], index: 1, kind: input, shape index: {}]   ;;  %s4236_s2 = inlined_call_operand.hbm [shape: s32[2,256], index: 2, kind: input, shape index: {}]   ;;  %s4237_s3 = inlined_call_operand.hbm [shape: f32[2,4,256], index: 3, kind: output, shape index: {}]  }
   0x1   :  { %10 = vsyncpa [#allocation3 + $0x1], 0 }
   0x2   :  { %11 = vsyncpa [#allocation5], 0 }
   0x3   :  { %12 = vsyncpa [#allocation8], 0 }
   0x4   :  { %13 = vsyncpa [#allocation4], 0 }
   0x5   :  { %15 = vsyncpa [#allocation4 + $0x1], 0  ;;  %s2118_s12 = smov 0   ;;  %s2120_s13 = smov 0  }
   0x6   :  { %s2122_s14 = smov 0   ;;  %s2124_s15 = smov 0  }
   0x7 LB: > { %s2139_s16 = sadd.s32 4294967295, %s2045_s15   ;;  %s1652_s17 = sadd.s32 4294967294, %s2045_s15   ;;  %s2045_s15 = sphi %s2124_s15, %s4570_s15   ;;  %s2041_s14 = sphi %s2122_s14, %s4569_s14   ;;  %s2037_s13 = sphi %s2120_s13, %s4568_s13   ;;  %s2033_s12 = sphi %s2118_s12, %s4567_s12  }
   0x8   : > { %p41_p0 = scmp.ne.s32.totalorder %s2037_s13, %s2033_s12  ;;  %p42_p1 = scmp.eq.s32.totalorder %s2139_s16, 0 }
   0x9   : > { %p107_p2 = scmp.eq.s32.totalorder %s2139_s16, 1  ;;  %p113_p3 = scmp.eq.s32.totalorder %s1652_s17, 1 }
   0xa   : > { %p2148_p4 = por %p42_p1, %p41_p0  ;;  %p1653_p5 = scmp.ge.s32.totalorder %s2045_s15, 1 }
   0xb   : > { %p2153_p6 = por %p113_p3, %p41_p0  ;;  %p120_p7 = scmp.lt.s32.totalorder %s2045_s15, 3 }
   0xc   : > { %s132_s22 = sshll.u32 %s4235_s1, 4  ;;  %s142_s26 = sshll.u32 %s4236_s2, 4  ;;  %s133_s22 = int_to_ptr.hbm [resolvable:$true] %s132_s22  ;;  %s143_s26 = int_to_ptr.hbm [resolvable:$true] %s142_s26 }
   0xd   : > { %p2161_p8 = pnand %p1653_p5, %p120_p7  ;;  %s2047_s27 = smov [#allocation7]  }
   0xe   : > { %s144_s28 = sshll.u32 %s2047_s27, 4  ;;  %s2048_s29 = smov [#allocation6]   ;;  %s145_s28 = int_to_ptr.vmem [resolvable:$true] %s144_s28 }
   0xf   : > { %p1783_p10 = pneg %p2161_p8  ;;  %s2174_s30 = sadd.s32 1, %s2045_s15  }
  0x10   : > { %s28_s4 = sadd.s32 1, %s2041_s14  ;;  %s25_s5 = ssub.s32 %s2045_s15, %s2174_s30 }
  0x11   : > { %p1784_p11 = pnand %p1783_p10, %p42_p1  ;;  %p35_p12 = scmp.ne.s32.totalorder %s2041_s14, %s2037_s13 }
  0x12   : > { %p26_p13 = scmp.eq.s32.totalorder %s25_s5, 0  ;;  %p36_p0 = scmp.eq.s32.totalorder %s2045_s15, 0 }
  0x13   : > { %1786 = dma.hbm_to_smem (!%p1784_p11), %s133_s22, 16, %s2048_s29, [#allocation5]  }
  0x14   : > { %1789 = dma.hbm_to_vmem [thread:$0]  (!%p1784_p11), %s143_s26, 64, %s145_s28, [#allocation8]  }
  0x15   : > { %p2184_p3 = por %p107_p2, %p35_p12  ;;  %p1800_p5 = scmp.lt.s32.totalorder %s2045_s15, 2 }
  0x16   : > { %s2190_s7 = scalar_select %p26_p13, %s2041_s14, %s28_s4  }
  0x17   : > { %p37_p7 = por %p36_p0, %p35_p12  ;;  %s155_s8 = sand.u32 1, %s2041_s14  }
  0x18   : > { %s1657_s9 = sshll.u32 %s155_s8, 3  ;;  %s1769_s10 = sshll.u32 %s2045_s15, 3 }
  0x19   : > { %s164_s20 = scalar_lea.hbm %s4234_s0, %s1769_s10  ;;  %s159_s21 = scalar_lea.vmem [#allocation2], %s1657_s9 }
  0x1a   : > { %s168_s22 = sshll.u32 %s159_s21, 4  ;;  %s166_s24 = sshll.u32 %s164_s20, 4  ;;  %s169_s22 = int_to_ptr.vmem [resolvable:$true] %s168_s22  ;;  %s167_s24 = int_to_ptr.hbm [resolvable:$true] %s166_s24 }
  0x1b   : > { %p2197_p2 = pnand %p1800_p5, %p37_p7  ;;  %s156_s26 = scalar_lea.sflag [#allocation3], %s155_s8 }
  0x1c   : > { %s1941_s27 = sshra.s32 %s167_s24, 4  ;;  %s1948_s5 = scalar_lea.hbm %s4234_s0, 16  ;;  %s1942_s27 = int_to_ptr.hbm [resolvable:$true] %s1941_s27 }
  0x1d   : > { %s1943_s28 = scalar_lea.hbm %s1942_s27, 8  ;;  %p1945_p11 = pneg %p2197_p2 }
  0x1e   : > { %p1944_p10 = scmp.ne.s32.totalorder %s1942_s27, %s1943_s28  ;;  %p1949_p0 = scmp.lt.s32.totalorder %s1942_s27, %s4234_s0 }
  0x1f   : > { %p1950_p5 = scmp.lt.s32.totalorder %s1948_s5, %s1943_s28 }
  0x20   : > { %p1946_p12 = pnand %p1945_p11, %p1944_p10 }
  0x21   : > { %p1951_p7 = por %p1950_p5, %p1949_p0 }
  0x22   : > { %p1947_p13 = pneg %p1946_p12 }
  0x24   : > { %p1952_p9 = pnand %p1951_p7, %p1947_p13 }
  0x26   : > { %1955 = shalt.err (!%p1952_p9)
}
  0x27   : > { %1793 = dma.hbm_to_vmem [thread:$0]  (!%p2197_p2), %s167_s24, 128, %s169_s22, %s156_s26  }
  0x28   : > { %177 = sbr.rel (%p2161_p8) target bundleno = 504 (0x1f8), region = 32  ;;  %s2214_s8 = sand.u32 (!%p2161_p8), 1, %s2037_s13  }
  0x29   : > { %s1661_s11 = sshll.u32 (!%p2161_p8), %s2214_s8, 3  ;;  %s180_s17 = scalar_lea.sflag (!%p2161_p8), [#allocation3], %s2214_s8 }
  0x2a   : > { %s183_s20 = scalar_lea.vmem (!%p2161_p8), [#allocation2], %s1661_s11 }
  0x2d   : > { %2016 = dma.done.wait (%p2148_p4), %s180_s17, 128  }
  0x2e   : > { %2018 = vsyncadd (%p2148_p4), %s180_s17, 4294967168 }
  0x2f   : > { %2020 = dma.done.wait (%p42_p1), [#allocation5], 16  }
  0x30   : > { %2022 = vsyncadd (%p42_p1), [#allocation5], 4294967280 }
  0x31   : > { %2024 = dma.done.wait (%p42_p1), [#allocation8], 64  }
  0x32   : > { %2026 = vsyncadd (%p42_p1), [#allocation8], 4294967232 }
  0x33   : > { %199 = sfence }
  0x34   : > { %v2232_v0 = vld [vmem:[%s183_s20] sm:$0xff]  ;;  %vm4238_vm0 = vcmask 1043456   ;;  %vm261_vm1 = vcmask 1040384   ;;  %s2049_s18 = smov 50   ;;  %s2050_s23 = smov 51   ;;  %v407_v37 = vlaneseq  ;;  %v4264_v48 = vmov 0 }
  0x35   : > { %220 = vst [vmem:[#allocation1] ss:$2 sm:$0xff] %v2232_v0  ;;  %s2051_s21 = smov 49   ;;  %s2052_s22 = smov 48   ;;  %v2071_v51 = vmov 0   ;;  %v4266_v61 = vmov 0 }
  0x36   : > { %s2053_s24 = smov 47   ;;  %s2054_s25 = smov 46   ;;  %v2280_v39 = vand.u32 127, %v407_v37  ;;  %v2286_v40 = vld [vmem:[#allocation7] ss:$2 sm:$0x3] }
  0x37   : > { %s2055_s26 = smov 45   ;;  %s2056_s27 = smov 35   ;;  %v2288_v41 = vld [vmem:[#allocation7 + $0x1] ss:$2 sm:$0x3]  ;;  %vm267_vm3 = vcmp.ge.s32.totalorder %v2286_v40, 3 }
  0x38   : > { %s2057_s28 = smov 34   ;;  %s2058_s29 = smov 33   ;;  %vm460_vm2 = vcmp.lt.s32.totalorder %v2280_v39, 49  ;;  %vm268_vm4 = vcmp.lt.s32.totalorder %v2286_v40, 19  ;;  %vm294_vm5 = vcmp.ge.s32.totalorder %v2288_v41, 1  ;;  %vm295_vm6 = vcmp.lt.s32.totalorder %v2288_v41, 17 }
  0x39   : > { %s2059_s4 = smov 32   ;;  %s2060_s5 = smov 31   ;;  %vm291_vm7 = vcmp.ge.s32.totalorder %v2288_v41, 2  ;;  %vm292_vm8 = vcmp.lt.s32.totalorder %v2288_v41, 18  ;;  %vm2302_vm9 = vmand %vm267_vm3, %vm268_vm4  ;;  %vm288_vm10 = vcmp.ge.s32.totalorder %v2288_v41, 3  ;;  %vm289_vm11 = vcmp.lt.s32.totalorder %v2288_v41, 19 }
  0x3a   : > { %s2061_s9 = smov 30   ;;  %s2062_s10 = smov 29   ;;  %vm2310_vm12 = vmand %vm294_vm5, %vm295_vm6  ;;  %v2347_v50 = vshrl.u32 %v407_v37, 7  ;;  %vm297_vm3 = vcmp.ge.s32.totalorder %v2288_v41, 0  ;;  %vm298_vm4 = vcmp.lt.s32.totalorder %v2288_v41, 16  ;;  %v4283_v37 = vmov 0 }
  0x3b   : > { %s2063_s17 = smov 19   ;;  %s2064_s20 = smov 18   ;;  %vm2317_vm13 = vmand %vm291_vm7, %vm292_vm8 }
  0x3c   : > { %v221_v1 = vld.sshfl [vmem:[#allocation1] sm:$0xff pattern:$0x75316420]  ;;  %v222_v2 = vld.sshfl [vmem:[#allocation1 + $0x8] sm:$0xff pattern:$0x75316420]  ;;  %vm2325_vm14 = vmand %vm288_vm10, %vm289_vm11 }
  0x3d   : > { %v226_v3 = vsel %vm4238_vm0, %v221_v1, 0.0  ;;  %242 = vst [vmem:[#allocation1] ss:$2 sm:$0xff] %v2232_v0  ;;  %v233_v4 = vsel %vm4238_vm0, %v222_v2, 0.0  ;;  %v4265_v48 = vsel %vm2325_vm14, 4294967295, %v4264_v48  ;;  %vm466_vm15 = vmand %vm2302_vm9, %vm2310_vm12  ;;  %vm4239_vm5 = vcmp.eq.s32.totalorder %v2347_v50, 1 }
  0x3e   : > { %v227_v5 = vrot.slane %v226_v3, 4  ;;  %v234_v6 = vrot.slane %v233_v4, 4  ;;  %v2352_v52 = vsel %vm466_vm15, 1, %v2071_v51  ;;  %vm2364_vm6 = vmand %vm297_vm3, %vm298_vm4  ;;  %vm438_vm10 = vcmp.lt.s32.totalorder %v2280_v39, 50 }
  0x3f   : > { %v470_v59 = vperm.slane %v2352_v52, 0  ;;  %v4267_v61 = vsel %vm2364_vm6, 4294967295, %v4266_v61  ;;  %vm488_vm7 = vmand %vm2302_vm9, %vm2364_vm6  ;;  %vm416_vm11 = vcmp.lt.s32.totalorder %v2280_v39, 51  ;;  %vm300_vm4 = vcmp.ge.s32.totalorder %v2288_v41, 4294967295 }
  0x40   : > { %v228_v7 = vadd.f32 %v227_v5, %v226_v3  ;;  %v235_v8 = vadd.f32 %v234_v6, %v233_v4 }
  0x41   : > { %vm2384_vm8 = vcmp.eq.s32.totalorder %v470_v59, 1 }
  0x42   : > { %v229_v9 = vrot.slane %v228_v7, 2  ;;  %v236_v10 = vrot.slane %v235_v8, 2 }
  0x44   : > { %v230_v11 = vadd.f32 %v229_v9, %v228_v7  ;;  %v243_v12 = vld.sshfl [vmem:[#allocation1] sm:$0xff pattern:$0x75316420]  ;;  %v244_v13 = vld.sshfl [vmem:[#allocation1 + $0x8] sm:$0xff pattern:$0x75316420]  ;;  %v237_v20 = vadd.f32 %v236_v10, %v235_v8 }
  0x45   : > { %v247_v14 = vsel %vm4238_vm0, %v243_v12, -inf  ;;  %v254_v15 = vsel %vm4238_vm0, %v244_v13, -inf  ;;  %v471_v8 = vperm.slane %v2352_v52, 1  ;;  %vm301_vm0 = vcmp.lt.s32.totalorder %v2288_v41, 15 }
  0x46   : > { %v231_v16 = vrot.slane %v230_v11, 1  ;;  %v248_v17 = vrot.slane %v247_v14, 4  ;;  %v255_v18 = vrot.slane %v254_v15, 4  ;;  %v238_v26 = vrot.slane %v237_v20, 1 }
  0x47   : > { %v4290_v12 = vmov 0 }
  0x48   : > { %v249_v19 = vmax.f32 %v247_v14, %v248_v17  ;;  %v256_v21 = vmax.f32 %v254_v15, %v255_v18  ;;  %v232_v22 = vadd.f32 %v231_v16, %v230_v11  ;;  %v239_v31 = vadd.f32 %v238_v26, %v237_v20 }
  0x49   : > { %v491_v16 = vsel %vm488_vm7, 1, %v2071_v51  ;;  %vm304_vm7 = vcmp.lt.s32.totalorder %v2288_v41, 14 }
  0x4a   : > { %v250_v23 = vrot.slane %v249_v19, 2  ;;  %v257_v24 = vrot.slane %v256_v21, 2  ;;  %v240_v28 = vmul.f32 0.25, %v232_v22  ;;  %v241_v34 = vmul.f32 0.25, %v239_v31 }
  0x4c   : > { %v251_v25 = vmax.f32 %v249_v19, %v250_v23  ;;  %v258_v27 = vmax.f32 %v256_v21, %v257_v24 }
  0x4e   : > { %v252_v29 = vrot.slane %v251_v25, 1  ;;  %v259_v32 = vrot.slane %v258_v27, 1 }
  0x50   : > { %v253_v30 = vmax.f32 %v251_v25, %v252_v29  ;;  %v260_v35 = vmax.f32 %v258_v27, %v259_v32 }
  0x52   : > { %v2240_v33 = vsel %vm261_vm1, %v240_v28, %v253_v30  ;;  %v2245_v36 = vsel %vm261_vm1, %v241_v34, %v260_v35  ;;  %vm444_vm1 = vmand %vm2302_vm9, %vm2317_vm13  ;;  %v4278_v30 = vmov 0  ;;  %v492_v35 = vperm.slane %v491_v16, 0 }
  0x53   : > { %434 = vrot.lane.b32.xlu1 %v2240_v33, %s2049_s18  ;;  %410 = vrot.lane.b32.xlu0 %v2240_v33, %s2050_s23  ;;  %v447_v53 = vsel %vm444_vm1, 1, %v2071_v51 }
  0x54   : > { %456 = vrot.lane.b32.xlu2 %v2240_v33, %s2051_s21  ;;  %v448_v1 = vperm.slane %v447_v53, 0  ;;  %v449_v2 = vperm.slane %v447_v53, 1 }
  0x56   : > { %vm2394_vm15 = vcmp.eq.s32.totalorder %v448_v1, 1  ;;  %vm2398_vm1 = vcmp.eq.s32.totalorder %v449_v2, 1 }
  0x5b   : > { %436 = vrot.lane.b32.xlu1 %v2245_v36, %s2049_s18  ;;  %412 = vrot.lane.b32.xlu0 %v2245_v36, %s2050_s23  ;;  %s2065_s18 = smov 17   ;;  %s2066_s23 = smov 16  }
  0x5c   : > { %458 = vrot.lane.b32.xlu2 %v2245_v36, %s2051_s21  ;;  %s2067_s21 = smov 15  }
  0x63   : > { %480 = vrot.lane.b32.xlu1 %v2245_v36, %s2052_s22  ;;  %478 = vrot.lane.b32.xlu0 %v2240_v33, %s2052_s22  ;;  %s2068_s22 = smov 14  }
  0x64   : > { %500 = vrot.lane.b32.xlu2 %v2240_v33, %s2053_s24 }
  0x6b   : > { %522 = vrot.lane.b32.xlu1 %v2240_v33, %s2054_s25  ;;  %502 = vrot.lane.b32.xlu0 %v2245_v36, %s2053_s24  ;;  %s2069_s24 = smov 13  }
  0x6c   : > { %524 = vrot.lane.b32.xlu2 %v2245_v36, %s2054_s25  ;;  %s2306_s25 = sld [smem:[#allocation6 + $0x2]] }
  0x72   : > { %v464_v58 = vstv %s2306_s25  ;;  %s2075_s25 = smov 126  }
  0x73   : > { %546 = vrot.lane.b32.xlu1 %v2245_v36, %s2055_s26  ;;  %544 = vrot.lane.b32.xlu0 %v2240_v33, %s2055_s26  ;;  %s2314_s26 = sld [smem:[#allocation6 + $0x33]] }
  0x74   : > { %566 = vrot.lane.b32.xlu2 %v2240_v33, %s2056_s27 }
  0x79   : > { %v463_v57 = vstv %s2314_s26  ;;  %s2516_s26 = sld [smem:[#allocation6 + $0x6]] }
  0x7a   : > { %v465_v7 = vsel %vm4239_vm5, %v463_v57, %v464_v58 }
  0x7b   : > { %588 = vrot.lane.b32.xlu1 %v2240_v33, %s2057_s28  ;;  %568 = vrot.lane.b32.xlu0 %v2245_v36, %s2056_s27  ;;  %s2321_s27 = sld [smem:[#allocation6 + $0x1]] }
  0x7c   : > { %590 = vrot.lane.b32.xlu2 %v2245_v36, %s2057_s28  ;;  %s2323_s28 = sld [smem:[#allocation6 + $0x32]] }
  0x81   : > { %v442_v63 = vstv %s2321_s27  ;;  %s2520_s27 = sld [smem:[#allocation6 + $0x37]] }
  0x82   : > { %v441_v60 = vstv %s2323_s28  ;;  %s2076_s28 = smov 125  }
  0x83   : > { %612 = vrot.lane.b32.xlu1 %v2245_v36, %s2058_s29  ;;  %610 = vrot.lane.b32.xlu0 %v2240_v33, %s2058_s29  ;;  %s2335_s29 = sld [smem:[#allocation6]]  ;;  %v443_v10 = vsel %vm4239_vm5, %v441_v60, %v442_v63 }
  0x84   : > { %632 = vrot.lane.b32.xlu2 %v2240_v33, %s2059_s4 }
  0x89   : > { %v420_v5 = vstv %s2335_s29  ;;  %s2564_s29 = sld [smem:[#allocation6 + $0x7]] }
  0x8b   : > { %654 = vrot.lane.b32.xlu1 %v2240_v33, %s2060_s5  ;;  %634 = vrot.lane.b32.xlu0 %v2245_v36, %s2059_s4  ;;  %s2341_s4 = sld [smem:[#allocation6 + $0x31]] }
  0x8c   : > { %656 = vrot.lane.b32.xlu2 %v2245_v36, %s2060_s5  ;;  %s2070_s5 = smov 3  }
  0x91   : > { %v419_v4 = vstv %s2341_s4  ;;  %s2578_s4 = sld [smem:[#allocation6 + $0x38]] }
  0x92   : > { %v421_v13 = vsel %vm4239_vm5, %v419_v4, %v420_v5  ;;  %vm2438_vm5 = vmand %vm300_vm4, %vm301_vm0  ;;  %vm2489_vm4 = vcmp.eq.s32.totalorder %v492_v35, 1 }
  0x93   : > { %678 = vrot.lane.b32.xlu1 %v2245_v36, %s2061_s9  ;;  %676 = vrot.lane.b32.xlu0 %v2240_v33, %s2061_s9  ;;  %s2072_s9 = smov 2   ;;  %v4279_v30 = vsel %vm2438_vm5, 4294967295, %v4278_v30  ;;  %vm510_vm0 = vmand %vm2302_vm9, %vm2438_vm5 }
  0x94   : > { %698 = vrot.lane.b32.xlu2 %v2240_v33, %s2062_s10  ;;  %v513_v2 = vsel %vm510_vm0, 1, %v2071_v51  ;;  %vm504_vm0 = vcmp.lt.s32.totalorder %v2280_v39, 47 }
  0x95   : > { %v515_v14 = vperm.slane %v513_v2, 1 }
  0x9b   : > { %720 = vrot.lane.b32.xlu1 %v2240_v33, %s2063_s17  ;;  %700 = vrot.lane.b32.xlu0 %v2245_v36, %s2062_s10  ;;  %s2371_s10 = sld [smem:[#allocation6 + $0x3]] }
  0x9c   : > { %722 = vrot.lane.b32.xlu2 %v2245_v36, %s2063_s17  ;;  %s2375_s17 = sld [smem:[#allocation6 + $0x34]] }
  0xa1   : > { %v486_v34 = vstv %s2371_s10  ;;  %s2077_s10 = smov 115  }
  0xa2   : > { %v485_v32 = vstv %s2375_s17  ;;  %s2078_s17 = smov 114  }
  0xa3   : > { %744 = vrot.lane.b32.xlu1 %v2245_v36, %s2064_s20  ;;  %742 = vrot.lane.b32.xlu0 %v2240_v33, %s2064_s20  ;;  %s2073_s20 = smov 1  }
  0xa4   : > { %764 = vrot.lane.b32.xlu2 %v2240_v33, %s2065_s18 }
  0xab   : > { %786 = vrot.lane.b32.xlu1 %v2240_v33, %s2066_s23  ;;  %766 = vrot.lane.b32.xlu0 %v2245_v36, %s2065_s18  ;;  %s2418_s18 = sld [smem:[#allocation6 + $0x4]] }
  0xac   : > { %788 = vrot.lane.b32.xlu2 %v2245_v36, %s2066_s23  ;;  %s2430_s23 = sld [smem:[#allocation6 + $0x35]] }
  0xae   : > { %v457_v38 = vpop.permute.xlu2 %456 }
  0xb1   : > { %v508_v11 = vstv %s2418_s18  ;;  %s2637_s18 = sld [smem:[#allocation6 + $0x3a]] }
  0xb3   : > { %810 = vrot.lane.b32.xlu1 %v2245_v36, %s2067_s21  ;;  %808 = vrot.lane.b32.xlu0 %v2240_v33, %s2067_s21  ;;  %s2442_s21 = sld [smem:[#allocation6 + $0x5]] }
  0xb4   : > { %830 = vrot.lane.b32.xlu2 %v2240_v33, %s2068_s22 }
  0xb6   : > { %v459_v42 = vpop.permute.xlu2 %458 }
  0xb7   : > { %v2290_v43 = vsel %vm460_vm2, %v457_v38, %v459_v42  ;;  %v2292_v44 = vsel %vm460_vm2, %v459_v42, %v457_v38  ;;  %vm422_vm2 = vmand %vm2302_vm9, %vm2325_vm14 }
  0xb8   : > { %v425_v54 = vsel %vm422_vm2, 1, %v2071_v51  ;;  %v467_v17 = vmul.f32 %v465_v7, %v2292_v44  ;;  %v468_v18 = vmul.f32 %v465_v7, %v2290_v43 }
  0xb9   : > { %v426_v3 = vperm.slane %v425_v54, 0  ;;  %v427_v6 = vperm.slane %v425_v54, 1  ;;  %v493_v54 = vperm.slane %v491_v16, 1  ;;  %v530_v16 = vstv %s2442_s21  ;;  %s2678_s21 = sld [smem:[#allocation6 + $0xa]] }
  0xbb   : > { %852 = vrot.lane.b32.xlu1 %v2240_v33, %s2069_s24  ;;  %832 = vrot.lane.b32.xlu0 %v2245_v36, %s2068_s22  ;;  %vm2404_vm2 = vcmp.eq.s32.totalorder %v426_v3, 1  ;;  %vm2408_vm3 = vcmp.eq.s32.totalorder %v427_v6, 1  ;;  %s2458_s22 = sld [smem:[#allocation6 + $0x36]] }
  0xbc   : > { %854 = vrot.lane.b32.xlu2 %v2245_v36, %s2069_s24  ;;  %s2074_s24 = smov 127  }
  0xbe   : > { %v2329_v49 = vpop.permute.xlu2 %500 }
  0xc1   : > { %v529_v15 = vstv %s2458_s22  ;;  %s2682_s22 = sld [smem:[#allocation6 + $0x3b]] }
  0xc3   : > { %876 = vrot.lane.b32.xlu1 %v2245_v36, %s2070_s5  ;;  %874 = vrot.lane.b32.xlu0 %v2240_v33, %s2070_s5  ;;  %s2590_s5 = sld [smem:[#allocation6 + $0x8]] }
  0xc4   : > { %896 = vrot.lane.b32.xlu2 %v2240_v33, %s2072_s9 }
  0xc5   : > { %v435_v55 = vpop.permute.xlu1 %434  ;;  %v411_v56 = vpop.permute.xlu0 %410 }
  0xc6   : > { %v2368_v62 = vpop.permute.xlu2 %524 }
  0xcb   : > { %918 = vrot.lane.b32.xlu1 %v2240_v33, %s2073_s20  ;;  %898 = vrot.lane.b32.xlu0 %v2245_v36, %s2072_s9  ;;  %s2594_s9 = sld [smem:[#allocation6 + $0x39]] }
  0xcc   : > { %920 = vrot.lane.b32.xlu2 %v2245_v36, %s2073_s20  ;;  %s2633_s20 = sld [smem:[#allocation6 + $0x9]] }
  0xcd   : > { %v437_v19 = vpop.permute.xlu1 %436  ;;  %v413_v20 = vpop.permute.xlu0 %412 }
  0xce   : > { %v439_v21 = vsel %vm438_vm10, %v435_v55, %v437_v19  ;;  %v440_v22 = vsel %vm438_vm10, %v437_v19, %v435_v55  ;;  %v417_v23 = vsel %vm416_vm11, %v411_v56, %v413_v20  ;;  %v418_v24 = vsel %vm416_vm11, %v413_v20, %v411_v56  ;;  %v2432_v25 = vpop.permute.xlu2 %566 }
  0xcf   : > { %v445_v26 = vmul.f32 %v443_v10, %v440_v22  ;;  %v446_v27 = vmul.f32 %v443_v10, %v439_v21  ;;  %v423_v28 = vmul.f32 %v421_v13, %v418_v24  ;;  %v424_v29 = vmul.f32 %v421_v13, %v417_v23 }
  0xd0   : > { %vm2444_vm10 = vcmp.eq.s32.totalorder %v471_v8, 1  ;;  %vm4282_vm11 = vcmp.ge.s32.totalorder %v2288_v41, 4294967294  ;;  %v474_v55 = vsel %vm2384_vm8, %v467_v17, 0.0  ;;  %vm306_vm8 = vcmp.ge.s32.totalorder %v2288_v41, 4294967293 }
  0xd1   : > { %vm2454_vm6 = vmand %vm4282_vm11, %vm304_vm7  ;;  %v452_v38 = vsel %vm2394_vm15, %v445_v26, 0.0  ;;  %v453_v42 = vsel %vm2398_vm1, %v446_v27, 0.0  ;;  %v430_v43 = vsel %vm2404_vm2, %v423_v28, 0.0  ;;  %v431_v44 = vsel %vm2408_vm3, %v424_v29, 0.0 }
  0xd2   : > { %v4284_v37 = vsel %vm2454_vm6, 4294967295, %v4283_v37  ;;  %v454_v52 = vadd.f32 %v452_v38, %v430_v43  ;;  %v455_v53 = vadd.f32 %v453_v42, %v431_v44  ;;  %v475_v56 = vsel %vm2444_vm10, %v468_v18, 0.0  ;;  %vm532_vm2 = vmand %vm2302_vm9, %vm2454_vm6 }
  0xd3   : > { %957 = vrot.lane.b32.xlu1 %v2245_v36, %s2074_s24  ;;  %955 = vrot.lane.b32.xlu0 %v2240_v33, %s2074_s24  ;;  %vm482_vm15 = vcmp.lt.s32.totalorder %v2280_v39, 48  ;;  %vm4285_vm1 = vcmp.eq.s32.totalorder %v2347_v50, 1  ;;  %vm307_vm3 = vcmp.lt.s32.totalorder %v2288_v41, 13  ;;  %vm2499_vm7 = vcmp.eq.s32.totalorder %v493_v54, 1  ;;  %s2686_s24 = sld [smem:[#allocation6 + $0x3c]] }
  0xd4   : > { %v487_v57 = vsel %vm4285_vm1, %v485_v32, %v486_v34  ;;  %v476_v58 = vadd.f32 %v474_v55, %v454_v52  ;;  %v477_v59 = vadd.f32 %v475_v56, %v455_v53  ;;  %977 = vrot.lane.b32.xlu2 %v2240_v33, %s2075_s25  ;;  %v535_v6 = vsel %vm532_vm2, 1, %v2071_v51  ;;  %vm2512_vm10 = vmand %vm306_vm8, %vm307_vm3 }
  0xd5   : > { %v481_v60 = vpop.permute.xlu1 %480  ;;  %v479_v1 = vpop.permute.xlu0 %478  ;;  %v507_v10 = vstv %s2430_s23  ;;  %v4291_v12 = vsel %vm2512_vm10, 4294967295, %v4290_v12  ;;  %v514_v13 = vperm.slane %v513_v2, 0  ;;  %v536_v19 = vperm.slane %v535_v6, 0  ;;  %vm554_vm11 = vmand %vm2302_vm9, %vm2512_vm10  ;;  %s2079_s23 = smov 113  }
  0xd6   : > { %v483_v4 = vsel %vm482_vm15, %v479_v1, %v481_v60  ;;  %v484_v5 = vsel %vm482_vm15, %v481_v60, %v479_v1  ;;  %v2504_v7 = vpop.permute.xlu2 %590  ;;  %v537_v41 = vperm.slane %v535_v6, 1  ;;  %vm4292_vm15 = vmmov %vm4285_vm1  ;;  %v557_v32 = vsel %vm554_vm11, 1, %v2071_v51 }
  0xd7   : > { %v489_v8 = vmul.f32 %v487_v57, %v484_v5  ;;  %v490_v9 = vmul.f32 %v487_v57, %v483_v4  ;;  %v509_v22 = vsel %vm4292_vm15, %v507_v10, %v508_v11  ;;  %vm2537_vm2 = vcmp.eq.s32.totalorder %v514_v13, 1  ;;  %vm4295_vm8 = vmmov %vm4285_vm1 }
  0xd8   : > { %v531_v24 = vsel %vm4295_vm8, %v529_v15, %v530_v16  ;;  %vm2550_vm15 = vcmp.eq.s32.totalorder %v536_v19, 1  ;;  %vm2554_vm1 = vcmp.eq.s32.totalorder %v537_v41, 1  ;;  %vm4302_vm8 = vcmp.lt.s32.totalorder %v2280_v39, 46 }
  0xd9   : > { %v496_v17 = vsel %vm2489_vm4, %v489_v8, 0.0  ;;  %v497_v18 = vsel %vm2499_vm7, %v490_v9, 0.0  ;;  %vm271_vm4 = vcmp.lt.s32.totalorder %v2286_v40, 18  ;;  %vm2546_vm7 = vcmp.eq.s32.totalorder %v515_v14, 1  ;;  %vm4303_vm3 = vmmov %vm4302_vm8 }
  0xda   : > { %v498_v20 = vadd.f32 %v496_v17, %v476_v58  ;;  %v499_v21 = vadd.f32 %v497_v18, %v477_v59  ;;  %vm4304_vm9 = vcmp.ge.s32.totalorder %v2286_v40, 2  ;;  %v551_v54 = vstv %s2520_s27  ;;  %s2081_s27 = smov 111  }
  0xdb   : > { %999 = vrot.lane.b32.xlu1 %v2240_v33, %s2076_s28  ;;  %979 = vrot.lane.b32.xlu0 %v2245_v36, %s2075_s25  ;;  %vm2586_vm11 = vmand %vm4304_vm9, %vm271_vm4  ;;  %v558_v55 = vperm.slane %v557_v32, 0  ;;  %v559_v1 = vperm.slane %v557_v32, 1  ;;  %v573_v18 = vstv %s2578_s4  ;;  %v574_v19 = vstv %s2564_s29  ;;  %s2700_s25 = sld [smem:[#allocation6 + $0xb]]  ;;  %s2082_s4 = smov 110  }
  0xdc   : > { %1001 = vrot.lane.b32.xlu2 %v2245_v36, %s2076_s28  ;;  %vm592_vm9 = vcmp.lt.s32.totalorder %v2280_v39, 34  ;;  %s2732_s28 = sld [smem:[#allocation6 + $0xc]] }
  0xdd   : > { %v523_v26 = vpop.permute.xlu1 %522  ;;  %v503_v28 = vpop.permute.xlu0 %502  ;;  %vm2619_vm4 = vcmp.eq.s32.totalorder %v558_v55, 1  ;;  %s2735_s29 = sld [smem:[#allocation6 + $0x3d]] }
  0xde   : > { %v505_v34 = vsel %vm504_vm0, %v2329_v49, %v503_v28  ;;  %v506_v35 = vsel %vm504_vm0, %v503_v28, %v2329_v49  ;;  %v527_v38 = vsel %vm4302_vm8, %v523_v26, %v2368_v62  ;;  %v528_v45 = vsel %vm4303_vm3, %v2368_v62, %v523_v26  ;;  %v2580_v42 = vpop.permute.xlu2 %632  ;;  %vm576_vm0 = vmand %vm2586_vm11, %vm2325_vm14 }
  0xdf   : > { %v511_v43 = vmul.f32 %v509_v22, %v506_v35  ;;  %v512_v44 = vmul.f32 %v509_v22, %v505_v34  ;;  %v533_v52 = vmul.f32 %v531_v24, %v528_v45  ;;  %v534_v53 = vmul.f32 %v531_v24, %v527_v38 }
  0xe0   : > { %v552_v62 = vstv %s2516_s26  ;;  %vm4307_vm3 = vcmp.eq.s32.totalorder %v2347_v50, 1  ;;  %v579_v9 = vsel %vm576_vm0, 1, %v2071_v51  ;;  %v596_v22 = vstv %s2590_s5  ;;  %s2080_s26 = smov 112   ;;  %s2773_s5 = sld [smem:[#allocation6 + $0xd]] }
  0xe1   : > { %v518_v56 = vsel %vm2537_vm2, %v511_v43, 0.0  ;;  %v519_v57 = vsel %vm2546_vm7, %v512_v44, 0.0  ;;  %v540_v58 = vsel %vm2550_vm15, %v533_v52, 0.0  ;;  %v541_v59 = vsel %vm2554_vm1, %v534_v53, 0.0  ;;  %vm598_vm1 = vmand %vm2586_vm11, %vm2317_vm13 }
  0xe2   : > { %v520_v60 = vadd.f32 %v518_v56, %v498_v20  ;;  %v521_v63 = vadd.f32 %v519_v57, %v499_v21  ;;  %vm548_vm2 = vcmp.lt.s32.totalorder %v2280_v39, 45  ;;  %v553_v4 = vsel %vm4307_vm3, %v551_v54, %v552_v62  ;;  %vm620_vm15 = vmand %vm2586_vm11, %vm2310_vm12 }
  0xe3   : > { %1023 = vrot.lane.b32.xlu1 %v2245_v36, %s2077_s10  ;;  %1021 = vrot.lane.b32.xlu0 %v2240_v33, %s2077_s10  ;;  %vm2624_vm7 = vcmp.eq.s32.totalorder %v559_v1, 1  ;;  %v601_v14 = vsel %vm598_vm1, 1, %v2071_v51  ;;  %v580_v41 = vperm.slane %v579_v9, 0  ;;  %v581_v20 = vperm.slane %v579_v9, 1  ;;  %vm4312_vm0 = vmmov %vm4307_vm3  ;;  %s2793_s10 = sld [smem:[#allocation6 + $0xe]] }
  0xe4   : > { %v542_v2 = vadd.f32 %v540_v58, %v520_v60  ;;  %v543_v3 = vadd.f32 %v541_v59, %v521_v63  ;;  %1043 = vrot.lane.b32.xlu2 %v2240_v33, %s2078_s17  ;;  %v595_v21 = vstv %s2594_s9  ;;  %v602_v26 = vperm.slane %v601_v14, 0  ;;  %vm4315_vm1 = vmmov %vm4312_vm0  ;;  %s2789_s9 = sld [smem:[#allocation6 + $0x3e]] }
  0xe5   : > { %v547_v5 = vpop.permute.xlu1 %546  ;;  %v545_v8 = vpop.permute.xlu0 %544  ;;  %v603_v27 = vperm.slane %v601_v14, 1  ;;  %vm570_vm8 = vcmp.lt.s32.totalorder %v2280_v39, 35  ;;  %v575_v31 = vsel %vm4312_vm0, %v573_v18, %v574_v19  ;;  %v597_v34 = vsel %vm4315_vm1, %v595_v21, %v596_v22 }
  0xe6   : > { %v549_v11 = vsel %vm548_vm2, %v545_v8, %v547_v5  ;;  %v550_v13 = vsel %vm548_vm2, %v547_v5, %v545_v8  ;;  %v2629_v15 = vpop.permute.xlu2 %656  ;;  %vm2654_vm2 = vcmp.eq.s32.totalorder %v580_v41, 1  ;;  %vm2661_vm3 = vcmp.eq.s32.totalorder %v581_v20, 1 }
  0xe7   : > { %v555_v16 = vmul.f32 %v553_v4, %v550_v13  ;;  %v556_v17 = vmul.f32 %v553_v4, %v549_v11  ;;  %v623_v52 = vsel %vm620_vm15, 1, %v2071_v51  ;;  %v617_v63 = vstv %s2637_s18  ;;  %s2084_s18 = smov 99  }
  0xe8   : > { %v618_v1 = vstv %s2633_s20  ;;  %vm4322_vm15 = vnez %v4267_v61  ;;  %v624_v6 = vperm.slane %v623_v52, 0  ;;  %v625_v8 = vperm.slane %v623_v52, 1  ;;  %s2083_s20 = smov 109  }
  0xe9   : > { %v562_v23 = vsel %vm2619_vm4, %v555_v16, 0.0  ;;  %v563_v24 = vsel %vm2624_vm7, %v556_v17, 0.0  ;;  %vm2665_vm4 = vcmp.eq.s32.totalorder %v602_v26, 1  ;;  %vm2669_vm7 = vcmp.eq.s32.totalorder %v603_v27, 1 }
  0xea   : > { %v564_v28 = vadd.f32 %v562_v23, %v542_v2  ;;  %v565_v29 = vadd.f32 %v563_v24, %v543_v3  ;;  %vm614_vm0 = vcmp.lt.s32.totalorder %v2280_v39, 33  ;;  %v639_v24 = vstv %s2682_s22  ;;  %s2085_s22 = smov 98  }
  0xeb   : > { %1065 = vrot.lane.b32.xlu1 %v2240_v33, %s2079_s23  ;;  %1045 = vrot.lane.b32.xlu0 %v2245_v36, %s2078_s17  ;;  %v640_v26 = vstv %s2678_s21  ;;  %s2805_s17 = sld [smem:[#allocation6 + $0x3f]] }
  0xec   : > { %1067 = vrot.lane.b32.xlu2 %v2245_v36, %s2079_s23  ;;  %s2844_s23 = sld [smem:[#allocation6 + $0xf]] }
  0xed   : > { %v589_v35 = vpop.permute.xlu1 %588  ;;  %v569_v45 = vpop.permute.xlu0 %568  ;;  %s2848_s21 = sld [smem:[#allocation6 + $0x40]] }
  0xee   : > { %v571_v53 = vsel %vm570_vm8, %v2432_v25, %v569_v45  ;;  %v572_v54 = vsel %vm570_vm8, %v569_v45, %v2432_v25  ;;  %v593_v62 = vsel %vm592_vm9, %v589_v35, %v2504_v7  ;;  %v594_v55 = vsel %vm592_vm9, %v2504_v7, %v589_v35  ;;  %v2680_v56 = vpop.permute.xlu2 %698  ;;  %vm642_vm8 = vmand %vm2586_vm11, %vm4322_vm15 }
  0xef   : > { %v577_v57 = vmul.f32 %v575_v31, %v572_v54  ;;  %v578_v58 = vmul.f32 %v575_v31, %v571_v53  ;;  %v599_v59 = vmul.f32 %v597_v34, %v594_v55  ;;  %v600_v60 = vmul.f32 %v597_v34, %v593_v62  ;;  %vm664_vm9 = vmand %vm2586_vm11, %vm2438_vm5 }
  0xf0   : > { %v645_v16 = vsel %vm642_vm8, 1, %v2071_v51  ;;  %v667_v17 = vsel %vm664_vm9, 1, %v2071_v51  ;;  %v662_v35 = vstv %s2700_s25  ;;  %vm274_vm9 = vcmp.lt.s32.totalorder %v2286_v40, 17  ;;  %s2891_s25 = sld [smem:[#allocation6 + $0x41]] }
  0xf1   : > { %v584_v25 = vsel %vm2654_vm2, %v577_v57, 0.0  ;;  %v585_v7 = vsel %vm2661_vm3, %v578_v58, 0.0  ;;  %v606_v2 = vsel %vm2665_vm4, %v599_v59, 0.0  ;;  %v607_v3 = vsel %vm2669_vm7, %v600_v60, 0.0  ;;  %vm4323_vm2 = vmmov %vm4315_vm1 }
  0xf2   : > { %v586_v4 = vadd.f32 %v584_v25, %v564_v28  ;;  %v587_v5 = vadd.f32 %v585_v7, %v565_v29  ;;  %v619_v11 = vsel %vm4323_vm2, %v617_v63, %v618_v1  ;;  %vm2720_vm1 = vcmp.eq.s32.totalorder %v624_v6, 1  ;;  %vm686_vm4 = vmand %vm2586_vm11, %vm2454_vm6 }
  0xf3   : > { %1089 = vrot.lane.b32.xlu1 %v2245_v36, %s2080_s26  ;;  %1087 = vrot.lane.b32.xlu0 %v2240_v33, %s2080_s26  ;;  %vm2724_vm3 = vcmp.eq.s32.totalorder %v625_v8, 1  ;;  %v646_v27 = vperm.slane %v645_v16, 0  ;;  %v647_v28 = vperm.slane %v645_v16, 1  ;;  %v661_v29 = vstv %s2686_s24  ;;  %vm4328_vm8 = vmmov %vm4323_vm2  ;;  %s2885_s24 = sld [smem:[#allocation6 + $0x10]] }
  0xf4   : > { %v608_v9 = vadd.f32 %v606_v2, %v586_v4  ;;  %v609_v10 = vadd.f32 %v607_v3, %v587_v5  ;;  %1109 = vrot.lane.b32.xlu2 %v2240_v33, %s2081_s27  ;;  %v668_v31 = vperm.slane %v667_v17, 0  ;;  %v669_v38 = vperm.slane %v667_v17, 1  ;;  %s2895_s26 = sld [smem:[#allocation6 + $0x11]] }
  0xf5   : > { %v613_v13 = vpop.permute.xlu1 %612  ;;  %v611_v14 = vpop.permute.xlu0 %610  ;;  %vm636_vm7 = vcmp.lt.s32.totalorder %v2280_v39, 32  ;;  %v641_v44 = vsel %vm4328_vm8, %v639_v24, %v640_v26  ;;  %vm2757_vm2 = vcmp.eq.s32.totalorder %v647_v28, 1  ;;  %v689_v59 = vsel %vm686_vm4, 1, %v2071_v51 }
  0xf6   : > { %v615_v41 = vsel %vm614_vm0, %v611_v14, %v613_v13  ;;  %v616_v20 = vsel %vm614_vm0, %v613_v13, %v611_v14  ;;  %v2728_v21 = vpop.permute.xlu2 %722  ;;  %vm2753_vm0 = vcmp.eq.s32.totalorder %v646_v27, 1  ;;  %vm4338_vm6 = vcmp.lt.s32.totalorder %v2280_v39, 31 }
  0xf7   : > { %v621_v22 = vmul.f32 %v619_v11, %v616_v20  ;;  %v622_v23 = vmul.f32 %v619_v11, %v615_v41  ;;  %vm4339_vm4 = vmmov %vm4338_vm6  ;;  %v683_v6 = vstv %s2735_s29  ;;  %v690_v8 = vperm.slane %v689_v59, 0  ;;  %s2087_s29 = smov 96  }
  0xf8   : > { %v691_v17 = vperm.slane %v689_v59, 1 }
  0xf9   : > { %v628_v32 = vsel %vm2720_vm1, %v621_v22, 0.0  ;;  %v629_v34 = vsel %vm2724_vm3, %v622_v23, 0.0  ;;  %vm4333_vm1 = vmmov %vm4328_vm8  ;;  %vm2763_vm3 = vcmp.eq.s32.totalorder %v668_v31, 1  ;;  %vm2768_vm8 = vcmp.eq.s32.totalorder %v669_v38, 1 }
  0xfa   : > { %v630_v45 = vadd.f32 %v628_v32, %v608_v9  ;;  %v631_v43 = vadd.f32 %v629_v34, %v609_v10  ;;  %v663_v54 = vsel %vm4333_vm1, %v661_v29, %v662_v35  ;;  %vm273_vm1 = vcmp.ge.s32.totalorder %v2286_v40, 1 }
  0xfb   : > { %1131 = vrot.lane.b32.xlu1 %v2240_v33, %s2082_s4  ;;  %1111 = vrot.lane.b32.xlu0 %v2245_v36, %s2081_s27  ;;  %v705_v34 = vstv %s2789_s9  ;;  %v706_v35 = vstv %s2773_s5  ;;  %s2899_s27 = sld [smem:[#allocation6 + $0x42]]  ;;  %s2088_s9 = smov 95  }
  0xfc   : > { %1133 = vrot.lane.b32.xlu2 %v2245_v36, %s2082_s4  ;;  %s2938_s4 = sld [smem:[#allocation6 + $0x12]] }
  0xfd   : > { %v655_v55 = vpop.permute.xlu1 %654  ;;  %v635_v57 = vpop.permute.xlu0 %634  ;;  %s2942_s5 = sld [smem:[#allocation6 + $0x43]] }
  0xfe   : > { %v637_v60 = vsel %vm636_vm7, %v2580_v42, %v635_v57  ;;  %v638_v63 = vsel %vm636_vm7, %v635_v57, %v2580_v42  ;;  %v659_v1 = vsel %vm4338_vm6, %v655_v55, %v2629_v15  ;;  %v660_v25 = vsel %vm4339_vm4, %v2629_v15, %v655_v55  ;;  %v2791_v7 = vpop.permute.xlu2 %764  ;;  %vm2801_vm6 = vmand %vm273_vm1, %vm274_vm9 }
  0xff   : > { %v643_v2 = vmul.f32 %v641_v44, %v638_v63  ;;  %v644_v3 = vmul.f32 %v641_v44, %v637_v60  ;;  %v665_v4 = vmul.f32 %v663_v54, %v660_v25  ;;  %v666_v5 = vmul.f32 %v663_v54, %v659_v1  ;;  %vm708_vm7 = vmand %vm2586_vm11, %vm2512_vm10 }
 0x100   : > { %v684_v42 = vstv %s2732_s28  ;;  %vm680_vm9 = vcmp.lt.s32.totalorder %v2280_v39, 30  ;;  %vm2830_vm11 = vcmp.eq.s32.totalorder %v690_v8, 1  ;;  %v711_v23 = vsel %vm708_vm7, 1, %v2071_v51  ;;  %s2086_s28 = smov 97  }
 0x101   : > { %v650_v15 = vsel %vm2753_vm0, %v643_v2, 0.0  ;;  %v651_v10 = vsel %vm2757_vm2, %v644_v3, 0.0  ;;  %v672_v11 = vsel %vm2763_vm3, %v665_v4, 0.0  ;;  %v673_v13 = vsel %vm2768_vm8, %v666_v5, 0.0  ;;  %vm730_vm0 = vmand %vm2801_vm6, %vm2325_vm14 }
 0x102   : > { %v652_v14 = vadd.f32 %v650_v15, %v630_v45  ;;  %v653_v16 = vadd.f32 %v651_v10, %v631_v43  ;;  %vm4342_vm2 = vcmp.eq.s32.totalorder %v2347_v50, 1  ;;  %vm2835_vm3 = vcmp.eq.s32.totalorder %v691_v17, 1  ;;  %vm752_vm8 = vmand %vm2801_vm6, %vm2317_vm13 }
 0x103   : > { %1155 = vrot.lane.b32.xlu1 %v2245_v36, %s2083_s20  ;;  %1153 = vrot.lane.b32.xlu0 %v2240_v33, %s2083_s20  ;;  %v685_v49 = vsel %vm4342_vm2, %v683_v6, %v684_v42  ;;  %v733_v28 = vsel %vm730_vm0, 1, %v2071_v51  ;;  %v712_v38 = vperm.slane %v711_v23, 0  ;;  %v713_v45 = vperm.slane %v711_v23, 1  ;;  %vm4347_vm7 = vmmov %vm4342_vm2  ;;  %s2989_s20 = sld [smem:[#allocation6 + $0x14]] }
 0x104   : > { %v674_v18 = vadd.f32 %v672_v11, %v652_v14  ;;  %v675_v19 = vadd.f32 %v673_v13, %v653_v16  ;;  %1175 = vrot.lane.b32.xlu2 %v2240_v33, %s2084_s18  ;;  %v727_v43 = vstv %s2805_s17  ;;  %v728_v44 = vstv %s2793_s10  ;;  %vm4350_vm0 = vmmov %vm4342_vm2  ;;  %s2979_s10 = sld [smem:[#allocation6 + $0x13]] }
 0x105   : > { %v679_v41 = vpop.permute.xlu1 %678  ;;  %v677_v22 = vpop.permute.xlu0 %676  ;;  %v734_v54 = vperm.slane %v733_v28, 0  ;;  %v735_v62 = vperm.slane %v733_v28, 1  ;;  %vm702_vm1 = vcmp.lt.s32.totalorder %v2280_v39, 29  ;;  %vm724_vm4 = vcmp.lt.s32.totalorder %v2280_v39, 19  ;;  %s2985_s17 = sld [smem:[#allocation6 + $0x44]] }
 0x106   : > { %v681_v26 = vsel %vm680_vm9, %v677_v22, %v679_v41  ;;  %v682_v27 = vsel %vm680_vm9, %v679_v41, %v677_v22  ;;  %v2840_v29 = vpop.permute.xlu2 %788  ;;  %v707_v58 = vsel %vm4347_vm7, %v705_v34, %v706_v35  ;;  %vm2865_vm9 = vcmp.eq.s32.totalorder %v712_v38, 1  ;;  %vm4357_vm7 = vmmov %vm4350_vm0 }
 0x107   : > { %v687_v31 = vmul.f32 %v685_v49, %v682_v27  ;;  %v688_v32 = vmul.f32 %v685_v49, %v681_v26  ;;  %v729_v60 = vsel %vm4350_vm0, %v727_v43, %v728_v44  ;;  %vm2872_vm2 = vcmp.eq.s32.totalorder %v713_v45, 1 }
 0x108   : > { %v755_v4 = vsel %vm752_vm8, 1, %v2071_v51  ;;  %v749_v16 = vstv %s2848_s21  ;;  %v750_v17 = vstv %s2844_s23  ;;  %vm774_vm8 = vmand %vm2801_vm6, %vm2310_vm12  ;;  %s2089_s23 = smov 94   ;;  %s2090_s21 = smov 93  }
 0x109   : > { %v694_v52 = vsel %vm2830_vm11, %v687_v31, 0.0  ;;  %v695_v53 = vsel %vm2835_vm3, %v688_v32, 0.0  ;;  %vm2876_vm11 = vcmp.eq.s32.totalorder %v734_v54, 1  ;;  %vm2880_vm3 = vcmp.eq.s32.totalorder %v735_v62, 1 }
 0x10a   : > { %v696_v55 = vadd.f32 %v694_v52, %v674_v18  ;;  %v697_v57 = vadd.f32 %v695_v53, %v675_v19  ;;  %v756_v18 = vperm.slane %v755_v4, 0  ;;  %v757_v22 = vperm.slane %v755_v4, 1 }
 0x10b   : > { %1197 = vrot.lane.b32.xlu1 %v2240_v33, %s2085_s22  ;;  %1177 = vrot.lane.b32.xlu0 %v2245_v36, %s2084_s18  ;;  %v751_v26 = vsel %vm4357_vm7, %v749_v16, %v750_v17  ;;  %v777_v32 = vsel %vm774_vm8, 1, %v2071_v51  ;;  %v771_v53 = vstv %s2891_s25  ;;  %v772_v54 = vstv %s2885_s24  ;;  %vm4362_vm8 = vmmov %vm4357_vm7  ;;  %s2993_s18 = sld [smem:[#allocation6 + $0x45]]  ;;  %s2091_s25 = smov 83  }
 0x10c   : > { %1199 = vrot.lane.b32.xlu2 %v2245_v36, %s2085_s22  ;;  %vm2929_vm0 = vcmp.eq.s32.totalorder %v757_v22, 1  ;;  %v778_v62 = vperm.slane %v777_v32, 0  ;;  %v773_v3 = vsel %vm4362_vm8, %v771_v53, %v772_v54  ;;  %v816_v22 = vstv %s2938_s4  ;;  %s3047_s22 = sld [smem:[#allocation6 + $0x15]] }
 0x10d   : > { %v721_v63 = vpop.permute.xlu1 %720  ;;  %v701_v25 = vpop.permute.xlu0 %700  ;;  %s3051_s24 = sld [smem:[#allocation6 + $0x46]] }
 0x10e   : > { %v703_v5 = vsel %vm702_vm1, %v2680_v56, %v701_v25  ;;  %v704_v6 = vsel %vm702_vm1, %v701_v25, %v2680_v56  ;;  %v725_v42 = vsel %vm724_vm4, %v721_v63, %v2728_v21  ;;  %v726_v8 = vsel %vm724_vm4, %v2728_v21, %v721_v63  ;;  %v2893_v15 = vpop.permute.xlu2 %830  ;;  %vm796_vm4 = vmand %vm2801_vm6, %vm4322_vm15  ;;  %s3115_s4 = sld [smem:[#allocation6 + $0x49]] }
 0x10f   : > { %v709_v10 = vmul.f32 %v707_v58, %v704_v6  ;;  %v710_v11 = vmul.f32 %v707_v58, %v703_v5  ;;  %v731_v13 = vmul.f32 %v729_v60, %v726_v8  ;;  %v732_v14 = vmul.f32 %v729_v60, %v725_v42 }
 0x110   : > { %vm746_vm1 = vcmp.lt.s32.totalorder %v2280_v39, 18  ;;  %v799_v45 = vsel %vm796_vm4, 1, %v2071_v51  ;;  %v794_v58 = vstv %s2895_s26  ;;  %vm4365_vm4 = vmmov %vm4357_vm7  ;;  %s3066_s26 = sld [smem:[#allocation6 + $0x16]] }
 0x111   : > { %v716_v56 = vsel %vm2865_vm9, %v709_v10, 0.0  ;;  %v717_v21 = vsel %vm2872_vm2, %v710_v11, 0.0  ;;  %v738_v19 = vsel %vm2876_vm11, %v731_v13, 0.0  ;;  %v739_v49 = vsel %vm2880_vm3, %v732_v14, 0.0  ;;  %vm818_vm2 = vmand %vm2801_vm6, %vm2438_vm5 }
 0x112   : > { %v718_v41 = vadd.f32 %v716_v56, %v696_v55  ;;  %v719_v20 = vadd.f32 %v717_v21, %v697_v57  ;;  %vm2924_vm9 = vcmp.eq.s32.totalorder %v756_v18, 1  ;;  %v779_v55 = vperm.slane %v777_v32, 1  ;;  %vm4373_vm8 = vmmov %vm4365_vm4 }
 0x113   : > { %1221 = vrot.lane.b32.xlu1 %v2245_v36, %s2086_s28  ;;  %1219 = vrot.lane.b32.xlu0 %v2240_v33, %s2086_s28  ;;  %v793_v57 = vstv %s2899_s27  ;;  %v800_v63 = vperm.slane %v799_v45, 0  ;;  %v801_v1 = vperm.slane %v799_v45, 1  ;;  %vm768_vm11 = vcmp.lt.s32.totalorder %v2280_v39, 17  ;;  %s3076_s27 = sld [smem:[#allocation6 + $0x47]] }
 0x114   : > { %v740_v23 = vadd.f32 %v738_v19, %v718_v41  ;;  %v741_v24 = vadd.f32 %v739_v49, %v719_v20  ;;  %1241 = vrot.lane.b32.xlu2 %v2240_v33, %s2087_s29  ;;  %vm790_vm3 = vcmp.lt.s32.totalorder %v2280_v39, 16  ;;  %v795_v5 = vsel %vm4365_vm4, %v793_v57, %v794_v58  ;;  %s3097_s28 = sld [smem:[#allocation6 + $0x17]] }
 0x115   : > { %v745_v27 = vpop.permute.xlu1 %744  ;;  %v743_v31 = vpop.permute.xlu0 %742  ;;  %vm2966_vm7 = vcmp.eq.s32.totalorder %v779_v55, 1  ;;  %v821_v13 = vsel %vm818_vm2, 1, %v2071_v51  ;;  %v815_v20 = vstv %s2942_s5  ;;  %vm4372_vm2 = vnez %v4284_v37  ;;  %s3123_s5 = sld [smem:[#allocation6 + $0x48]] }
 0x116   : > { %v747_v35 = vsel %vm746_vm1, %v743_v31, %v745_v27  ;;  %v748_v38 = vsel %vm746_vm1, %v745_v27, %v743_v31  ;;  %v2934_v43 = vpop.permute.xlu2 %854  ;;  %vm2959_vm1 = vcmp.eq.s32.totalorder %v778_v62, 1  ;;  %v823_v31 = vperm.slane %v821_v13, 1 }
 0x117   : > { %v753_v44 = vmul.f32 %v751_v26, %v748_v38  ;;  %v754_v52 = vmul.f32 %v751_v26, %v747_v35  ;;  %v817_v32 = vsel %vm4373_vm8, %v815_v20, %v816_v22  ;;  %vm276_vm4 = vcmp.ge.s32.totalorder %v2286_v40, 0 }
 0x118   : > { %vm856_vm8 = vcmp.lt.s32.totalorder %v2280_v39, 13 }
 0x119   : > { %v760_v59 = vsel %vm2924_vm9, %v753_v44, 0.0  ;;  %v761_v60 = vsel %vm2929_vm0, %v754_v52, 0.0  ;;  %vm2970_vm9 = vcmp.eq.s32.totalorder %v800_v63, 1  ;;  %vm2974_vm0 = vcmp.eq.s32.totalorder %v801_v1, 1 }
 0x11a   : > { %v762_v25 = vadd.f32 %v760_v59, %v740_v23  ;;  %v763_v2 = vadd.f32 %v761_v60, %v741_v24  ;;  %v822_v23 = vperm.slane %v821_v13, 0  ;;  %v837_v60 = vstv %s2985_s17  ;;  %s2093_s17 = smov 81  }
 0x11b   : > { %1263 = vrot.lane.b32.xlu1 %v2240_v33, %s2088_s9  ;;  %1243 = vrot.lane.b32.xlu0 %v2245_v36, %s2087_s29  ;;  %v838_v63 = vstv %s2979_s10  ;;  %s3111_s29 = sld [smem:[#allocation6 + $0x18]]  ;;  %v926_v11 = vstv %s3097_s28 }
 0x11c   : > { %1265 = vrot.lane.b32.xlu2 %v2245_v36, %s2088_s9  ;;  %s2092_s9 = smov 82   ;;  %s3147_s10 = sld [smem:[#allocation6 + $0x19]] }
 0x11d   : > { %v787_v6 = vpop.permute.xlu1 %786  ;;  %v767_v8 = vpop.permute.xlu0 %766  ;;  %s3322_s28 = sld [smem:[#allocation6 + $0x4d]] }
 0x11e   : > { %v769_v14 = vsel %vm768_vm11, %v2791_v7, %v767_v8  ;;  %v770_v16 = vsel %vm768_vm11, %v767_v8, %v2791_v7  ;;  %v791_v17 = vsel %vm790_vm3, %v787_v6, %v2840_v29  ;;  %v792_v18 = vsel %vm790_vm3, %v2840_v29, %v787_v6  ;;  %v2987_v56 = vpop.permute.xlu2 %896  ;;  %vm840_vm11 = vmand %vm2801_vm6, %vm4372_vm2 }
 0x11f   : > { %v775_v21 = vmul.f32 %v773_v3, %v770_v16  ;;  %v776_v19 = vmul.f32 %v773_v3, %v769_v14  ;;  %v797_v49 = vmul.f32 %v795_v5, %v792_v18  ;;  %v798_v41 = vmul.f32 %v795_v5, %v791_v17 }
 0x120   : > { %vm812_vm3 = vcmp.lt.s32.totalorder %v2280_v39, 15  ;;  %v843_v52 = vsel %vm840_vm11, 1, %v2071_v51  ;;  %v860_v3 = vstv %s2989_s20  ;;  %s3163_s20 = sld [smem:[#allocation6 + $0x4a]] }
 0x121   : > { %v782_v7 = vsel %vm2959_vm1, %v775_v21, 0.0  ;;  %v783_v29 = vsel %vm2966_vm7, %v776_v19, 0.0  ;;  %v804_v24 = vsel %vm2970_vm9, %v797_v49, 0.0  ;;  %v805_v26 = vsel %vm2974_vm0, %v798_v41, 0.0  ;;  %vm862_vm1 = vmand %vm2801_vm6, %vm2512_vm10 }
 0x122   : > { %v784_v27 = vadd.f32 %v782_v7, %v762_v25  ;;  %v785_v28 = vadd.f32 %v783_v29, %v763_v2  ;;  %vm277_vm7 = vcmp.lt.s32.totalorder %v2286_v40, 16  ;;  %vm3020_vm9 = vcmp.eq.s32.totalorder %v822_v23, 1 }
 0x123   : > { %1287 = vrot.lane.b32.xlu1 %v2245_v36, %s2089_s23  ;;  %1285 = vrot.lane.b32.xlu0 %v2240_v33, %s2089_s23  ;;  %vm3030_vm0 = vcmp.eq.s32.totalorder %v823_v31, 1  ;;  %v865_v55 = vsel %vm862_vm1, 1, %v2071_v51  ;;  %vm3043_vm6 = vmand %vm276_vm4, %vm277_vm7  ;;  %v844_v1 = vperm.slane %v843_v52, 0  ;;  %v845_v25 = vperm.slane %v843_v52, 1  ;;  %s3225_s23 = sld [smem:[#allocation6 + $0x4b]] }
 0x124   : > { %v806_v34 = vadd.f32 %v804_v24, %v784_v27  ;;  %v807_v35 = vadd.f32 %v805_v26, %v785_v28  ;;  %1307 = vrot.lane.b32.xlu2 %v2240_v33, %s2090_s21  ;;  %v859_v2 = vstv %s2993_s18  ;;  %v866_v6 = vperm.slane %v865_v55, 0  ;;  %vm884_vm11 = vmand %vm3043_vm6, %vm2325_vm14  ;;  %s2094_s18 = smov 80  }
 0x125   : > { %v811_v38 = vpop.permute.xlu1 %810  ;;  %v809_v44 = vpop.permute.xlu0 %808  ;;  %v867_v40 = vperm.slane %v865_v55, 1  ;;  %vm4380_vm1 = vcmp.eq.s32.totalorder %v2347_v50, 1  ;;  %vm3070_vm4 = vcmp.eq.s32.totalorder %v844_v1, 1  ;;  %v887_v19 = vsel %vm884_vm11, 1, %v2071_v51  ;;  %vm906_vm11 = vmand %vm3043_vm6, %vm2317_vm13 }
 0x126   : > { %v813_v54 = vsel %vm812_vm3, %v809_v44, %v811_v38  ;;  %v814_v62 = vsel %vm812_vm3, %v811_v38, %v809_v44  ;;  %v3035_v57 = vpop.permute.xlu2 %920  ;;  %vm834_vm3 = vcmp.lt.s32.totalorder %v2280_v39, 14  ;;  %v839_v10 = vsel %vm4380_vm1, %v837_v60, %v838_v63  ;;  %vm4383_vm7 = vmmov %vm4380_vm1 }
 0x127   : > { %v819_v58 = vmul.f32 %v817_v32, %v814_v62  ;;  %v820_v59 = vmul.f32 %v817_v32, %v813_v54  ;;  %v861_v13 = vsel %vm4383_vm7, %v859_v2, %v860_v3  ;;  %vm3087_vm1 = vcmp.eq.s32.totalorder %v867_v40, 1 }
 0x128   : > { %v881_v27 = vstv %s3051_s24  ;;  %v888_v28 = vperm.slane %v887_v19, 0  ;;  %v889_v31 = vperm.slane %v887_v19, 1  ;;  %v909_v44 = vsel %vm906_vm11, 1, %v2071_v51  ;;  %s3254_s24 = sld [smem:[#allocation6 + $0x4c]] }
 0x129   : > { %v826_v4 = vsel %vm3020_vm9, %v819_v58, 0.0  ;;  %v827_v5 = vsel %vm3030_vm0, %v820_v59, 0.0  ;;  %vm3079_vm9 = vcmp.eq.s32.totalorder %v845_v25, 1  ;;  %vm3083_vm0 = vcmp.eq.s32.totalorder %v866_v6, 1 }
 0x12a   : > { %v828_v42 = vadd.f32 %v826_v4, %v806_v34  ;;  %v829_v8 = vadd.f32 %v827_v5, %v807_v35  ;;  %v903_v60 = vstv %s3076_s27  ;;  %v904_v63 = vstv %s3066_s26  ;;  %s2096_s26 = smov 78   ;;  %s3318_s27 = sld [smem:[#allocation6 + $0x1c]] }
 0x12b   : > { %1329 = vrot.lane.b32.xlu1 %v2240_v33, %s2091_s25  ;;  %1309 = vrot.lane.b32.xlu0 %v2245_v36, %s2090_s21  ;;  %v910_v3 = vperm.slane %v909_v44, 0  ;;  %v911_v4 = vperm.slane %v909_v44, 1  ;;  %s3239_s21 = sld [smem:[#allocation6 + $0x1a]] }
 0x12c   : > { %1331 = vrot.lane.b32.xlu2 %v2245_v36, %s2091_s25  ;;  %s2095_s25 = smov 79  }
 0x12d   : > { %v853_v14 = vpop.permute.xlu1 %852  ;;  %v833_v17 = vpop.permute.xlu0 %832 }
 0x12e   : > { %v835_v49 = vsel %vm834_vm3, %v2893_v15, %v833_v17  ;;  %v836_v41 = vsel %vm834_vm3, %v833_v17, %v2893_v15  ;;  %v857_v20 = vsel %vm856_vm8, %v853_v14, %v2934_v43  ;;  %v858_v22 = vsel %vm856_vm8, %v2934_v43, %v853_v14  ;;  %v3113_v23 = vpop.permute.xlu2 %977  ;;  %vm928_vm3 = vmand %vm3043_vm6, %vm2310_vm12 }
 0x12f   : > { %v841_v7 = vmul.f32 %v839_v10, %v836_v41  ;;  %v842_v29 = vmul.f32 %v839_v10, %v835_v49  ;;  %v863_v24 = vmul.f32 %v861_v13, %v858_v22  ;;  %v864_v26 = vmul.f32 %v861_v13, %v857_v20 }
 0x130   : > { %v882_v15 = vstv %s3047_s22  ;;  %vm878_vm8 = vcmp.lt.s32.totalorder %v2280_v39, 3  ;;  %v931_v1 = vsel %vm928_vm3, 1, %v2071_v51  ;;  %v925_v10 = vstv %s3123_s5  ;;  %s3243_s22 = sld [smem:[#allocation6 + $0x1b]] }
 0x131   : > { %v848_v43 = vsel %vm3070_vm4, %v841_v7, 0.0  ;;  %v849_v32 = vsel %vm3079_vm9, %v842_v29, 0.0  ;;  %v870_v34 = vsel %vm3083_vm0, %v863_v24, 0.0  ;;  %v871_v35 = vsel %vm3087_vm1, %v864_v26, 0.0  ;;  %vm4390_vm4 = vmmov %vm4383_vm7  ;;  %s1742_s5 = sld [smem:[#allocation6 + $0x4e]] }
 0x132   : > { %v850_v38 = vadd.f32 %v848_v43, %v828_v42  ;;  %v851_v45 = vadd.f32 %v849_v32, %v829_v8  ;;  %v883_v54 = vsel %vm4390_vm4, %v881_v27, %v882_v15  ;;  %vm3143_vm7 = vcmp.eq.s32.totalorder %v888_v28, 1  ;;  %vm943_vm0 = vmand %vm3043_vm6, %vm4322_vm15 }
 0x133   : > { %1353 = vrot.lane.b32.xlu1 %v2245_v36, %s2092_s9  ;;  %1351 = vrot.lane.b32.xlu0 %v2240_v33, %s2092_s9  ;;  %vm3151_vm9 = vcmp.eq.s32.totalorder %v889_v31, 1  ;;  %v940_v42 = vstv %s3115_s4  ;;  %v941_v8 = vstv %s3111_s29  ;;  %v932_v13 = vperm.slane %v931_v1, 0  ;;  %vm4395_vm11 = vmmov %vm4390_vm4  ;;  %s2097_s29 = smov 77   ;;  %s3367_s4 = sld [smem:[#allocation6 + $0x1d]] }
 0x134   : > { %v872_v52 = vadd.f32 %v870_v34, %v850_v38  ;;  %v873_v53 = vadd.f32 %v871_v35, %v851_v45  ;;  %1373 = vrot.lane.b32.xlu2 %v2240_v33, %s2093_s17  ;;  %v933_v14 = vperm.slane %v931_v1, 1  ;;  %vm900_vm1 = vcmp.lt.s32.totalorder %v2280_v39, 2  ;;  %vm4396_vm3 = vmmov %vm4390_vm4  ;;  %s3411_s9 = sld [smem:[#allocation6 + $0x1e]] }
 0x135   : > { %v877_v55 = vpop.permute.xlu1 %876  ;;  %v875_v59 = vpop.permute.xlu0 %874  ;;  %v946_v18 = vsel %vm943_vm0, 1, %v2071_v51  ;;  %v905_v49 = vsel %vm4395_vm11, %v903_v60, %v904_v63  ;;  %v942_v41 = vsel %vm4396_vm3, %v940_v42, %v941_v8  ;;  %vm3196_vm4 = vcmp.eq.s32.totalorder %v910_v3, 1  ;;  %vm4401_vm0 = vmmov %vm4396_vm3 }
 0x136   : > { %v879_v25 = vsel %vm878_vm8, %v875_v59, %v877_v55  ;;  %v880_v2 = vsel %vm878_vm8, %v877_v55, %v875_v59  ;;  %v3173_v5 = vpop.permute.xlu2 %1001  ;;  %vm965_vm8 = vmand %vm3043_vm6, %vm2438_vm5  ;;  %v927_v7 = vsel %vm4401_vm0, %v925_v10, %v926_v11  ;;  %vm3207_vm11 = vcmp.eq.s32.totalorder %v932_v13, 1  ;;  %v3280_v11 = vld [vmem:[#allocation7] ss:$2 sm:$0x3] }
 0x137   : > { %v885_v6 = vmul.f32 %v883_v54, %v880_v2  ;;  %v886_v40 = vmul.f32 %v883_v54, %v879_v25  ;;  %vm3211_vm3 = vcmp.eq.s32.totalorder %v933_v14, 1  ;;  %v947_v26 = vperm.slane %v946_v18, 0 }
 0x138   : > { %v948_v27 = vperm.slane %v946_v18, 1  ;;  %v945_v31 = vmul.f32 %v942_v41, %v2245_v36  ;;  %v962_v43 = vstv %s3163_s20  ;;  %v963_v32 = vstv %s3147_s10  ;;  %s3413_s10 = sld [smem:[#allocation6 + $0x4f]] }
 0x139   : > { %v892_v16 = vsel %vm3143_vm7, %v885_v6, 0.0  ;;  %v893_v17 = vsel %vm3151_vm9, %v886_v40, 0.0  ;;  %vm3200_vm7 = vcmp.eq.s32.totalorder %v911_v4, 1  ;;  %vm922_vm9 = vcmp.lt.s32.totalorder %v2280_v39, 1  ;;  %s3417_s20 = sld [smem:[#allocation6 + $0x50]] }
 0x13a   : > { %v894_v21 = vadd.f32 %v892_v16, %v872_v52  ;;  %v895_v19 = vadd.f32 %v893_v17, %v873_v53  ;;  %v968_v34 = vsel %vm965_vm8, 1, %v2071_v51  ;;  %vm3245_vm8 = vcmp.eq.s32.totalorder %v948_v27, 1 }
 0x13b   : > { %1395 = vrot.lane.b32.xlu1 %v2240_v33, %s2094_s18  ;;  %1375 = vrot.lane.b32.xlu0 %v2245_v36, %s2093_s17  ;;  %v969_v58 = vperm.slane %v968_v34, 0  ;;  %v970_v59 = vperm.slane %v968_v34, 1  ;;  %v944_v60 = vmul.f32 %v942_v41, %v2240_v33  ;;  %v952_v6 = vsel %vm3245_vm8, %v945_v31, 0.0  ;;  %s3415_s17 = sld [smem:[#allocation6 + $0x1f]] }
 0x13c   : > { %1397 = vrot.lane.b32.xlu2 %v2245_v36, %s2094_s18  ;;  %v985_v41 = vstv %s3239_s21  ;;  %v1007_v31 = vstv %s3243_s22  ;;  %s3423_s18 = sld [smem:[#allocation6 + $0x20]] }
 0x13d   : > { %v919_v15 = vpop.permute.xlu1 %918  ;;  %v899_v28 = vpop.permute.xlu0 %898  ;;  %vm3286_vm8 = vcmp.eq.s32.totalorder %v969_v58, 1  ;;  %s3438_s21 = sld [smem:[#allocation6 + $0x21]] }
 0x13e   : > { %v901_v35 = vsel %vm900_vm1, %v2987_v56, %v899_v28  ;;  %v902_v38 = vsel %vm900_vm1, %v899_v28, %v2987_v56  ;;  %v923_v45 = vsel %vm922_vm9, %v919_v15, %v3035_v57  ;;  %v924_v44 = vsel %vm922_vm9, %v3035_v57, %v919_v15  ;;  %v3241_v52 = vpop.permute.xlu2 %1043  ;;  %vm987_vm1 = vmand %vm3043_vm6, %vm4372_vm2  ;;  %s3440_s22 = sld [smem:[#allocation6 + $0x52]] }
 0x13f   : > { %v907_v53 = vmul.f32 %v905_v49, %v902_v38  ;;  %v908_v54 = vmul.f32 %v905_v49, %v901_v35  ;;  %v929_v62 = vmul.f32 %v927_v7, %v924_v44  ;;  %v930_v55 = vmul.f32 %v927_v7, %v923_v45 }
 0x140   : > { %vm3264_vm9 = vcmp.eq.s32.totalorder %v947_v26, 1  ;;  %v990_v42 = vsel %vm987_vm1, 1, %v2071_v51  ;;  %vm3290_vm1 = vcmp.eq.s32.totalorder %v970_v59, 1  ;;  %v1006_v28 = vstv %s3254_s24  ;;  %s3447_s24 = sld [smem:[#allocation6 + $0x22]] }
 0x141   : > { %v914_v57 = vsel %vm3196_vm4, %v907_v53, 0.0  ;;  %v915_v63 = vsel %vm3200_vm7, %v908_v54, 0.0  ;;  %v936_v1 = vsel %vm3207_vm11, %v929_v62, 0.0  ;;  %v937_v25 = vsel %vm3211_vm3, %v930_v55, 0.0  ;;  %vm4410_vm7 = vmmov %vm4401_vm0 }
 0x142   : > { %v916_v2 = vadd.f32 %v914_v57, %v894_v21  ;;  %v917_v3 = vadd.f32 %v915_v63, %v895_v19  ;;  %vm959_vm4 = vcmp.lt.s32.totalorder %v2280_v39, 127  ;;  %v964_v40 = vsel %vm4410_vm7, %v962_v43, %v963_v32  ;;  %vm1009_vm0 = vmand %vm3043_vm6, %vm2512_vm10 }
 0x143   : > { %1419 = vrot.lane.b32.xlu1 %v2245_v36, %s2095_s25  ;;  %1417 = vrot.lane.b32.xlu0 %v2240_v33, %s2095_s25  ;;  %vm279_vm11 = vcmp.ge.s32.totalorder %v3280_v11, 4294967295  ;;  %vm280_vm3 = vcmp.lt.s32.totalorder %v3280_v11, 15  ;;  %v951_v18 = vsel %vm3264_vm9, %v944_v60, 0.0  ;;  %v984_v21 = vstv %s3225_s23  ;;  %s3425_s23 = sld [smem:[#allocation6 + $0x51]] }
 0x144   : > { %v938_v8 = vadd.f32 %v936_v1, %v916_v2  ;;  %v939_v10 = vadd.f32 %v937_v25, %v917_v3  ;;  %1439 = vrot.lane.b32.xlu2 %v2240_v33, %s2096_s26  ;;  %v1012_v20 = vsel %vm1009_vm0, 1, %v2071_v51  ;;  %v991_v24 = vperm.slane %v990_v42, 0  ;;  %vm3314_vm9 = vmand %vm279_vm11, %vm280_vm3  ;;  %s3449_s25 = sld [smem:[#allocation6 + $0x53]] }
 0x145   : > { %v958_v13 = vpop.permute.xlu1 %957  ;;  %v956_v17 = vpop.permute.xlu0 %955  ;;  %v992_v26 = vperm.slane %v990_v42, 1  ;;  %v1013_v34 = vperm.slane %v1012_v20, 0  ;;  %v1014_v35 = vperm.slane %v1012_v20, 1  ;;  %vm1031_vm6 = vmand %vm3314_vm9, %vm2325_vm14  ;;  %vm1003_vm7 = vcmp.lt.s32.totalorder %v2280_v39, 125 }
 0x146   : > { %v960_v19 = vsel %vm959_vm4, %v956_v17, %v958_v13  ;;  %v961_v49 = vsel %vm959_vm4, %v958_v13, %v956_v17  ;;  %v3308_v22 = vpop.permute.xlu2 %1067  ;;  %v954_v9 = vadd.f32 %v952_v6, %v939_v10  ;;  %v953_v15 = vadd.f32 %v951_v18, %v938_v8 }
 0x147   : > { %v966_v7 = vmul.f32 %v964_v40, %v960_v19  ;;  %v967_v29 = vmul.f32 %v964_v40, %v961_v49  ;;  %vm981_vm4 = vcmp.lt.s32.totalorder %v2280_v39, 126  ;;  %vm4417_vm0 = vcmp.eq.s32.totalorder %v2347_v50, 1 }
 0x148   : > { %v986_v44 = vsel %vm4417_vm0, %v984_v21, %v985_v41  ;;  %vm3339_vm11 = vcmp.eq.s32.totalorder %v991_v24, 1  ;;  %vm4420_vm3 = vmmov %vm4417_vm0  ;;  %vm3354_vm0 = vcmp.eq.s32.totalorder %v1014_v35, 1  ;;  %v1034_v59 = vsel %vm1031_vm6, 1, %v2071_v51 }
 0x149   : > { %v973_v43 = vsel %vm3286_vm8, %v966_v7, 0.0  ;;  %v974_v32 = vsel %vm3290_vm1, %v967_v29, 0.0  ;;  %v1008_v54 = vsel %vm4420_vm3, %v1006_v28, %v1007_v31  ;;  %vm3346_vm8 = vcmp.eq.s32.totalorder %v992_v26, 1 }
 0x14a   : > { %v975_v38 = vadd.f32 %v973_v43, %v953_v15  ;;  %v976_v45 = vadd.f32 %v974_v32, %v954_v9  ;;  %vm3350_vm1 = vcmp.eq.s32.totalorder %v1013_v34, 1  ;;  %v1028_v6 = vstv %s3322_s28  ;;  %s3496_s28 = sld [smem:[#allocation6 + $0x24]] }
 0x14b   : > { %1441 = vrot.lane.b32.xlu0 %v2245_v36, %s2096_s26  ;;  %1461 = vrot.lane.b32.xlu1 %v2240_v33, %s2097_s29  ;;  %v1029_v40 = vstv %s3318_s27  ;;  %v1035_v14 = vperm.slane %v1034_v59, 0  ;;  %v1036_v16 = vperm.slane %v1034_v59, 1  ;;  %vm1025_vm6 = vcmp.lt.s32.totalorder %v2280_v39, 115  ;;  %s3465_s26 = sld [smem:[#allocation6 + $0x23]] }
 0x14c   : > { %1463 = vrot.lane.b32.xlu2 %v2245_v36, %s2097_s29  ;;  %v1050_v28 = vstv %s1742_s5  ;;  %v1051_v31 = vstv %s3367_s4  ;;  %s3480_s27 = sld [smem:[#allocation6 + $0x54]] }
 0x14d   : > { %v1000_v62 = vpop.permute.xlu1 %999  ;;  %v980_v55 = vpop.permute.xlu0 %979  ;;  %s3519_s29 = sld [smem:[#allocation6 + $0x55]] }
 0x14e   : > { %v982_v36 = vsel %vm981_vm4, %v3113_v23, %v980_v55  ;;  %v983_v60 = vsel %vm981_vm4, %v980_v55, %v3113_v23  ;;  %v1004_v57 = vsel %vm1003_vm7, %v1000_v62, %v3173_v5  ;;  %v1005_v63 = vsel %vm1003_vm7, %v3173_v5, %v1000_v62  ;;  %v3363_v1 = vpop.permute.xlu2 %1109  ;;  %vm4427_vm4 = vmmov %vm4420_vm3  ;;  %s3552_s4 = sld [smem:[#allocation6 + $0x25]] }
 0x14f   : > { %v988_v25 = vmul.f32 %v986_v44, %v982_v36  ;;  %v989_v2 = vmul.f32 %v986_v44, %v983_v60  ;;  %v1010_v3 = vmul.f32 %v1008_v54, %v1004_v57  ;;  %v1011_v4 = vmul.f32 %v1008_v54, %v1005_v63  ;;  %vm1053_vm7 = vmand %vm3314_vm9, %vm2317_vm13  ;;  %s3561_s5 = sld [smem:[#allocation6 + $0x56]] }
 0x150   : > { %v1030_v21 = vsel %vm4427_vm4, %v1028_v6, %v1029_v40  ;;  %vm1038_vm3 = vcmp.eq.s32.totalorder %v1036_v16, 1  ;;  %v1056_v26 = vsel %vm1053_vm7, 1, %v2071_v51  ;;  %vm1097_vm7 = vmand %vm3314_vm9, %vm4322_vm15 }
 0x151   : > { %v995_v42 = vsel %vm3339_vm11, %v988_v25, 0.0  ;;  %v996_v23 = vsel %vm3346_vm8, %v989_v2, 0.0  ;;  %v1017_v8 = vsel %vm3350_vm1, %v1010_v3, 0.0  ;;  %v1018_v5 = vsel %vm3354_vm0, %v1011_v4, 0.0  ;;  %vm4428_vm1 = vmmov %vm4427_vm4 }
 0x152   : > { %v997_v10 = vadd.f32 %v995_v42, %v975_v38  ;;  %v998_v13 = vadd.f32 %v996_v23, %v976_v45  ;;  %vm1037_vm11 = vcmp.eq.s32.totalorder %v1035_v14, 1  ;;  %v1057_v34 = vperm.slane %v1056_v26, 0  ;;  %vm1075_vm4 = vmand %vm3314_vm9, %vm2310_vm12 }
 0x153   : > { %v1058_v35 = vperm.slane %v1056_v26, 1  ;;  %vm1047_vm8 = vcmp.lt.s32.totalorder %v2280_v39, 114  ;;  %v1052_v38 = vsel %vm4428_vm1, %v1050_v28, %v1051_v31  ;;  %v1078_v6 = vsel %vm1075_vm4, 1, %v2071_v51 }
 0x154   : > { %v1019_v17 = vadd.f32 %v1017_v8, %v997_v10  ;;  %v1020_v18 = vadd.f32 %v1018_v5, %v998_v13  ;;  %vm1059_vm0 = vcmp.eq.s32.totalorder %v1057_v34, 1  ;;  %v1100_v40 = vsel %vm1097_vm7, 1, %v2071_v51 }
 0x155   : > { %v1024_v19 = vpop.permute.xlu1 %1023  ;;  %v1022_v49 = vpop.permute.xlu0 %1021  ;;  %v1079_v42 = vperm.slane %v1078_v6, 0  ;;  %v1080_v23 = vperm.slane %v1078_v6, 1  ;;  %v1072_v8 = vstv %s3413_s10  ;;  %v1073_v5 = vstv %s3411_s9  ;;  %s3601_s9 = sld [smem:[#allocation6 + $0x26]] }
 0x156   : > { %v1026_v41 = vsel %vm1025_vm6, %v1022_v49, %v1024_v19  ;;  %v1027_v20 = vsel %vm1025_vm6, %v1024_v19, %v1022_v49  ;;  %v3384_v7 = vpop.permute.xlu2 %1133  ;;  %vm1060_vm6 = vcmp.eq.s32.totalorder %v1058_v35, 1  ;;  %v1094_v10 = vstv %s3417_s20  ;;  %s3607_s10 = sld [smem:[#allocation6 + $0x57]] }
 0x157   : > { %v1032_v29 = vmul.f32 %v1030_v21, %v1026_v41  ;;  %v1033_v24 = vmul.f32 %v1030_v21, %v1027_v20  ;;  %v1095_v13 = vstv %s3415_s17  ;;  %v1101_v14 = vperm.slane %v1100_v40, 0  ;;  %s3617_s17 = sld [smem:[#allocation6 + $0x27]] }
 0x158   : > { %v1102_v16 = vperm.slane %v1100_v40, 1  ;;  %v1117_v21 = vstv %s3423_s18  ;;  %vm3469_vm4 = vcmp.eq.s32.totalorder %v1079_v42, 1  ;;  %vm3473_vm7 = vcmp.eq.s32.totalorder %v1080_v23, 1  ;;  %s3636_s20 = sld [smem:[#allocation6 + $0x58]] }
 0x159   : > { %v1039_v9 = vsel %vm1037_vm11, %v1032_v29, 0.0  ;;  %v1040_v15 = vsel %vm1038_vm3, %v1033_v24, 0.0  ;;  %vm1119_vm11 = vmand %vm3314_vm9, %vm2438_vm5  ;;  %vm1069_vm3 = vcmp.lt.s32.totalorder %v2280_v39, 113  ;;  %v1096_v24 = vsel %vm4428_vm1, %v1094_v10, %v1095_v13  ;;  %s3686_s18 = sld [smem:[#allocation6 + $0x28]] }
 0x15a   : > { %v1041_v43 = vadd.f32 %v1039_v9, %v1019_v17  ;;  %v1042_v32 = vadd.f32 %v1040_v15, %v1020_v18  ;;  %v1122_v17 = vsel %vm1119_vm11, 1, %v2071_v51  ;;  %v1116_v18 = vstv %s3425_s23  ;;  %s3699_s23 = sld [smem:[#allocation6 + $0x59]] }
 0x15b   : > { %v1123_v26 = vperm.slane %v1122_v17, 0  ;;  %v1124_v9 = vperm.slane %v1122_v17, 1  ;;  %vm3525_vm5 = vcmp.eq.s32.totalorder %v1102_v16, 1  ;;  %v1182_v16 = vstv %s3480_s27  ;;  %s3817_s27 = sld [smem:[#allocation6 + $0x5c]] }
 0x15c   : > { %v1183_v17 = vstv %s3465_s26  ;;  %s3798_s26 = sld [smem:[#allocation6 + $0x2b]] }
 0x15d   : > { %v3391_v45 = vpop.permute.xlu1 %1065  ;;  %v1046_v44 = vpop.permute.xlu0 %1045 }
 0x15e   : > { %v1048_v53 = vsel %vm1047_vm8, %v3241_v52, %v1046_v44  ;;  %v1049_v54 = vsel %vm1047_vm8, %v1046_v44, %v3241_v52  ;;  %v3395_v55 = vpop.permute.xlu2 %1175  ;;  %vm1141_vm8 = vmand %vm3314_vm9, %vm4372_vm2  ;;  %v1070_v31 = vsel %vm1069_vm3, %v3391_v45, %v3308_v22  ;;  %v1071_v35 = vsel %vm1069_vm3, %v3308_v22, %v3391_v45 }
 0x15f   : > { %v1054_v62 = vmul.f32 %v1052_v38, %v1048_v53  ;;  %v1055_v33 = vmul.f32 %v1052_v38, %v1049_v54  ;;  %v1144_v15 = vsel %vm1141_vm8, 1, %v2071_v51  ;;  %v1138_v44 = vstv %s3440_s22  ;;  %s3722_s22 = sld [smem:[#allocation6 + $0x5a]] }
 0x160   : > { %v1139_v53 = vstv %s3438_s21  ;;  %v1145_v54 = vperm.slane %v1144_v15, 0  ;;  %vm3540_vm3 = vcmp.eq.s32.totalorder %v1123_v26, 1  ;;  %v1146_v6 = vperm.slane %v1144_v15, 1  ;;  %s3709_s21 = sld [smem:[#allocation6 + $0x29]] }
 0x161   : > { %v1061_v56 = vsel %vm1059_vm0, %v1054_v62, 0.0  ;;  %v1062_v58 = vsel %vm1060_vm6, %v1055_v33, 0.0  ;;  %vm283_vm0 = vcmp.lt.s32.totalorder %v3280_v11, 14  ;;  %vm4429_vm6 = vmmov %vm4428_vm1  ;;  %vm3504_vm1 = vcmp.eq.s32.totalorder %v1101_v14, 1 }
 0x162   : > { %v3397_v59 = vadd.f32 %v1061_v56, %v1041_v43  ;;  %v3399_v36 = vadd.f32 %v1062_v58, %v1042_v32  ;;  %v1074_v19 = vsel %vm4429_vm6, %v1072_v8, %v1073_v5  ;;  %vm4436_vm11 = vmmov %vm4429_vm6  ;;  %vm4437_vm6 = vcmp.ge.s32.totalorder %v3280_v11, 4294967294 }
 0x163   : > { %v1118_v32 = vsel %vm4436_vm11, %v1116_v18, %v1117_v21  ;;  %vm3515_vm2 = vmand %vm4437_vm6, %vm283_vm0  ;;  %v1160_v62 = vstv %s3449_s25  ;;  %v1161_v33 = vstv %s3447_s24  ;;  %v1076_v58 = vmul.f32 %v1074_v19, %v1070_v31  ;;  %s3770_s24 = sld [smem:[#allocation6 + $0x2a]] }
 0x164   : > { %vm4442_vm0 = vmand %vm3314_vm9, %vm2512_vm10  ;;  %vm3544_vm6 = vcmp.eq.s32.totalorder %v1124_v9, 1  ;;  %v1077_v27 = vmul.f32 %v1074_v19, %v1071_v35  ;;  %vm4447_vm9 = vcmp.lt.s32.totalorder %v2280_v39, 112  ;;  %v1204_v31 = vstv %s3519_s29  ;;  %s3787_s25 = sld [smem:[#allocation6 + $0x5b]] }
 0x165   : > { %v3401_v60 = vpop.permute.xlu1 %1089  ;;  %v3403_v57 = vpop.permute.xlu0 %1087  ;;  %v1166_v56 = vsel %vm4442_vm0, 1, %v2071_v51  ;;  %vm1185_vm11 = vmand %vm3515_vm2, %vm2325_vm14  ;;  %vm4448_vm0 = vcmp.eq.s32.totalorder %v2347_v50, 1  ;;  %v1083_v21 = vsel %vm3469_vm4, %v1076_v58, 0.0  ;;  %v1205_v35 = vstv %s3496_s28  ;;  %s3854_s28 = sld [smem:[#allocation6 + $0x2c]] }
 0x166   : > { %v3405_v63 = vpop.permute.xlu2 %1199  ;;  %v1092_v40 = vsel %vm4447_vm9, %v3403_v57, %v3401_v60  ;;  %v1140_v42 = vsel %vm4448_vm0, %v1138_v44, %v1139_v53  ;;  %vm4449_vm10 = vmmov %vm4447_vm9  ;;  %v1167_v5 = vperm.slane %v1166_v56, 0  ;;  %v1168_v10 = vperm.slane %v1166_v56, 1  ;;  %s3876_s29 = sld [smem:[#allocation6 + $0x5d]] }
 0x167   : > { %v1093_v23 = vsel %vm4449_vm10, %v3401_v60, %v3403_v57  ;;  %vm4450_vm14 = vmmov %vm4448_vm0  ;;  %vm4451_vm9 = vcmp.lt.s32.totalorder %v2280_v39, 111  ;;  %vm3575_vm0 = vcmp.eq.s32.totalorder %v1145_v54, 1  ;;  %v1188_v60 = vsel %vm1185_vm11, 1, %v2071_v51 }
 0x168   : > { %v3569_v8 = vsel %vm4450_vm14, %v1160_v62, %v1161_v33  ;;  %v1098_v19 = vmul.f32 %v1096_v24, %v1092_v40  ;;  %vm4454_vm14 = vmmov %vm4451_vm9  ;;  %vm3592_vm10 = vcmp.eq.s32.totalorder %v1146_v6, 1  ;;  %v1084_v49 = vsel %vm3473_vm7, %v1077_v27, 0.0 }
 0x169   : > { %vm1207_vm11 = vmand %vm3515_vm2, %vm2317_vm13  ;;  %v1099_v15 = vmul.f32 %v1096_v24, %v1093_v23  ;;  %vm4457_vm4 = vcmp.eq.s32.totalorder %v2347_v50, 1  ;;  %v1189_v44 = vperm.slane %v1188_v60, 0  ;;  %v1190_v53 = vperm.slane %v1188_v60, 1 }
 0x16a   : > { %v1085_v24 = vadd.f32 %v1083_v21, %v3397_v59  ;;  %vm4458_vm7 = vcmp.lt.s32.totalorder %v2280_v39, 110  ;;  %v1210_v56 = vsel %vm1207_vm11, 1, %v2071_v51  ;;  %v1086_v59 = vadd.f32 %v1084_v49, %v3399_v36 }
 0x16b   : > { %vm4461_vm8 = vcmp.eq.s32.totalorder %v2347_v50, 1  ;;  %v1106_v27 = vsel %vm3525_vm5, %v1099_v15, 0.0  ;;  %v1226_v40 = vstv %s3561_s5  ;;  %v1227_v23 = vstv %s3552_s4  ;;  %vm1251_vm5 = vmand %vm3515_vm2, %vm4322_vm15  ;;  %s3928_s4 = sld [smem:[#allocation6 + $0x2d]] }
 0x16c   : > { %v3648_v6 = vsel %vm4461_vm8, %v1204_v31, %v1205_v35  ;;  %v1211_v38 = vperm.slane %v1210_v56, 0  ;;  %vm4464_vm8 = vcmp.lt.s32.totalorder %v2280_v39, 109  ;;  %v1108_v45 = vadd.f32 %v1106_v27, %v1086_v59  ;;  %s3948_s5 = sld [smem:[#allocation6 + $0x5e]] }
 0x16d   : > { %v3407_v25 = vpop.permute.xlu1 %1131  ;;  %v3409_v2 = vpop.permute.xlu0 %1111  ;;  %vm3688_vm11 = vcmp.eq.s32.totalorder %v1190_v53, 1  ;;  %v1248_v31 = vstv %s3607_s10  ;;  %v1249_v35 = vstv %s3601_s9  ;;  %s3960_s9 = sld [smem:[#allocation6 + $0x2e]] }
 0x16e   : > { %v3427_v52 = vpop.permute.xlu2 %1241  ;;  %v1114_v13 = vsel %vm4451_vm9, %v3363_v1, %v3409_v2  ;;  %v1115_v26 = vsel %vm4454_vm14, %v3409_v2, %v3363_v1  ;;  %v3611_v2 = vsel %vm4457_vm4, %v1182_v16, %v1183_v17  ;;  %vm1229_vm14 = vmand %vm3515_vm2, %vm2310_vm12  ;;  %v1136_v62 = vsel %vm4458_vm7, %v3407_v25, %v3384_v7  ;;  %s3978_s10 = sld [smem:[#allocation6 + $0x5f]] }
 0x16f   : > { %v1120_v1 = vmul.f32 %v1118_v32, %v1114_v13  ;;  %v1121_v54 = vmul.f32 %v1118_v32, %v1115_v26  ;;  %vm3626_vm4 = vcmp.eq.s32.totalorder %v1167_v5, 1  ;;  %v1105_v32 = vsel %vm3504_vm1, %v1098_v19, 0.0 }
 0x170   : > { %v1137_v58 = vsel %vm4458_vm7, %v3384_v7, %v3407_v25  ;;  %v3660_v36 = vsel %vm1229_vm14, 1, %v2071_v51  ;;  %v1142_v25 = vmul.f32 %v1140_v42, %v1136_v62  ;;  %vm3664_vm1 = vcmp.eq.s32.totalorder %v1168_v10, 1  ;;  %vm4470_vm7 = vmmov %vm4464_vm8 }
 0x171   : > { %v1127_v7 = vsel %vm3540_vm3, %v1120_v1, 0.0  ;;  %v1212_v5 = vperm.slane %v1210_v56, 1  ;;  %v1107_v13 = vadd.f32 %v1105_v32, %v1085_v24  ;;  %v1128_v16 = vsel %vm3544_vm6, %v1121_v54, 0.0 }
 0x172   : > { %v1143_v22 = vmul.f32 %v1140_v42, %v1137_v58  ;;  %vm3678_vm3 = vcmp.eq.s32.totalorder %v1189_v44, 1  ;;  %vm4469_vm14 = vcmp.eq.s32.totalorder %v2347_v50, 1  ;;  %v1233_v26 = vperm.slane %v3660_v36, 0 }
 0x173   : > { %v3695_v42 = vsel %vm4469_vm14, %v1226_v40, %v1227_v23  ;;  %v1234_v49 = vperm.slane %v3660_v36, 1  ;;  %v1129_v15 = vadd.f32 %v1127_v7, %v1107_v13  ;;  %v1254_v1 = vsel %vm1251_vm5, 1, %v2071_v51 }
 0x174   : > { %v1130_v44 = vadd.f32 %v1128_v16, %v1108_v45  ;;  %v1149_v53 = vsel %vm3575_vm0, %v1142_v25, 0.0  ;;  %v1150_v62 = vsel %vm3592_vm10, %v1143_v22, 0.0  ;;  %vm4472_vm0 = vcmp.lt.s32.totalorder %v2280_v39, 99 }
 0x175   : > { %v3433_v3 = vpop.permute.xlu1 %1155  ;;  %v3435_v4 = vpop.permute.xlu0 %1153  ;;  %vm3730_vm5 = vcmp.eq.s32.totalorder %v1211_v38, 1  ;;  %vm3740_vm6 = vcmp.eq.s32.totalorder %v1212_v5, 1  ;;  %vm4478_vm9 = vcmp.eq.s32.totalorder %v2347_v50, 1  ;;  %v1255_v58 = vperm.slane %v1254_v1, 0 }
 0x176   : > { %v3498_v28 = vpop.permute.xlu2 %1265  ;;  %v1158_v10 = vsel %vm4464_vm8, %v3435_v4, %v3433_v3  ;;  %v1159_v24 = vsel %vm4470_vm7, %v3433_v3, %v3435_v4  ;;  %vm4471_vm8 = vnez %v4279_v30  ;;  %v1270_v3 = vstv %s3636_s20  ;;  %vm4475_vm7 = vmmov %vm4472_vm0  ;;  %s4054_s20 = sld [smem:[#allocation6 + $0x60]] }
 0x177   : > { %v1164_v54 = vmul.f32 %v3569_v8, %v1158_v10  ;;  %vm1273_vm14 = vmand %vm3515_vm2, %vm4471_vm8  ;;  %v1271_v4 = vstv %s3617_s17  ;;  %v3747_v9 = vsel %vm4478_vm9, %v1248_v31, %v1249_v35  ;;  %v1151_v40 = vadd.f32 %v1149_v53, %v1129_v15  ;;  %s4042_s17 = sld [smem:[#allocation6 + $0x2f]] }
 0x178   : > { %v1165_v23 = vmul.f32 %v3569_v8, %v1159_v24  ;;  %v1256_v36 = vperm.slane %v1254_v1, 1  ;;  %v1292_v45 = vstv %s3699_s23  ;;  %v1314_v1 = vstv %s3722_s22  ;;  %s4102_s23 = sld [smem:[#allocation6 + $0x61]] }
 0x179   : > { %v1171_v7 = vsel %vm3626_vm4, %v1164_v54, 0.0  ;;  %vm4481_vm4 = vcmp.lt.s32.totalorder %v2280_v39, 98  ;;  %v1402_v56 = vstv %s3948_s5 }
 0x17a   : > { %vm4484_vm10 = vmmov %vm4481_vm4  ;;  %v1173_v15 = vadd.f32 %v1171_v7, %v1151_v40 }
 0x17d   : > { %v3478_v20 = vpop.permute.xlu1 %1197  ;;  %v3482_v29 = vpop.permute.xlu0 %1177 }
 0x17e   : > { %v3619_v41 = vpop.permute.xlu2 %1307  ;;  %v1180_v14 = vsel %vm4472_vm0, %v3395_v55, %v3482_v29  ;;  %v1181_v59 = vsel %vm4475_vm7, %v3482_v29, %v3395_v55  ;;  %v1276_v55 = vsel %vm1273_vm14, 1, %v2071_v51  ;;  %v1152_v29 = vadd.f32 %v1150_v62, %v1130_v44  ;;  %vm4479_vm0 = vmmov %vm4478_vm9 }
 0x17f   : > { %v1186_v25 = vmul.f32 %v3611_v2, %v1180_v14  ;;  %v3764_v8 = vsel %vm4479_vm0, %v1270_v3, %v1271_v4  ;;  %vm4480_vm7 = vnez %v4284_v37  ;;  %v1187_v38 = vmul.f32 %v3611_v2, %v1181_v59 }
 0x180   : > { %v1202_v33 = vsel %vm4481_vm4, %v3478_v20, %v3405_v63  ;;  %vm3777_vm14 = vcmp.eq.s32.totalorder %v1233_v26, 1  ;;  %vm286_vm9 = vcmp.lt.s32.totalorder %v3280_v11, 13  ;;  %v1203_v2 = vsel %vm4484_vm10, %v3405_v63, %v3478_v20  ;;  %vm4490_vm8 = vmand %vm3515_vm2, %vm4480_vm7 }
 0x181   : > { %v1277_v22 = vperm.slane %v1276_v55, 0  ;;  %v1278_v10 = vperm.slane %v1276_v55, 1  ;;  %vm4485_vm4 = vnez %v4291_v12  ;;  %v1172_v26 = vsel %vm3664_vm1, %v1165_v23, 0.0 }
 0x182   : > { %vm3802_vm0 = vcmp.eq.s32.totalorder %v1234_v49, 1  ;;  %vm3806_vm10 = vcmp.eq.s32.totalorder %v1255_v58, 1  ;;  %v1293_v20 = vstv %s3686_s18  ;;  %v1298_v35 = vsel %vm4490_vm8, 1, %v2071_v51  ;;  %s4089_s18 = sld [smem:[#allocation6 + $0x30]] }
 0x183   : > { %v1193_v43 = vsel %vm3678_vm3, %v1186_v25, 0.0  ;;  %v1208_v49 = vmul.f32 %v3648_v6, %v1202_v33  ;;  %v1315_v44 = vstv %s3709_s21  ;;  %vm4491_vm1 = vcmp.ge.s32.totalorder %v3280_v11, 4294967293  ;;  %s1770_s21 = sshll.u32 %s2139_s16, 3  ;;  %s217_s16 = scalar_lea.vmem [#allocation9], %s1661_s11 }
 0x184   : > { %vm3828_vm15 = vmand %vm4491_vm1, %vm286_vm9  ;;  %v1194_v24 = vsel %vm3688_vm11, %v1187_v38, 0.0  ;;  %v1209_v54 = vmul.f32 %v3648_v6, %v1203_v2  ;;  %vm4494_vm3 = vcmp.lt.s32.totalorder %v2280_v39, 97  ;;  %vm3839_vm8 = vcmp.eq.s32.totalorder %v1256_v36, 1 }
 0x185   : > { %v3582_v57 = vpop.permute.xlu1 %1221  ;;  %v3584_v18 = vpop.permute.xlu0 %1219  ;;  %vm4497_vm9 = vmand %vm3515_vm2, %vm4485_vm4  ;;  %v1174_v19 = vadd.f32 %v1172_v26, %v1152_v29  ;;  %vm4498_vm1 = vcmp.eq.s32.totalorder %v2347_v50, 1  ;;  %v1299_v14 = vperm.slane %v1298_v35, 0  ;;  %v1300_v3 = vperm.slane %v1298_v35, 1 }
 0x186   : > { %v3749_v27 = vpop.permute.xlu2 %1331  ;;  %v1224_v17 = vsel %vm4494_vm3, %v3584_v18, %v3582_v57  ;;  %v1320_v11 = vsel %vm4497_vm9, 1, %v2071_v51  ;;  %v3852_v6 = vsel %vm4498_vm1, %v1292_v45, %v1293_v20  ;;  %v1195_v4 = vadd.f32 %v1193_v43, %v1173_v15 }
 0x187   : > { %v1225_v34 = vsel %vm4494_vm3, %v3582_v57, %v3584_v18  ;;  %vm4499_vm2 = vcmp.lt.s32.totalorder %v2280_v39, 96  ;;  %vm3864_vm9 = vcmp.eq.s32.totalorder %v1277_v22, 1  ;;  %v3870_v40 = vsel %vm4498_vm1, %v1314_v1, %v1315_v44 }
 0x188   : > { %vm4502_vm11 = vnez %v4265_v48  ;;  %v1196_v57 = vadd.f32 %v1194_v24, %v1174_v19  ;;  %v1215_v18 = vsel %vm3730_vm5, %v1208_v49, 0.0  ;;  %v1230_v23 = vmul.f32 %v3695_v42, %v1224_v17  ;;  %vm4503_vm1 = vmmov %vm4499_vm2 }
 0x189   : > { %v1321_v36 = vperm.slane %v1320_v11, 0  ;;  %v1216_v29 = vsel %vm3740_vm6, %v1209_v54, 0.0  ;;  %vm3890_vm3 = vcmp.eq.s32.totalorder %v1278_v10, 1  ;;  %v1336_v33 = vstv %s3787_s25  ;;  %vm4506_vm6 = vmand %vm3828_vm15, %vm4502_vm11  ;;  %s1555_s25 = scalar_lea.hbm %s4237_s3, %s1770_s21 }
 0x18a   : > { %v1337_v2 = vstv %s3770_s24  ;;  %v1231_v22 = vmul.f32 %v3695_v42, %v1225_v34  ;;  %v1322_v45 = vperm.slane %v1320_v11, 1  ;;  %vm1361_vm5 = vmand %vm3828_vm15, %vm2317_vm13  ;;  %v1358_v10 = vstv %s3817_s27  ;;  %s1559_s27 = sshll.u32 %s1555_s25, 4  ;;  %s1560_s27 = int_to_ptr.hbm [resolvable:$true] %s1559_s27 }
 0x18b   : > { %v1359_v26 = vstv %s3798_s26  ;;  %v1218_v15 = vadd.f32 %v1216_v29, %v1196_v57  ;;  %v1237_v48 = vsel %vm3777_vm14, %v1230_v23, 0.0  ;;  %vm4508_vm11 = vcmp.eq.s32.totalorder %v2347_v50, 1  ;;  %s1557_s26 = sshll.u32 %s217_s16, 4  ;;  %s1558_s26 = int_to_ptr.vmem [resolvable:$true] %s1557_s26 }
 0x18c   : > { %v3922_v35 = vsel %vm4508_vm11, %v1336_v33, %v1337_v2  ;;  %vm3934_vm14 = vcmp.eq.s32.totalorder %v1299_v14, 1  ;;  %vm3938_vm11 = vcmp.eq.s32.totalorder %v1300_v3, 1  ;;  %v1364_v44 = vsel %vm1361_vm5, 1, %v2071_v51 }
 0x18d   : > { %v3682_v60 = vpop.permute.xlu1 %1263  ;;  %v3684_v21 = vpop.permute.xlu0 %1243  ;;  %vm3962_vm13 = vcmp.eq.s32.totalorder %v1321_v36, 1  ;;  %vm3966_vm5 = vcmp.eq.s32.totalorder %v1322_v45, 1  ;;  %v1380_v63 = vstv %s3876_s29  ;;  %v1381_v11 = vstv %s3854_s28  ;;  %s1544_s28 = scalar_lea.sflag [#allocation4], %s2214_s8  ;;  %s1985_s29 = sshra.s32 %s1560_s27, 4  ;;  %s1986_s29 = int_to_ptr.hbm [resolvable:$true] %s1985_s29 }
 0x18e   : > { %v1246_v59 = vsel %vm4499_vm2, %v3427_v52, %v3684_v21  ;;  %v3882_v55 = vpop.permute.xlu2 %1373  ;;  %v1247_v7 = vsel %vm4503_vm1, %v3684_v21, %v3427_v52  ;;  %v1342_v52 = vsel %vm4506_vm6, 1, %v2071_v51  ;;  %v1217_v21 = vadd.f32 %v1215_v18, %v1195_v4  ;;  %vm1383_vm6 = vmand %vm3828_vm15, %vm2310_vm12  ;;  %p1992_p9 = scmp.lt.s32.totalorder %s1986_s29, %s4237_s3 }
 0x18f   : > { %v1252_v32 = vmul.f32 %v3747_v9, %v1246_v59  ;;  %vm4507_vm1 = vcmp.lt.s32.totalorder %v2280_v39, 95  ;;  %v1253_v20 = vmul.f32 %v3747_v9, %v1247_v7  ;;  %v1343_v49 = vperm.slane %v1342_v52, 0 }
 0x190   : > { %v1268_v42 = vsel %vm4507_vm1, %v3682_v60, %v3498_v28  ;;  %v1269_v43 = vsel %vm4507_vm1, %v3498_v28, %v3682_v60  ;;  %v1344_v1 = vperm.slane %v1342_v52, 1  ;;  %v1238_v28 = vsel %vm3802_vm0, %v1231_v22, 0.0 }
 0x191   : > { %v1259_v60 = vsel %vm3806_vm10, %v1252_v32, 0.0  ;;  %v1274_v24 = vmul.f32 %v3764_v8, %v1268_v42  ;;  %vm1355_vm1 = vcmp.lt.s32.totalorder %v2280_v39, 82  ;;  %vm4513_vm2 = vcmp.eq.s32.totalorder %v2347_v50, 1 }
 0x192   : > { %v3958_v54 = vsel %vm4513_vm2, %v1358_v10, %v1359_v26  ;;  %v1239_v47 = vadd.f32 %v1237_v48, %v1217_v21  ;;  %v1386_v19 = vsel %vm1383_vm6, 1, %v2071_v51  ;;  %v1260_v14 = vsel %vm3839_vm8, %v1253_v20, 0.0 }
 0x193   : > { %v1275_v3 = vmul.f32 %v3764_v8, %v1269_v43  ;;  %v1365_v4 = vperm.slane %v1364_v44, 0  ;;  %v1366_v34 = vperm.slane %v1364_v44, 1  ;;  %v1240_v59 = vadd.f32 %v1238_v28, %v1218_v15 }
 0x194   : > { %v1261_v57 = vadd.f32 %v1259_v60, %v1239_v47  ;;  %vm4518_vm0 = vcmp.lt.s32.totalorder %v2280_v39, 94  ;;  %vm4520_vm10 = vnez %v4267_v61  ;;  %v1281_v8 = vsel %vm3864_vm9, %v1274_v24, 0.0 }
 0x195   : > { %v3781_v13 = vpop.permute.xlu1 %1287  ;;  %v3783_v16 = vpop.permute.xlu0 %1285  ;;  %vm4519_vm12 = vmmov %vm4518_vm0  ;;  %vm3997_vm2 = vcmp.eq.s32.totalorder %v1343_v49, 1  ;;  %vm4001_vm6 = vcmp.eq.s32.totalorder %v1344_v1, 1  ;;  %vm4526_vm9 = vcmp.lt.s32.totalorder %v2280_v39, 93  ;;  %v1388_v33 = vperm.slane %v1386_v19, 1 }
 0x196   : > { %v1290_v18 = vsel %vm4518_vm0, %v3783_v16, %v3781_v13  ;;  %v1291_v46 = vsel %vm4519_vm12, %v3781_v13, %v3783_v16  ;;  %vm1405_vm8 = vmand %vm3828_vm15, %vm4520_vm10  ;;  %vm4525_vm12 = vcmp.eq.s32.totalorder %v2347_v50, 1  ;;  %v1387_v13 = vperm.slane %v1386_v19, 0  ;;  %v1398_v2 = vpop.permute.xlu2 %1397 }
 0x197   : > { %v4008_v61 = vsel %vm4525_vm12, %v1380_v63, %v1381_v11  ;;  %v1262_v16 = vadd.f32 %v1260_v14, %v1240_v59  ;;  %vm4527_vm10 = vmmov %vm4526_vm9  ;;  %v1282_v22 = vsel %vm3890_vm3, %v1275_v3, 0.0  ;;  %v1296_v32 = vmul.f32 %v3852_v6, %v1290_v18 }
 0x198   : > { %v1297_v45 = vmul.f32 %v3852_v6, %v1291_v46  ;;  %v1408_v52 = vsel %vm1405_vm8, 1, %v2071_v51  ;;  %v1283_v21 = vadd.f32 %v1281_v8, %v1261_v57  ;;  %vm4021_vm12 = vcmp.eq.s32.totalorder %v1365_v4, 1 }
 0x199   : > { %vm4532_vm3 = vcmp.lt.s32.totalorder %v2280_v39, 83  ;;  %v1284_v48 = vadd.f32 %v1282_v22, %v1262_v16  ;;  %vm4048_vm0 = vcmp.eq.s32.totalorder %v1388_v33, 1  ;;  %v4536_v43 = vmov 0 }
 0x19a   : > { %vm4533_vm8 = vmmov %vm4532_vm3  ;;  %v4537_v43 = vsel %vm4048_vm0, 4294967295, %v4536_v43  ;;  %v1424_v49 = vstv %s3978_s10  ;;  %v1425_v1 = vstv %s3960_s9  ;;  %v1303_v44 = vsel %vm3934_vm14, %v1296_v32, 0.0  ;;  %s1991_s9 = scalar_lea.hbm %s4237_s3, 16 }
 0x19b   : > { %v1410_v28 = vperm.slane %v1408_v52, 1  ;;  %vm4539_vm14 = vnez %v4279_v30  ;;  %v1305_v14 = vadd.f32 %v1303_v44, %v1283_v21  ;;  %v1446_v29 = vstv %s4054_s20 }
 0x19d   : > { %v3894_v25 = vpop.permute.xlu1 %1329  ;;  %v1310_v38 = vpop.permute.xlu0 %1309 }
 0x19e   : > { %v1312_v58 = vsel %vm4526_vm9, %v3619_v41, %v1310_v38  ;;  %v1313_v7 = vsel %vm4527_vm10, %v1310_v38, %v3619_v41  ;;  %vm4025_vm9 = vcmp.eq.s32.totalorder %v1366_v34, 1  ;;  %v1403_v38 = vstv %s3928_s4  ;;  %s1987_s4 = scalar_lea.hbm %s1986_s29, 8 }
 0x19f   : > { %v1318_v10 = vmul.f32 %v3870_v40, %v1312_v58  ;;  %v1319_v6 = vmul.f32 %v3870_v40, %v1313_v7  ;;  %v1334_v26 = vsel %vm4532_vm3, %v3894_v25, %v3749_v27  ;;  %v1335_v15 = vsel %vm4533_vm8, %v3749_v27, %v3894_v25  ;;  %p1988_p1 = scmp.ne.s32.totalorder %s1986_s29, %s1987_s4  ;;  %p1993_p2 = scmp.lt.s32.totalorder %s1991_s9, %s1987_s4 }
 0x1a0   : > { %vm4044_vm10 = vcmp.eq.s32.totalorder %v1387_v13, 1  ;;  %v1409_v40 = vperm.slane %v1408_v52, 0  ;;  %v1304_v27 = vsel %vm3938_vm11, %v1297_v45, 0.0  ;;  %vm4538_vm3 = vcmp.eq.s32.totalorder %v2347_v50, 1  ;;  %vm1427_vm11 = vmand %vm3828_vm15, %vm4539_vm14 }
 0x1a1   : > { %v1404_v25 = vsel %vm4538_vm3, %v1402_v56, %v1403_v38  ;;  %v1340_v60 = vmul.f32 %v3922_v35, %v1334_v26  ;;  %v1341_v24 = vmul.f32 %v3922_v35, %v1335_v15  ;;  %v1325_v9 = vsel %vm3962_vm13, %v1318_v10, 0.0  ;;  %p1989_p4 = pnand %p1988_p1, %p2184_p3  ;;  %p1994_p10 = por %p1993_p2, %p1992_p9 }
 0x1a2   : > { %v1326_v19 = vsel %vm3966_vm5, %v1319_v6, 0.0  ;;  %vm1421_vm8 = vcmp.lt.s32.totalorder %v2280_v39, 79  ;;  %v1426_v35 = vsel %vm4538_vm3, %v1424_v49, %v1425_v1  ;;  %v1306_v3 = vadd.f32 %v1304_v27, %v1284_v48  ;;  %vm1449_vm5 = vmand %vm3828_vm15, %vm4480_vm7 }
 0x1a3   : > { %vm4085_vm0 = vcmp.eq.s32.totalorder %v1409_v40, 1  ;;  %vm4093_vm13 = vcmp.eq.s32.totalorder %v1410_v28, 1  ;;  %v1430_v57 = vsel %vm1427_vm11, 1, %v2071_v51  ;;  %v1348_v46 = vsel %vm4001_vm6, %v1341_v24, 0.0  ;;  %vm1471_vm11 = vmand %vm3828_vm15, %vm4485_vm4  ;;  %p1990_p8 = pneg %p1989_p4 }
 0x1a4   : > { %v1328_v18 = vadd.f32 %v1326_v19, %v1306_v3  ;;  %vm4546_vm3 = vcmp.lt.s32.totalorder %v2280_v39, 80  ;;  %v1431_v16 = vperm.slane %v1430_v57, 0  ;;  %v1432_v58 = vperm.slane %v1430_v57, 1 }
 0x1a5   : > { %v1354_v23 = vpop.permute.xlu1 %1353  ;;  %v1352_v36 = vpop.permute.xlu0 %1351  ;;  %v1447_v7 = vstv %s4042_s17  ;;  %vm4548_vm4 = vnez %v4537_v43  ;;  %v1468_v26 = vstv %s4102_s23  ;;  %v1469_v15 = vstv %s4089_s18  ;;  %p1995_p11 = pnand %p1994_p10, %p1990_p8 }
 0x1a6   : > { %v1356_v47 = vsel %vm1355_vm1, %v1352_v36, %v1354_v23  ;;  %v1357_v63 = vsel %vm1355_vm1, %v1354_v23, %v1352_v36  ;;  %vm4540_vm1 = vcmp.lt.s32.totalorder %v2280_v39, 81  ;;  %v1440_v23 = vpop.permute.xlu2 %1439  ;;  %v1350_v32 = vadd.f32 %v1348_v46, %v1328_v18 }
 0x1a7   : > { %vm4541_vm14 = vmmov %vm4540_vm1  ;;  %v1362_v31 = vmul.f32 %v3958_v54, %v1356_v47  ;;  %v1363_v34 = vmul.f32 %v3958_v54, %v1357_v63  ;;  %v1347_v54 = vsel %vm3997_vm2, %v1340_v60, 0.0  ;;  %vm4145_vm15 = vcmp.eq.s32.totalorder %v1431_v16, 1 }
 0x1a8   : > { %vm4149_vm7 = vcmp.eq.s32.totalorder %v1432_v58, 1  ;;  %vm1443_vm2 = vcmp.lt.s32.totalorder %v2280_v39, 78  ;;  %vm4553_vm6 = vcmp.eq.s32.totalorder %v2347_v50, 1 }
 0x1a9   : > { %v1369_v12 = vsel %vm4021_vm12, %v1362_v31, 0.0  ;;  %v1370_v33 = vsel %vm4025_vm9, %v1363_v34, 0.0  ;;  %v1448_v60 = vsel %vm4553_vm6, %v1446_v29, %v1447_v7 }
 0x1aa   : > { %v1372_v38 = vadd.f32 %v1370_v33, %v1350_v32 }
 0x1ad   : > { %v1396_v11 = vpop.permute.xlu1 %1395  ;;  %v1376_v5 = vpop.permute.xlu0 %1375 }
 0x1ae   : > { %v1378_v30 = vsel %vm4540_vm1, %v3882_v55, %v1376_v5  ;;  %v1379_v4 = vsel %vm4541_vm14, %v1376_v5, %v3882_v55  ;;  %v1327_v55 = vadd.f32 %v1325_v9, %v1305_v14  ;;  %v1400_v13 = vsel %vm4546_vm3, %v1396_v11, %v1398_v2  ;;  %vm4547_vm1 = vmmov %vm4546_vm3  ;;  %v1464_v47 = vpop.permute.xlu2 %1463 }
 0x1af   : > { %v1384_v36 = vmul.f32 %v4008_v61, %v1378_v30  ;;  %v1385_v8 = vmul.f32 %v4008_v61, %v1379_v4  ;;  %v1401_v62 = vsel %vm4547_vm1, %v1398_v2, %v1396_v11  ;;  %v1452_v61 = vsel %vm1449_vm5, 1, %v2071_v51 }
 0x1b0   : > { %v1474_v2 = vsel %vm1471_vm11, 1, %v2071_v51  ;;  %v1349_v22 = vadd.f32 %v1347_v54, %v1327_v55  ;;  %v1406_v45 = vmul.f32 %v1404_v25, %v1400_v13  ;;  %v1407_v52 = vmul.f32 %v1404_v25, %v1401_v62 }
 0x1b1   : > { %v1391_v41 = vsel %vm4044_vm10, %v1384_v36, 0.0  ;;  %v1392_v53 = vsel %vm4548_vm4, %v1385_v8, 0.0  ;;  %v1453_v10 = vperm.slane %v1452_v61, 0  ;;  %v1454_v6 = vperm.slane %v1452_v61, 1  ;;  %vm4558_vm10 = vmmov %vm4553_vm6 }
 0x1b2   : > { %v1371_v51 = vadd.f32 %v1369_v12, %v1349_v22  ;;  %v1475_v48 = vperm.slane %v1474_v2, 0  ;;  %v1476_v40 = vperm.slane %v1474_v2, 1  ;;  %v1394_v20 = vadd.f32 %v1392_v53, %v1372_v38 }
 0x1b3   : > { %v1413_v43 = vsel %vm4085_vm0, %v1406_v45, 0.0  ;;  %v1414_v27 = vsel %vm4093_vm13, %v1407_v52, 0.0  ;;  %vm4156_vm12 = vcmp.eq.s32.totalorder %v1453_v10, 1  ;;  %vm1465_vm0 = vcmp.lt.s32.totalorder %v2280_v39, 77 }
 0x1b4   : > { %v1393_v49 = vadd.f32 %v1391_v41, %v1371_v51  ;;  %vm4161_vm9 = vcmp.eq.s32.totalorder %v1454_v6, 1  ;;  %v1470_v11 = vsel %vm4558_vm10, %v1468_v26, %v1469_v15  ;;  %vm4171_vm14 = vcmp.eq.s32.totalorder %v1476_v40, 1 }
 0x1b5   : > { %v1420_v21 = vpop.permute.xlu1 %1419  ;;  %v1418_v42 = vpop.permute.xlu0 %1417  ;;  %vm1483_vm13 = vcmask 1041408   ;;  %vm4565_vm6 = vcmask 1043456  }
 0x1b6   : > { %v1422_v37 = vsel %vm1421_vm8, %v1418_v42, %v1420_v21  ;;  %v1423_v56 = vsel %vm1421_vm8, %v1420_v21, %v1418_v42  ;;  %vm4167_vm8 = vcmp.eq.s32.totalorder %v1475_v48, 1  ;;  %v1415_v19 = vadd.f32 %v1413_v43, %v1393_v49 }
 0x1b7   : > { %v1428_v1 = vmul.f32 %v1426_v35, %v1422_v37  ;;  %v1429_v44 = vmul.f32 %v1426_v35, %v1423_v56  ;;  %v1416_v35 = vadd.f32 %v1414_v27, %v1394_v20 }
 0x1b9   : > { %v1435_v14 = vsel %vm4145_vm15, %v1428_v1, 0.0  ;;  %v1436_v3 = vsel %vm4149_vm7, %v1429_v44, 0.0 }
 0x1ba   : > { %v1437_v54 = vadd.f32 %v1435_v14, %v1415_v19  ;;  %v1438_v46 = vadd.f32 %v1436_v3, %v1416_v35 }
 0x1bd   : > { %v1442_v30 = vpop.permute.xlu0 %1441  ;;  %v1462_v4 = vpop.permute.xlu1 %1461 }
 0x1be   : > { %v1444_v50 = vsel %vm1443_vm2, %v1440_v23, %v1442_v30  ;;  %v1445_v17 = vsel %vm1443_vm2, %v1442_v30, %v1440_v23  ;;  %v1466_v31 = vsel %vm1465_vm0, %v1462_v4, %v1464_v47  ;;  %v1467_v34 = vsel %vm1465_vm0, %v1464_v47, %v1462_v4 }
 0x1bf   : > { %v1450_v59 = vmul.f32 %v1448_v60, %v1444_v50  ;;  %v1451_v57 = vmul.f32 %v1448_v60, %v1445_v17  ;;  %v1472_v55 = vmul.f32 %v1470_v11, %v1466_v31  ;;  %v1473_v18 = vmul.f32 %v1470_v11, %v1467_v34 }
 0x1c1   : > { %v1457_v36 = vsel %vm4156_vm12, %v1450_v59, 0.0  ;;  %v1458_v8 = vsel %vm4161_vm9, %v1451_v57, 0.0  ;;  %v1479_v13 = vsel %vm4167_vm8, %v1472_v55, 0.0  ;;  %v1480_v39 = vsel %vm4171_vm14, %v1473_v18, 0.0 }
 0x1c2   : > { %v1459_v23 = vadd.f32 %v1457_v36, %v1437_v54  ;;  %v1460_v62 = vadd.f32 %v1458_v8, %v1438_v46 }
 0x1c4   : > { %v1481_v16 = vadd.f32 %v1479_v13, %v1459_v23  ;;  %v1482_v58 = vadd.f32 %v1480_v39, %v1460_v62 }
 0x1c6   : > { %v1484_v29 = vsel %vm1483_vm13, %v1481_v16, 0.0  ;;  %v1491_v7 = vsel %vm1483_vm13, %v1482_v58, 0.0 }
 0x1c7   : > { %v1485_v12 = vrot.slane %v1484_v29, 4  ;;  %v1492_v33 = vrot.slane %v1491_v7, 4 }
 0x1c9   : > { %v1486_v61 = vadd.f32 %v1485_v12, %v1484_v29  ;;  %v1493_v2 = vadd.f32 %v1492_v33, %v1491_v7 }
 0x1cb   : > { %v1487_v22 = vrot.slane %v1486_v61, 2  ;;  %v1494_v32 = vrot.slane %v1493_v2, 2 }
 0x1cd   : > { %v1488_v45 = vadd.f32 %v1487_v22, %v1486_v61  ;;  %v1495_v52 = vadd.f32 %v1494_v32, %v1493_v2 }
 0x1cf   : > { %v1489_v21 = vrot.slane %v1488_v45, 1  ;;  %v1496_v42 = vrot.slane %v1495_v52, 1 }
 0x1d1   : > { %v1490_v41 = vadd.f32 %v1489_v21, %v1488_v45  ;;  %v1497_v53 = vadd.f32 %v1496_v42, %v1495_v52 }
 0x1d3   : > { %v1762_v37 = vmul.f32 -1.442695, %v1490_v41  ;;  %v1763_v56 = vmul.f32 -1.442695, %v1497_v53 }
 0x1d5   : > { %1887 = vpow2.f32 %v1762_v37 }
 0x1d6   : > { %1889 = vpow2.f32 %v1763_v56 }
 0x1db   : > { %v1888_v51 = vpop.eup %1887 }
 0x1dc   : > { %v1890_v38 = vpop.eup %1889  ;;  %v1504_v10 = vadd.f32 1.0, %v1888_v51 }
 0x1dd   : > { %v1505_v6 = vadd.f32 1.0, %v1890_v38 }
 0x1de   : > { %1891 = vrcp.f32 %v1504_v10  ;;  %vm1511_vm3 = vweird.f32 %v1504_v10  ;;  %v1517_v28 = vand.u32 2147483648, %v1504_v10  ;;  %v1515_v24 = vand.u32 2147483647, %v1504_v10 }
 0x1df   : > { %1893 = vrcp.f32 %v1505_v6  ;;  %v1532_v44 = vand.u32 2147483648, %v1505_v6  ;;  %v1530_v27 = vand.u32 2147483647, %v1505_v6  ;;  %vm1526_vm4 = vweird.f32 %v1505_v6 }
 0x1e0   : > { %v1518_v9 = vor.u32 1.1754944e-38, %v1517_v28  ;;  %vm1516_vm2 = vcmp.eq.f32.partialorder %v1515_v24, 8.507059e+37 }
 0x1e1   : > { %v1533_v63 = vor.u32 1.1754944e-38, %v1532_v44  ;;  %vm1531_vm7 = vcmp.eq.f32.partialorder %v1530_v27, 8.507059e+37 }
 0x1e4   : > { %v1892_v26 = vpop.eup %1891 }
 0x1e5   : > { %v1894_v15 = vpop.eup %1893  ;;  %v1507_v48 = vmul.f32 %v1892_v26, %v1504_v10  ;;  %vm1512_vm5 = vweird.f32 %v1892_v26 }
 0x1e6   : > { %v1522_v40 = vmul.f32 %v1894_v15, %v1505_v6  ;;  %vm1527_vm11 = vweird.f32 %v1894_v15  ;;  %vm4192_vm1 = vmor %vm1511_vm3, %vm1512_vm5 }
 0x1e7   : > { %v1508_v49 = vsub.f32 1.0, %v1507_v48  ;;  %vm1528_vm15 = vmor %vm1526_vm4, %vm1527_vm11 }
 0x1e8   : > { %v1523_v20 = vsub.f32 1.0, %v1522_v40 }
 0x1e9   : > { %v1509_v1 = vmul.f32 %v1892_v26, %v1508_v49 }
 0x1ea   : > { %v1524_v43 = vmul.f32 %v1894_v15, %v1523_v20 }
 0x1eb   : > { %v1510_v25 = vadd.f32 %v1892_v26, %v1509_v1 }
 0x1ec   : > { %v1525_v47 = vadd.f32 %v1894_v15, %v1524_v43 }
 0x1ed   : > { %v1514_v11 = vsel %vm4192_vm1, %v1892_v26, %v1510_v25 }
 0x1ee   : > { %v1529_v5 = vsel %vm1528_vm15, %v1894_v15, %v1525_v47  ;;  %v1519_v14 = vsel %vm1516_vm2, %v1518_v9, %v1514_v11 }
 0x1ef   : > { %v1534_v19 = vsel %vm1531_vm7, %v1533_v63, %v1529_v5 }
 0x1f0   : > { %v1538_v35 = vrot.slane %v1534_v19, 4 }
 0x1f2   : > { %v1539_v3 = vsel %vm4565_vm6, %v1519_v14, %v1538_v35 }
 0x1f3   : > { %v1541_v30 = vmul.f32 %v1539_v3, %v2232_v0 }
 0x1f5   : > { %1542 = vst [vmem:[%s217_s16] sm:$0xff] %v1541_v30 }
 0x1f6   : > { %1998 = shalt.err (!%p1995_p11)
}
 0x1f7   : > { %1781 = dma.vmem_to_hbm [thread:$0]  (%p2184_p3), %s1558_s26, 128, %s1560_s27, %s1544_s28  }
 0x1f8 PF: > { %s1571_s8 = sand.u32 1, %s2033_s12   ;;  %p4566_p12 = scmp.ge.s32.totalorder %s2045_s15, 2 }
 0x1f9   : > { %s1572_s20 = scalar_lea.sflag [#allocation4], %s1571_s8 }
 0x1fa   : > { %p1795_p13 = pnand %p4566_p12, %p2153_p6 }
 0x1fc   : > { %p1796_p0 = pneg %p1795_p13 }
 0x1fe   : > { %2028 = dma.done.wait (%p1796_p0), %s1572_s20, 128  }
 0x1ff   : > { %2030 = vsyncadd (%p1796_p0), %s1572_s20, 4294967168  ;;  %p18_p5 = scmp.ge.s32.totalorder %s2174_s30, 4   ;;  %s4567_s12 = smov %s2037_s13 }
 0x200   : > { %s4568_s13 = smov %s2041_s14  ;;  %s4569_s14 = smov %s2190_s7 }
 0x201   : > { %s4570_s15 = smov %s2174_s30  ;;  %20 = sbr.rel (!%p18_p5) target bundleno = 7 (0x7), region = 87 }
 0x206   :  { %1578 = vsyncpa [#allocation3], 1 }
 0x207   :  { %1580 = vsyncpa [#allocation3 + $0x1], 1 }
 0x208   :  { %1581 = vsyncpa [#allocation8], 1 }
 0x209   :  { %1582 = vsyncpa [#allocation4], 1 }
 0x20a   :  { %1584 = vsyncpa [#allocation4 + $0x1], 1 }
 0x20b   :  { %1585 = vsyncpa [#allocation5], 1 }
 0x20c   :  { %1587 = vsyncpa [#allocation5 + $0x1], 1 }

</bundles_post_ra>
